<compile_context>
chip_gen: v5e
topology: v5e:2x2
jax: 0.10.0
libtpu: 0.0.40
codegen_flags: <defaults>
</compile_context>

<pallas_src>
import math

import jax
import jax.numpy as jnp
from jax.experimental import pallas as pl
from jax.experimental.pallas import tpu as pltpu

# ------------------------- synthetic small config -------------------------
NUM_FRAMES = 4                 # temporal_config.frames
IMG_H = IMG_W = 32             # raw frame size
LATENT_C = 8                   # bridgenet.in_channels / image_config.in_channels
LATENT_L = 6                   # bridgenet.latent_image_size
CONV_OUT = 4                   # image_config.out_channels (BridgeNet out channels)
CONV_K = 3
CONV_OH = LATENT_L - CONV_K + 1                 # 4
N_PATCH = CONV_OH * CONV_OH                     # 16
LATENT_DIM = LATENT_C * LATENT_L * LATENT_L     # 288
PIX_DIM = 3 * IMG_H * IMG_W                     # 3072
D_MODEL = CONV_OUT * N_PATCH                    # 64
N_HEAD = 2
HEAD_DIM = D_MODEL // N_HEAD                    # 32
N_HID = 32
N_LAYERS = 2
D_OUT = 16
LN_EPS = 1e-5
MAX_LEN = 64

EMB_SCALE = math.sqrt(D_MODEL)
ATTN_SCALE = 1.0 / math.sqrt(HEAD_DIM)

# -------- packed-slab column offsets (per-layer weight slab, width 384) -----
W_QKV_LO, W_QKV_HI = 0, 3 * D_MODEL          # 0 .. 192   [Wq | Wk | Wv]
W_O_LO, W_O_HI = 192, 256                    # output projection
W_FF1_LO, W_FF1_HI = 256, 320                # FFN linear1 (hidden padded to 64)
W_FF2_LO, W_FF2_HI = 320, 384                # FFN linear2 (hidden padded to 64)
W_SLAB = 384

# -------- packed-slab column offsets (per-layer bias/LN slab, width 640) ----
V_BQKV_LO, V_BQKV_HI = 0, 192
V_BO_LO, V_BO_HI = 192, 256
V_LN1G_LO, V_LN1G_HI = 256, 320
V_LN1B_LO, V_LN1B_HI = 320, 384
V_BFF1_LO, V_BFF1_HI = 384, 448
V_BFF2_LO, V_BFF2_HI = 448, 512
V_LN2G_LO, V_LN2G_HI = 512, 576
V_LN2B_LO, V_LN2B_HI = 576, 640
V_SLAB = 640

# -------- misc vector slab rows (6, 64) -------------------------------------
ROW_PE = 0                       # rows 0..3  : positional encoding for 4 frames
ROW_CB = NUM_FRAMES              # row 4      : folded conv bias
ROW_BOUT = NUM_FRAMES + 1        # row 5      : final head bias (padded to 64)

_VMEM = pl.BlockSpec(memory_space=pltpu.MemorySpace.VMEM)


# ------------------------- Pallas kernel -------------------------
def _layernorm(y, g, b):
    mu = jnp.mean(y, axis=-1, keepdims=True)
    var = jnp.mean((y - mu) ** 2, axis=-1, keepdims=True)
    return (y - mu) * jax.lax.rsqrt(var + LN_EPS) * g + b


def _actron_kernel(x_ref, w_im_ref, b_im_ref, w_front_ref, vec_misc_ref,
                   w_layer_ref, vec_layer_ref, o_ref):
    """Whole Actron forward (encoder proxy + conv + transformer + head) in VMEM."""
    f32, bf16 = jnp.float32, jnp.bfloat16

    # --- ImageEncoder proxy: relu(frames @ W_im + b_im) -> (F, 288) ---------
    lat = jnp.dot(x_ref[...], w_im_ref[...], preferred_element_type=f32)
    lat = jnp.maximum(lat + b_im_ref[...], 0.0)

    # --- BridgeNet conv folded into one (288, 64) matmul + ReLU -------------
    enc = jnp.dot(lat.astype(bf16), w_front_ref[0:LATENT_DIM, :],
                  preferred_element_type=f32)
    enc = jnp.maximum(enc + vec_misc_ref[ROW_CB:ROW_CB + 1, :], 0.0)   # (F, 64)

    # --- scale by sqrt(d_model) + positional encoding (dropout = identity) --
    x = enc * EMB_SCALE + vec_misc_ref[ROW_PE:ROW_PE + NUM_FRAMES, :]

    # --- post-norm transformer encoder layers (static unroll) ---------------
    for l in range(N_LAYERS):
        xb = x.astype(bf16)
        # one wide qkv dot: (F, 64) @ (64, 192)
        qkv = jnp.dot(xb, w_layer_ref[l, :, W_QKV_LO:W_QKV_HI],
                      preferred_element_type=f32)
        qkv = qkv + vec_layer_ref[l, :, V_BQKV_LO:V_BQKV_HI]
        q = qkv[:, 0:D_MODEL]
        k = qkv[:, D_MODEL:2 * D_MODEL]
        v = qkv[:, 2 * D_MODEL:3 * D_MODEL]

        ctx_parts = []
        for h in range(N_HEAD):
            lo, hi = h * HEAD_DIM, (h + 1) * HEAD_DIM
            qh = q[:, lo:hi].astype(bf16)
            kh = k[:, lo:hi].astype(bf16)
            vh = v[:, lo:hi].astype(bf16)
            s = jax.lax.dot_general(qh, kh, (((1,), (1,)), ((), ())),
                                    preferred_element_type=f32) * ATTN_SCALE
            s = s - jnp.max(s, axis=-1, keepdims=True)
            e = jnp.exp(s)
            p = e * pl.reciprocal(jnp.sum(e, axis=-1, keepdims=True), approx=True)
            ctx_parts.append(jnp.dot(p.astype(bf16), vh,
                                     preferred_element_type=f32))     # (F, 32)
        ctx = jnp.concatenate(ctx_parts, axis=-1)                      # (F, 64)

        # one wide output projection: (F, 64) @ (64, 64)
        attn = jnp.dot(ctx.astype(bf16), w_layer_ref[l, :, W_O_LO:W_O_HI],
                       preferred_element_type=f32)
        attn = attn + vec_layer_ref[l, :, V_BO_LO:V_BO_HI]
        x = _layernorm(x + attn,
                       vec_layer_ref[l, :, V_LN1G_LO:V_LN1G_HI],
                       vec_layer_ref[l, :, V_LN1B_LO:V_LN1B_HI])

        # FFN (hidden dim zero-padded 32 -> 64; pads contribute exactly 0)
        ff = jnp.dot(x.astype(bf16), w_layer_ref[l, :, W_FF1_LO:W_FF1_HI],
                     preferred_element_type=f32)
        ff = jnp.maximum(ff + vec_layer_ref[l, :, V_BFF1_LO:V_BFF1_HI], 0.0)
        ff2 = jnp.dot(ff.astype(bf16), w_layer_ref[l, :, W_FF2_LO:W_FF2_HI],
                      preferred_element_type=f32)
        ff2 = ff2 + vec_layer_ref[l, :, V_BFF2_LO:V_BFF2_HI]
        x = _layernorm(x + ff2,
                       vec_layer_ref[l, :, V_LN2G_LO:V_LN2G_HI],
                       vec_layer_ref[l, :, V_LN2B_LO:V_LN2B_HI])

    # --- final Linear head (W_out zero-padded to 64 cols; take first 16) ----
    head = jnp.dot(x.astype(bf16),
                   w_front_ref[LATENT_DIM:LATENT_DIM + D_MODEL, :],
                   preferred_element_type=f32)
    head = head + vec_misc_ref[ROW_BOUT:ROW_BOUT + 1, :]
    o_ref[...] = head[:, 0:D_OUT]


def actron_fused(frames_sel, p):
    """frames_sel: (NUM_FRAMES, 3*H*W) bf16 -> (NUM_FRAMES, D_OUT) f32."""
    return pl.pallas_call(
        _actron_kernel,
        out_shape=jax.ShapeDtypeStruct((NUM_FRAMES, D_OUT), jnp.float32),
        in_specs=[_VMEM] * 7,
        out_specs=_VMEM,
    )(frames_sel, p["im_w"], p["b_im"], p["w_front"], p["vec_misc"],
      p["w_layer"], p["vec_layer"])


# ------------------------- init-time parameter packing -------------------------
def positional_encoding(d_model, max_len):
    pos = jnp.arange(max_len, dtype=jnp.float32)[:, None]
    div = jnp.exp(jnp.arange(0, d_model, 2, dtype=jnp.float32) *
                  (-math.log(10000.0) / d_model))
    pe = jnp.zeros((max_len, d_model), jnp.float32)
    pe = pe.at[:, 0::2].set(jnp.sin(pos * div))
    pe = pe.at[:, 1::2].set(jnp.cos(pos * div))
    return pe


def _fold_conv(conv_w):
    """Conv is linear in the latent: build the exact (288, 64) matrix such that
    latent_flat @ W_eff == Conv2d(latent).flatten() in PyTorch (c, oh, ow) order,
    by pushing the identity basis of the latent through lax.conv (once, at init)."""
    eye = jnp.eye(LATENT_DIM, dtype=jnp.float32)
    basis = eye.reshape(LATENT_DIM, LATENT_C, LATENT_L, LATENT_L)
    out = jax.lax.conv_general_dilated(
        basis, conv_w, window_strides=(1, 1), padding="VALID",
        dimension_numbers=("NCHW", "OIHW", "NCHW"))          # (288, C_out, OH, OW)
    return out.reshape(LATENT_DIM, D_MODEL)                  # (288, 64)


def init_params(key):
    def nrm(k, shape, scale=0.05):
        return scale * jax.random.normal(k, shape, jnp.float32)

    keys = jax.random.split(key, 24)
    it = iter(keys)
    bf16 = jnp.bfloat16
    L, D, NHID = N_LAYERS, D_MODEL, N_HID
    p = {}

    # Image encoder proxy.  swap_weights() deep-copies im_encoder at init time,
    # so static and trainable encoders share identical weights -> one weight.
    p["im_w"] = nrm(next(it), (PIX_DIM, LATENT_DIM), 0.02).astype(bf16)
    p["b_im"] = nrm(next(it), (1, LATENT_DIM), 0.02)

    # BridgeNet conv (shared across frames: [BridgeNet(...)] * num_frames),
    # folded into a dense effective matrix + bias once at init.
    conv_w = nrm(next(it), (CONV_OUT, LATENT_C, CONV_K, CONV_K), 0.1)
    conv_b = nrm(next(it), (CONV_OUT,), 0.1)
    w_conv_eff = _fold_conv(conv_w)                           # (288, 64)
    cb_eff = jnp.repeat(conv_b, N_PATCH)                      # (64,) in (c,oh,ow) order

    # Transformer encoder layers.
    w_q = nrm(next(it), (L, D, D))
    w_k = nrm(next(it), (L, D, D))
    w_v = nrm(next(it), (L, D, D))
    b_q = nrm(next(it), (L, D), 0.01)
    b_k = nrm(next(it), (L, D), 0.01)
    b_v = nrm(next(it), (L, D), 0.01)
    w_o = nrm(next(it), (L, D, D))
    b_o = nrm(next(it), (L, D), 0.01)
    ln1_g = jnp.ones((L, D), jnp.float32)
    ln1_b = jnp.zeros((L, D), jnp.float32)
    w_ff1 = nrm(next(it), (L, D, NHID))
    b_ff1 = nrm(next(it), (L, NHID), 0.01)
    w_ff2 = nrm(next(it), (L, NHID, D))
    b_ff2 = nrm(next(it), (L, D), 0.01)
    ln2_g = jnp.ones((L, D), jnp.float32)
    ln2_b = jnp.zeros((L, D), jnp.float32)
    w_out = nrm(next(it), (D, D_OUT))
    b_out = nrm(next(it), (D_OUT,), 0.01)
    pe = positional_encoding(D, MAX_LEN)

    # ---- pack per-layer weight slab (L, 64, 384), bf16 (MXU inputs) --------
    w_qkv = jnp.concatenate([w_q, w_k, w_v], axis=-1)                 # (L, 64, 192)
    w_ff1_pad = jnp.pad(w_ff1, ((0, 0), (0, 0), (0, D - NHID)))       # (L, 64, 64)
    w_ff2_pad = jnp.pad(w_ff2, ((0, 0), (0, D - NHID), (0, 0)))       # (L, 64, 64)
    p["w_layer"] = jnp.concatenate(
        [w_qkv, w_o, w_ff1_pad, w_ff2_pad], axis=-1).astype(bf16)     # (L, 64, 384)

    # ---- pack per-layer bias/LN slab (L, 1, 640), f32 -----------------------
    b_qkv = jnp.concatenate([b_q, b_k, b_v], axis=-1)                 # (L, 192)
    b_ff1_pad = jnp.pad(b_ff1, ((0, 0), (0, D - NHID)))               # (L, 64)
    vec_layer = jnp.concatenate(
        [b_qkv, b_o, ln1_g, ln1_b, b_ff1_pad, b_ff2, ln2_g, ln2_b], axis=-1)
    p["vec_layer"] = vec_layer.reshape(L, 1, V_SLAB)                  # (L, 1, 640)

    # ---- pack front weights (folded conv + padded head) and misc vectors ----
    w_out_pad = jnp.pad(w_out, ((0, 0), (0, D - D_OUT)))              # (64, 64)
    p["w_front"] = jnp.concatenate(
        [w_conv_eff, w_out_pad], axis=0).astype(bf16)                 # (352, 64)
    b_out_pad = jnp.pad(b_out, (0, D - D_OUT))                        # (64,)
    p["vec_misc"] = jnp.concatenate(
        [pe[:NUM_FRAMES], cb_eff[None, :], b_out_pad[None, :]], axis=0)  # (6, 64)
    return p


# ------------------------- wrapper -------------------------
def _actron_forward(inp_frames, p):
    t = inp_frames.shape[0]
    half = NUM_FRAMES // 2
    # Frame selection, matching the PyTorch code literally:
    #   initial = frames[:half], middle = frames[half+1], final = frames[-half:],
    #   then zip(frame_set, self.conv) truncates to the first num_frames frames.
    # For t=5 this is [0, 1, 3, 3]; frames 2 and 4 are never used (as in PyTorch).
    sel = (list(range(half)) + [half + 1] + list(range(t - half, t)))[:NUM_FRAMES]
    frames_flat = inp_frames.reshape(t, -1)[jnp.array(sel)]           # (F, 3072)
    frames_flat = frames_flat.astype(jnp.bfloat16)
    out = actron_fused(frames_flat, p)                                 # (F, 16)
    return out.reshape(NUM_FRAMES, 1, D_OUT)


actron_forward = jax.jit(_actron_forward)


if __name__ == "__main__":
    key = jax.random.PRNGKey(0)
    k_in, k_par = jax.random.split(key)
    # 5 frames so that initial (2) + middle (1) + final (2) matches the slicing.
    inp_frames = jax.random.normal(k_in, (5, 1, 3, IMG_H, IMG_W), jnp.float32)
    params = init_params(k_par)
    out = actron_forward(inp_frames, params)
    out = jax.block_until_ready(out)
    assert out.shape == (NUM_FRAMES, 1, D_OUT), out.shape
    assert bool(jnp.all(jnp.isfinite(out)))
    print("KERNEL_OK")
</pallas_src>

<mosaic_0001>
module attributes {stable_mosaic.version = 11 : i64} {
  func.func @_actron_kernel(%arg0: memref<4x3072xbf16, #tpu.memory_space<vmem>>, %arg1: memref<3072x288xbf16, #tpu.memory_space<vmem>>, %arg2: memref<1x288xf32, #tpu.memory_space<vmem>>, %arg3: memref<352x64xbf16, #tpu.memory_space<vmem>>, %arg4: memref<6x64xf32, #tpu.memory_space<vmem>>, %arg5: memref<2x64x384xbf16, #tpu.memory_space<vmem>>, %arg6: memref<2x1x640xf32, #tpu.memory_space<vmem>>, %arg7: memref<4x16xf32, #tpu.memory_space<vmem>>) attributes {dimension_semantics = [], scalar_prefetch = 0 : i64, scratch_operands = 0 : i64, tpu.core_type = #tpu.core_type<tc>} {
    %c0 = arith.constant 0 : index
    %c0_0 = arith.constant 0 : index
    %0 = vector.load %arg0[%c0, %c0_0] : memref<4x3072xbf16, #tpu.memory_space<vmem>>, vector<4x3072xbf16>
    %c0_1 = arith.constant 0 : index
    %c0_2 = arith.constant 0 : index
    %1 = vector.load %arg1[%c0_1, %c0_2] : memref<3072x288xbf16, #tpu.memory_space<vmem>>, vector<3072x288xbf16>
    %cst = arith.constant dense<0.000000e+00> : vector<4x288xf32>
    %2 = tpu.matmul %0, %1, %cst {dimension_numbers = #tpu.dot_dimension_numbers<[1], [0], [0], [1], [0, 0, 1, 1], [], []>} : vector<4x3072xbf16>, vector<3072x288xbf16>, vector<4x288xf32> -> vector<4x288xf32>
    %c0_3 = arith.constant 0 : index
    %c0_4 = arith.constant 0 : index
    %3 = vector.load %arg2[%c0_3, %c0_4] : memref<1x288xf32, #tpu.memory_space<vmem>>, vector<1x288xf32>
    %4 = vector.broadcast %3 : vector<1x288xf32> to vector<4x288xf32>
    %5 = arith.addf %2, %4 : vector<4x288xf32>
    %cst_5 = arith.constant 0.000000e+00 : f32
    %6 = vector.broadcast %cst_5 : f32 to vector<4x288xf32>
    %7 = arith.maximumf %5, %6 : vector<4x288xf32>
    %8 = arith.truncf %7 : vector<4x288xf32> to vector<4x288xbf16>
    %c0_6 = arith.constant 0 : index
    %c0_7 = arith.constant 0 : index
    %9 = vector.load %arg3[%c0_6, %c0_7] : memref<352x64xbf16, #tpu.memory_space<vmem>>, vector<288x64xbf16>
    %cst_8 = arith.constant dense<0.000000e+00> : vector<4x64xf32>
    %10 = tpu.matmul %8, %9, %cst_8 {dimension_numbers = #tpu.dot_dimension_numbers<[1], [0], [0], [1], [0, 0, 1, 1], [], []>} : vector<4x288xbf16>, vector<288x64xbf16>, vector<4x64xf32> -> vector<4x64xf32>
    %c4 = arith.constant 4 : index
    %c0_9 = arith.constant 0 : index
    %11 = vector.load %arg4[%c4, %c0_9] : memref<6x64xf32, #tpu.memory_space<vmem>>, vector<1x64xf32>
    %12 = vector.broadcast %11 : vector<1x64xf32> to vector<4x64xf32>
    %13 = arith.addf %10, %12 : vector<4x64xf32>
    %cst_10 = arith.constant 0.000000e+00 : f32
    %14 = vector.broadcast %cst_10 : f32 to vector<4x64xf32>
    %15 = arith.maximumf %13, %14 : vector<4x64xf32>
    %cst_11 = arith.constant 8.000000e+00 : f32
    %16 = vector.broadcast %cst_11 : f32 to vector<4x64xf32>
    %17 = arith.mulf %15, %16 : vector<4x64xf32>
    %c0_12 = arith.constant 0 : index
    %c0_13 = arith.constant 0 : index
    %18 = vector.load %arg4[%c0_12, %c0_13] : memref<6x64xf32, #tpu.memory_space<vmem>>, vector<4x64xf32>
    %19 = arith.addf %17, %18 : vector<4x64xf32>
    %20 = arith.truncf %19 : vector<4x64xf32> to vector<4x64xbf16>
    %c0_14 = arith.constant 0 : index
    %c0_15 = arith.constant 0 : index
    %c0_16 = arith.constant 0 : index
    %21 = vector.load %arg5[%c0_14, %c0_15, %c0_16] : memref<2x64x384xbf16, #tpu.memory_space<vmem>>, vector<1x64x192xbf16>
    %22 = vector.shape_cast %21 : vector<1x64x192xbf16> to vector<64x192xbf16>
    %cst_17 = arith.constant dense<0.000000e+00> : vector<4x192xf32>
    %23 = tpu.matmul %20, %22, %cst_17 {dimension_numbers = #tpu.dot_dimension_numbers<[1], [0], [0], [1], [0, 0, 1, 1], [], []>} : vector<4x64xbf16>, vector<64x192xbf16>, vector<4x192xf32> -> vector<4x192xf32>
    %c0_18 = arith.constant 0 : index
    %c0_19 = arith.constant 0 : index
    %c0_20 = arith.constant 0 : index
    %24 = vector.load %arg6[%c0_18, %c0_19, %c0_20] : memref<2x1x640xf32, #tpu.memory_space<vmem>>, vector<1x1x192xf32>
    %25 = vector.shape_cast %24 : vector<1x1x192xf32> to vector<1x192xf32>
    %26 = vector.broadcast %25 : vector<1x192xf32> to vector<4x192xf32>
    %27 = arith.addf %23, %26 : vector<4x192xf32>
    %28 = vector.extract_strided_slice %27 {offsets = [0, 0], sizes = [4, 64], strides = [1, 1]} : vector<4x192xf32> to vector<4x64xf32>
    %29 = vector.extract_strided_slice %27 {offsets = [0, 64], sizes = [4, 64], strides = [1, 1]} : vector<4x192xf32> to vector<4x64xf32>
    %30 = vector.extract_strided_slice %27 {offsets = [0, 128], sizes = [4, 64], strides = [1, 1]} : vector<4x192xf32> to vector<4x64xf32>
    %31 = vector.extract_strided_slice %28 {offsets = [0, 0], sizes = [4, 32], strides = [1, 1]} : vector<4x64xf32> to vector<4x32xf32>
    %32 = arith.truncf %31 : vector<4x32xf32> to vector<4x32xbf16>
    %33 = vector.extract_strided_slice %29 {offsets = [0, 0], sizes = [4, 32], strides = [1, 1]} : vector<4x64xf32> to vector<4x32xf32>
    %34 = arith.truncf %33 : vector<4x32xf32> to vector<4x32xbf16>
    %35 = vector.extract_strided_slice %30 {offsets = [0, 0], sizes = [4, 32], strides = [1, 1]} : vector<4x64xf32> to vector<4x32xf32>
    %36 = arith.truncf %35 : vector<4x32xf32> to vector<4x32xbf16>
    %cst_21 = arith.constant dense<0.000000e+00> : vector<4x4xf32>
    %37 = tpu.matmul %32, %34, %cst_21 {dimension_numbers = #tpu.dot_dimension_numbers<[1], [1], [0], [0], [0, 0, 1, 0], [], []>} : vector<4x32xbf16>, vector<4x32xbf16>, vector<4x4xf32> -> vector<4x4xf32>
    %cst_22 = arith.constant 0.176776692 : f32
    %38 = vector.broadcast %cst_22 : f32 to vector<4x4xf32>
    %39 = arith.mulf %37, %38 : vector<4x4xf32>
    %cst_23 = arith.constant dense<0xFF800000> : vector<4xf32>
    %40 = vector.multi_reduction <maximumf>, %39, %cst_23 [1] : vector<4x4xf32> to vector<4xf32>
    %41 = vector.shape_cast %40 : vector<4xf32> to vector<4x1xf32>
    %42 = vector.broadcast %41 : vector<4x1xf32> to vector<4x4xf32>
    %43 = arith.subf %39, %42 : vector<4x4xf32>
    %44 = math.exp %43 : vector<4x4xf32>
    %cst_24 = arith.constant dense<0.000000e+00> : vector<4xf32>
    %45 = vector.multi_reduction <add>, %44, %cst_24 [1] : vector<4x4xf32> to vector<4xf32>
    %46 = vector.shape_cast %45 : vector<4xf32> to vector<4x1xf32>
    %47 = tpu.reciprocal %46 {approx = true} : vector<4x1xf32> -> vector<4x1xf32>
    %48 = vector.broadcast %47 : vector<4x1xf32> to vector<4x4xf32>
    %49 = arith.mulf %44, %48 : vector<4x4xf32>
    %50 = arith.truncf %49 : vector<4x4xf32> to vector<4x4xbf16>
    %cst_25 = arith.constant dense<0.000000e+00> : vector<4x32xf32>
    %51 = tpu.matmul %50, %36, %cst_25 {dimension_numbers = #tpu.dot_dimension_numbers<[1], [0], [0], [1], [0, 0, 1, 1], [], []>} : vector<4x4xbf16>, vector<4x32xbf16>, vector<4x32xf32> -> vector<4x32xf32>
    %52 = vector.extract_strided_slice %28 {offsets = [0, 32], sizes = [4, 32], strides = [1, 1]} : vector<4x64xf32> to vector<4x32xf32>
    %53 = arith.truncf %52 : vector<4x32xf32> to vector<4x32xbf16>
    %54 = vector.extract_strided_slice %29 {offsets = [0, 32], sizes = [4, 32], strides = [1, 1]} : vector<4x64xf32> to vector<4x32xf32>
    %55 = arith.truncf %54 : vector<4x32xf32> to vector<4x32xbf16>
    %56 = vector.extract_strided_slice %30 {offsets = [0, 32], sizes = [4, 32], strides = [1, 1]} : vector<4x64xf32> to vector<4x32xf32>
    %57 = arith.truncf %56 : vector<4x32xf32> to vector<4x32xbf16>
    %cst_26 = arith.constant dense<0.000000e+00> : vector<4x4xf32>
    %58 = tpu.matmul %53, %55, %cst_26 {dimension_numbers = #tpu.dot_dimension_numbers<[1], [1], [0], [0], [0, 0, 1, 0], [], []>} : vector<4x32xbf16>, vector<4x32xbf16>, vector<4x4xf32> -> vector<4x4xf32>
    %cst_27 = arith.constant 0.176776692 : f32
    %59 = vector.broadcast %cst_27 : f32 to vector<4x4xf32>
    %60 = arith.mulf %58, %59 : vector<4x4xf32>
    %cst_28 = arith.constant dense<0xFF800000> : vector<4xf32>
    %61 = vector.multi_reduction <maximumf>, %60, %cst_28 [1] : vector<4x4xf32> to vector<4xf32>
    %62 = vector.shape_cast %61 : vector<4xf32> to vector<4x1xf32>
    %63 = vector.broadcast %62 : vector<4x1xf32> to vector<4x4xf32>
    %64 = arith.subf %60, %63 : vector<4x4xf32>
    %65 = math.exp %64 : vector<4x4xf32>
    %cst_29 = arith.constant dense<0.000000e+00> : vector<4xf32>
    %66 = vector.multi_reduction <add>, %65, %cst_29 [1] : vector<4x4xf32> to vector<4xf32>
    %67 = vector.shape_cast %66 : vector<4xf32> to vector<4x1xf32>
    %68 = tpu.reciprocal %67 {approx = true} : vector<4x1xf32> -> vector<4x1xf32>
    %69 = vector.broadcast %68 : vector<4x1xf32> to vector<4x4xf32>
    %70 = arith.mulf %65, %69 : vector<4x4xf32>
    %71 = arith.truncf %70 : vector<4x4xf32> to vector<4x4xbf16>
    %cst_30 = arith.constant dense<0.000000e+00> : vector<4x32xf32>
    %72 = tpu.matmul %71, %57, %cst_30 {dimension_numbers = #tpu.dot_dimension_numbers<[1], [0], [0], [1], [0, 0, 1, 1], [], []>} : vector<4x4xbf16>, vector<4x32xbf16>, vector<4x32xf32> -> vector<4x32xf32>
    %73 = tpu.concatenate %51, %72 in 1 : vector<4x32xf32>, vector<4x32xf32> -> vector<4x64xf32>
    %74 = arith.truncf %73 : vector<4x64xf32> to vector<4x64xbf16>
    %c0_31 = arith.constant 0 : index
    %c0_32 = arith.constant 0 : index
    %c192 = arith.constant 192 : index
    %75 = vector.load %arg5[%c0_31, %c0_32, %c192] : memref<2x64x384xbf16, #tpu.memory_space<vmem>>, vector<1x64x64xbf16>
    %76 = vector.shape_cast %75 : vector<1x64x64xbf16> to vector<64x64xbf16>
    %cst_33 = arith.constant dense<0.000000e+00> : vector<4x64xf32>
    %77 = tpu.matmul %74, %76, %cst_33 {dimension_numbers = #tpu.dot_dimension_numbers<[1], [0], [0], [1], [0, 0, 1, 1], [], []>} : vector<4x64xbf16>, vector<64x64xbf16>, vector<4x64xf32> -> vector<4x64xf32>
    %c0_34 = arith.constant 0 : index
    %c0_35 = arith.constant 0 : index
    %c192_36 = arith.constant 192 : index
    %78 = vector.load %arg6[%c0_34, %c0_35, %c192_36] : memref<2x1x640xf32, #tpu.memory_space<vmem>>, vector<1x1x64xf32>
    %79 = vector.shape_cast %78 : vector<1x1x64xf32> to vector<1x64xf32>
    %80 = vector.broadcast %79 : vector<1x64xf32> to vector<4x64xf32>
    %81 = arith.addf %77, %80 : vector<4x64xf32>
    %82 = arith.addf %19, %81 : vector<4x64xf32>
    %c0_37 = arith.constant 0 : index
    %c0_38 = arith.constant 0 : index
    %c256 = arith.constant 256 : index
    %83 = vector.load %arg6[%c0_37, %c0_38, %c256] : memref<2x1x640xf32, #tpu.memory_space<vmem>>, vector<1x1x64xf32>
    %84 = vector.shape_cast %83 : vector<1x1x64xf32> to vector<1x64xf32>
    %c0_39 = arith.constant 0 : index
    %c0_40 = arith.constant 0 : index
    %c320 = arith.constant 320 : index
    %85 = vector.load %arg6[%c0_39, %c0_40, %c320] : memref<2x1x640xf32, #tpu.memory_space<vmem>>, vector<1x1x64xf32>
    %86 = vector.shape_cast %85 : vector<1x1x64xf32> to vector<1x64xf32>
    %cst_41 = arith.constant dense<0.000000e+00> : vector<4xf32>
    %87 = vector.multi_reduction <add>, %82, %cst_41 [1] : vector<4x64xf32> to vector<4xf32>
    %88 = vector.shape_cast %87 : vector<4xf32> to vector<4x1xf32>
    %cst_42 = arith.constant 6.400000e+01 : f32
    %89 = vector.broadcast %cst_42 : f32 to vector<4x1xf32>
    %90 = arith.divf %88, %89 : vector<4x1xf32>
    %91 = vector.broadcast %90 : vector<4x1xf32> to vector<4x64xf32>
    %92 = arith.subf %82, %91 : vector<4x64xf32>
    %93 = arith.mulf %92, %92 : vector<4x64xf32>
    %cst_43 = arith.constant dense<0.000000e+00> : vector<4xf32>
    %94 = vector.multi_reduction <add>, %93, %cst_43 [1] : vector<4x64xf32> to vector<4xf32>
    %95 = vector.shape_cast %94 : vector<4xf32> to vector<4x1xf32>
    %cst_44 = arith.constant 6.400000e+01 : f32
    %96 = vector.broadcast %cst_44 : f32 to vector<4x1xf32>
    %97 = arith.divf %95, %96 : vector<4x1xf32>
    %98 = vector.broadcast %90 : vector<4x1xf32> to vector<4x64xf32>
    %99 = arith.subf %82, %98 : vector<4x64xf32>
    %cst_45 = arith.constant 9.99999974E-6 : f32
    %100 = vector.broadcast %cst_45 : f32 to vector<4x1xf32>
    %101 = arith.addf %97, %100 : vector<4x1xf32>
    %102 = math.rsqrt %101 : vector<4x1xf32>
    %103 = vector.broadcast %102 : vector<4x1xf32> to vector<4x64xf32>
    %104 = arith.mulf %99, %103 : vector<4x64xf32>
    %105 = vector.broadcast %84 : vector<1x64xf32> to vector<4x64xf32>
    %106 = arith.mulf %104, %105 : vector<4x64xf32>
    %107 = vector.broadcast %86 : vector<1x64xf32> to vector<4x64xf32>
    %108 = arith.addf %106, %107 : vector<4x64xf32>
    %109 = arith.truncf %108 : vector<4x64xf32> to vector<4x64xbf16>
    %c0_46 = arith.constant 0 : index
    %c0_47 = arith.constant 0 : index
    %c256_48 = arith.constant 256 : index
    %110 = vector.load %arg5[%c0_46, %c0_47, %c256_48] : memref<2x64x384xbf16, #tpu.memory_space<vmem>>, vector<1x64x64xbf16>
    %111 = vector.shape_cast %110 : vector<1x64x64xbf16> to vector<64x64xbf16>
    %cst_49 = arith.constant dense<0.000000e+00> : vector<4x64xf32>
    %112 = tpu.matmul %109, %111, %cst_49 {dimension_numbers = #tpu.dot_dimension_numbers<[1], [0], [0], [1], [0, 0, 1, 1], [], []>} : vector<4x64xbf16>, vector<64x64xbf16>, vector<4x64xf32> -> vector<4x64xf32>
    %c0_50 = arith.constant 0 : index
    %c0_51 = arith.constant 0 : index
    %c384 = arith.constant 384 : index
    %113 = vector.load %arg6[%c0_50, %c0_51, %c384] : memref<2x1x640xf32, #tpu.memory_space<vmem>>, vector<1x1x64xf32>
    %114 = vector.shape_cast %113 : vector<1x1x64xf32> to vector<1x64xf32>
    %115 = vector.broadcast %114 : vector<1x64xf32> to vector<4x64xf32>
    %116 = arith.addf %112, %115 : vector<4x64xf32>
    %cst_52 = arith.constant 0.000000e+00 : f32
    %117 = vector.broadcast %cst_52 : f32 to vector<4x64xf32>
    %118 = arith.maximumf %116, %117 : vector<4x64xf32>
    %119 = arith.truncf %118 : vector<4x64xf32> to vector<4x64xbf16>
    %c0_53 = arith.constant 0 : index
    %c0_54 = arith.constant 0 : index
    %c320_55 = arith.constant 320 : index
    %120 = vector.load %arg5[%c0_53, %c0_54, %c320_55] : memref<2x64x384xbf16, #tpu.memory_space<vmem>>, vector<1x64x64xbf16>
    %121 = vector.shape_cast %120 : vector<1x64x64xbf16> to vector<64x64xbf16>
    %cst_56 = arith.constant dense<0.000000e+00> : vector<4x64xf32>
    %122 = tpu.matmul %119, %121, %cst_56 {dimension_numbers = #tpu.dot_dimension_numbers<[1], [0], [0], [1], [0, 0, 1, 1], [], []>} : vector<4x64xbf16>, vector<64x64xbf16>, vector<4x64xf32> -> vector<4x64xf32>
    %c0_57 = arith.constant 0 : index
    %c0_58 = arith.constant 0 : index
    %c448 = arith.constant 448 : index
    %123 = vector.load %arg6[%c0_57, %c0_58, %c448] : memref<2x1x640xf32, #tpu.memory_space<vmem>>, vector<1x1x64xf32>
    %124 = vector.shape_cast %123 : vector<1x1x64xf32> to vector<1x64xf32>
    %125 = vector.broadcast %124 : vector<1x64xf32> to vector<4x64xf32>
    %126 = arith.addf %122, %125 : vector<4x64xf32>
    %127 = arith.addf %108, %126 : vector<4x64xf32>
    %c0_59 = arith.constant 0 : index
    %c0_60 = arith.constant 0 : index
    %c512 = arith.constant 512 : index
    %128 = vector.load %arg6[%c0_59, %c0_60, %c512] : memref<2x1x640xf32, #tpu.memory_space<vmem>>, vector<1x1x64xf32>
    %129 = vector.shape_cast %128 : vector<1x1x64xf32> to vector<1x64xf32>
    %c0_61 = arith.constant 0 : index
    %c0_62 = arith.constant 0 : index
    %c576 = arith.constant 576 : index
    %130 = vector.load %arg6[%c0_61, %c0_62, %c576] : memref<2x1x640xf32, #tpu.memory_space<vmem>>, vector<1x1x64xf32>
    %131 = vector.shape_cast %130 : vector<1x1x64xf32> to vector<1x64xf32>
    %cst_63 = arith.constant dense<0.000000e+00> : vector<4xf32>
    %132 = vector.multi_reduction <add>, %127, %cst_63 [1] : vector<4x64xf32> to vector<4xf32>
    %133 = vector.shape_cast %132 : vector<4xf32> to vector<4x1xf32>
    %cst_64 = arith.constant 6.400000e+01 : f32
    %134 = vector.broadcast %cst_64 : f32 to vector<4x1xf32>
    %135 = arith.divf %133, %134 : vector<4x1xf32>
    %136 = vector.broadcast %135 : vector<4x1xf32> to vector<4x64xf32>
    %137 = arith.subf %127, %136 : vector<4x64xf32>
    %138 = arith.mulf %137, %137 : vector<4x64xf32>
    %cst_65 = arith.constant dense<0.000000e+00> : vector<4xf32>
    %139 = vector.multi_reduction <add>, %138, %cst_65 [1] : vector<4x64xf32> to vector<4xf32>
    %140 = vector.shape_cast %139 : vector<4xf32> to vector<4x1xf32>
    %cst_66 = arith.constant 6.400000e+01 : f32
    %141 = vector.broadcast %cst_66 : f32 to vector<4x1xf32>
    %142 = arith.divf %140, %141 : vector<4x1xf32>
    %143 = vector.broadcast %135 : vector<4x1xf32> to vector<4x64xf32>
    %144 = arith.subf %127, %143 : vector<4x64xf32>
    %cst_67 = arith.constant 9.99999974E-6 : f32
    %145 = vector.broadcast %cst_67 : f32 to vector<4x1xf32>
    %146 = arith.addf %142, %145 : vector<4x1xf32>
    %147 = math.rsqrt %146 : vector<4x1xf32>
    %148 = vector.broadcast %147 : vector<4x1xf32> to vector<4x64xf32>
    %149 = arith.mulf %144, %148 : vector<4x64xf32>
    %150 = vector.broadcast %129 : vector<1x64xf32> to vector<4x64xf32>
    %151 = arith.mulf %149, %150 : vector<4x64xf32>
    %152 = vector.broadcast %131 : vector<1x64xf32> to vector<4x64xf32>
    %153 = arith.addf %151, %152 : vector<4x64xf32>
    %154 = arith.truncf %153 : vector<4x64xf32> to vector<4x64xbf16>
    %c1 = arith.constant 1 : index
    %c0_68 = arith.constant 0 : index
    %c0_69 = arith.constant 0 : index
    %155 = vector.load %arg5[%c1, %c0_68, %c0_69] : memref<2x64x384xbf16, #tpu.memory_space<vmem>>, vector<1x64x192xbf16>
    %156 = vector.shape_cast %155 : vector<1x64x192xbf16> to vector<64x192xbf16>
    %cst_70 = arith.constant dense<0.000000e+00> : vector<4x192xf32>
    %157 = tpu.matmul %154, %156, %cst_70 {dimension_numbers = #tpu.dot_dimension_numbers<[1], [0], [0], [1], [0, 0, 1, 1], [], []>} : vector<4x64xbf16>, vector<64x192xbf16>, vector<4x192xf32> -> vector<4x192xf32>
    %c1_71 = arith.constant 1 : index
    %c0_72 = arith.constant 0 : index
    %c0_73 = arith.constant 0 : index
    %158 = vector.load %arg6[%c1_71, %c0_72, %c0_73] : memref<2x1x640xf32, #tpu.memory_space<vmem>>, vector<1x1x192xf32>
    %159 = vector.shape_cast %158 : vector<1x1x192xf32> to vector<1x192xf32>
    %160 = vector.broadcast %159 : vector<1x192xf32> to vector<4x192xf32>
    %161 = arith.addf %157, %160 : vector<4x192xf32>
    %162 = vector.extract_strided_slice %161 {offsets = [0, 0], sizes = [4, 64], strides = [1, 1]} : vector<4x192xf32> to vector<4x64xf32>
    %163 = vector.extract_strided_slice %161 {offsets = [0, 64], sizes = [4, 64], strides = [1, 1]} : vector<4x192xf32> to vector<4x64xf32>
    %164 = vector.extract_strided_slice %161 {offsets = [0, 128], sizes = [4, 64], strides = [1, 1]} : vector<4x192xf32> to vector<4x64xf32>
    %165 = vector.extract_strided_slice %162 {offsets = [0, 0], sizes = [4, 32], strides = [1, 1]} : vector<4x64xf32> to vector<4x32xf32>
    %166 = arith.truncf %165 : vector<4x32xf32> to vector<4x32xbf16>
    %167 = vector.extract_strided_slice %163 {offsets = [0, 0], sizes = [4, 32], strides = [1, 1]} : vector<4x64xf32> to vector<4x32xf32>
    %168 = arith.truncf %167 : vector<4x32xf32> to vector<4x32xbf16>
    %169 = vector.extract_strided_slice %164 {offsets = [0, 0], sizes = [4, 32], strides = [1, 1]} : vector<4x64xf32> to vector<4x32xf32>
    %170 = arith.truncf %169 : vector<4x32xf32> to vector<4x32xbf16>
    %cst_74 = arith.constant dense<0.000000e+00> : vector<4x4xf32>
    %171 = tpu.matmul %166, %168, %cst_74 {dimension_numbers = #tpu.dot_dimension_numbers<[1], [1], [0], [0], [0, 0, 1, 0], [], []>} : vector<4x32xbf16>, vector<4x32xbf16>, vector<4x4xf32> -> vector<4x4xf32>
    %cst_75 = arith.constant 0.176776692 : f32
    %172 = vector.broadcast %cst_75 : f32 to vector<4x4xf32>
    %173 = arith.mulf %171, %172 : vector<4x4xf32>
    %cst_76 = arith.constant dense<0xFF800000> : vector<4xf32>
    %174 = vector.multi_reduction <maximumf>, %173, %cst_76 [1] : vector<4x4xf32> to vector<4xf32>
    %175 = vector.shape_cast %174 : vector<4xf32> to vector<4x1xf32>
    %176 = vector.broadcast %175 : vector<4x1xf32> to vector<4x4xf32>
    %177 = arith.subf %173, %176 : vector<4x4xf32>
    %178 = math.exp %177 : vector<4x4xf32>
    %cst_77 = arith.constant dense<0.000000e+00> : vector<4xf32>
    %179 = vector.multi_reduction <add>, %178, %cst_77 [1] : vector<4x4xf32> to vector<4xf32>
    %180 = vector.shape_cast %179 : vector<4xf32> to vector<4x1xf32>
    %181 = tpu.reciprocal %180 {approx = true} : vector<4x1xf32> -> vector<4x1xf32>
    %182 = vector.broadcast %181 : vector<4x1xf32> to vector<4x4xf32>
    %183 = arith.mulf %178, %182 : vector<4x4xf32>
    %184 = arith.truncf %183 : vector<4x4xf32> to vector<4x4xbf16>
    %cst_78 = arith.constant dense<0.000000e+00> : vector<4x32xf32>
    %185 = tpu.matmul %184, %170, %cst_78 {dimension_numbers = #tpu.dot_dimension_numbers<[1], [0], [0], [1], [0, 0, 1, 1], [], []>} : vector<4x4xbf16>, vector<4x32xbf16>, vector<4x32xf32> -> vector<4x32xf32>
    %186 = vector.extract_strided_slice %162 {offsets = [0, 32], sizes = [4, 32], strides = [1, 1]} : vector<4x64xf32> to vector<4x32xf32>
    %187 = arith.truncf %186 : vector<4x32xf32> to vector<4x32xbf16>
    %188 = vector.extract_strided_slice %163 {offsets = [0, 32], sizes = [4, 32], strides = [1, 1]} : vector<4x64xf32> to vector<4x32xf32>
    %189 = arith.truncf %188 : vector<4x32xf32> to vector<4x32xbf16>
    %190 = vector.extract_strided_slice %164 {offsets = [0, 32], sizes = [4, 32], strides = [1, 1]} : vector<4x64xf32> to vector<4x32xf32>
    %191 = arith.truncf %190 : vector<4x32xf32> to vector<4x32xbf16>
    %cst_79 = arith.constant dense<0.000000e+00> : vector<4x4xf32>
    %192 = tpu.matmul %187, %189, %cst_79 {dimension_numbers = #tpu.dot_dimension_numbers<[1], [1], [0], [0], [0, 0, 1, 0], [], []>} : vector<4x32xbf16>, vector<4x32xbf16>, vector<4x4xf32> -> vector<4x4xf32>
    %cst_80 = arith.constant 0.176776692 : f32
    %193 = vector.broadcast %cst_80 : f32 to vector<4x4xf32>
    %194 = arith.mulf %192, %193 : vector<4x4xf32>
    %cst_81 = arith.constant dense<0xFF800000> : vector<4xf32>
    %195 = vector.multi_reduction <maximumf>, %194, %cst_81 [1] : vector<4x4xf32> to vector<4xf32>
    %196 = vector.shape_cast %195 : vector<4xf32> to vector<4x1xf32>
    %197 = vector.broadcast %196 : vector<4x1xf32> to vector<4x4xf32>
    %198 = arith.subf %194, %197 : vector<4x4xf32>
    %199 = math.exp %198 : vector<4x4xf32>
    %cst_82 = arith.constant dense<0.000000e+00> : vector<4xf32>
    %200 = vector.multi_reduction <add>, %199, %cst_82 [1] : vector<4x4xf32> to vector<4xf32>
    %201 = vector.shape_cast %200 : vector<4xf32> to vector<4x1xf32>
    %202 = tpu.reciprocal %201 {approx = true} : vector<4x1xf32> -> vector<4x1xf32>
    %203 = vector.broadcast %202 : vector<4x1xf32> to vector<4x4xf32>
    %204 = arith.mulf %199, %203 : vector<4x4xf32>
    %205 = arith.truncf %204 : vector<4x4xf32> to vector<4x4xbf16>
    %cst_83 = arith.constant dense<0.000000e+00> : vector<4x32xf32>
    %206 = tpu.matmul %205, %191, %cst_83 {dimension_numbers = #tpu.dot_dimension_numbers<[1], [0], [0], [1], [0, 0, 1, 1], [], []>} : vector<4x4xbf16>, vector<4x32xbf16>, vector<4x32xf32> -> vector<4x32xf32>
    %207 = tpu.concatenate %185, %206 in 1 : vector<4x32xf32>, vector<4x32xf32> -> vector<4x64xf32>
    %208 = arith.truncf %207 : vector<4x64xf32> to vector<4x64xbf16>
    %c1_84 = arith.constant 1 : index
    %c0_85 = arith.constant 0 : index
    %c192_86 = arith.constant 192 : index
    %209 = vector.load %arg5[%c1_84, %c0_85, %c192_86] : memref<2x64x384xbf16, #tpu.memory_space<vmem>>, vector<1x64x64xbf16>
    %210 = vector.shape_cast %209 : vector<1x64x64xbf16> to vector<64x64xbf16>
    %cst_87 = arith.constant dense<0.000000e+00> : vector<4x64xf32>
    %211 = tpu.matmul %208, %210, %cst_87 {dimension_numbers = #tpu.dot_dimension_numbers<[1], [0], [0], [1], [0, 0, 1, 1], [], []>} : vector<4x64xbf16>, vector<64x64xbf16>, vector<4x64xf32> -> vector<4x64xf32>
    %c1_88 = arith.constant 1 : index
    %c0_89 = arith.constant 0 : index
    %c192_90 = arith.constant 192 : index
    %212 = vector.load %arg6[%c1_88, %c0_89, %c192_90] : memref<2x1x640xf32, #tpu.memory_space<vmem>>, vector<1x1x64xf32>
    %213 = vector.shape_cast %212 : vector<1x1x64xf32> to vector<1x64xf32>
    %214 = vector.broadcast %213 : vector<1x64xf32> to vector<4x64xf32>
    %215 = arith.addf %211, %214 : vector<4x64xf32>
    %216 = arith.addf %153, %215 : vector<4x64xf32>
    %c1_91 = arith.constant 1 : index
    %c0_92 = arith.constant 0 : index
    %c256_93 = arith.constant 256 : index
    %217 = vector.load %arg6[%c1_91, %c0_92, %c256_93] : memref<2x1x640xf32, #tpu.memory_space<vmem>>, vector<1x1x64xf32>
    %218 = vector.shape_cast %217 : vector<1x1x64xf32> to vector<1x64xf32>
    %c1_94 = arith.constant 1 : index
    %c0_95 = arith.constant 0 : index
    %c320_96 = arith.constant 320 : index
    %219 = vector.load %arg6[%c1_94, %c0_95, %c320_96] : memref<2x1x640xf32, #tpu.memory_space<vmem>>, vector<1x1x64xf32>
    %220 = vector.shape_cast %219 : vector<1x1x64xf32> to vector<1x64xf32>
    %cst_97 = arith.constant dense<0.000000e+00> : vector<4xf32>
    %221 = vector.multi_reduction <add>, %216, %cst_97 [1] : vector<4x64xf32> to vector<4xf32>
    %222 = vector.shape_cast %221 : vector<4xf32> to vector<4x1xf32>
    %cst_98 = arith.constant 6.400000e+01 : f32
    %223 = vector.broadcast %cst_98 : f32 to vector<4x1xf32>
    %224 = arith.divf %222, %223 : vector<4x1xf32>
    %225 = vector.broadcast %224 : vector<4x1xf32> to vector<4x64xf32>
    %226 = arith.subf %216, %225 : vector<4x64xf32>
    %227 = arith.mulf %226, %226 : vector<4x64xf32>
    %cst_99 = arith.constant dense<0.000000e+00> : vector<4xf32>
    %228 = vector.multi_reduction <add>, %227, %cst_99 [1] : vector<4x64xf32> to vector<4xf32>
    %229 = vector.shape_cast %228 : vector<4xf32> to vector<4x1xf32>
    %cst_100 = arith.constant 6.400000e+01 : f32
    %230 = vector.broadcast %cst_100 : f32 to vector<4x1xf32>
    %231 = arith.divf %229, %230 : vector<4x1xf32>
    %232 = vector.broadcast %224 : vector<4x1xf32> to vector<4x64xf32>
    %233 = arith.subf %216, %232 : vector<4x64xf32>
    %cst_101 = arith.constant 9.99999974E-6 : f32
    %234 = vector.broadcast %cst_101 : f32 to vector<4x1xf32>
    %235 = arith.addf %231, %234 : vector<4x1xf32>
    %236 = math.rsqrt %235 : vector<4x1xf32>
    %237 = vector.broadcast %236 : vector<4x1xf32> to vector<4x64xf32>
    %238 = arith.mulf %233, %237 : vector<4x64xf32>
    %239 = vector.broadcast %218 : vector<1x64xf32> to vector<4x64xf32>
    %240 = arith.mulf %238, %239 : vector<4x64xf32>
    %241 = vector.broadcast %220 : vector<1x64xf32> to vector<4x64xf32>
    %242 = arith.addf %240, %241 : vector<4x64xf32>
    %243 = arith.truncf %242 : vector<4x64xf32> to vector<4x64xbf16>
    %c1_102 = arith.constant 1 : index
    %c0_103 = arith.constant 0 : index
    %c256_104 = arith.constant 256 : index
    %244 = vector.load %arg5[%c1_102, %c0_103, %c256_104] : memref<2x64x384xbf16, #tpu.memory_space<vmem>>, vector<1x64x64xbf16>
    %245 = vector.shape_cast %244 : vector<1x64x64xbf16> to vector<64x64xbf16>
    %cst_105 = arith.constant dense<0.000000e+00> : vector<4x64xf32>
    %246 = tpu.matmul %243, %245, %cst_105 {dimension_numbers = #tpu.dot_dimension_numbers<[1], [0], [0], [1], [0, 0, 1, 1], [], []>} : vector<4x64xbf16>, vector<64x64xbf16>, vector<4x64xf32> -> vector<4x64xf32>
    %c1_106 = arith.constant 1 : index
    %c0_107 = arith.constant 0 : index
    %c384_108 = arith.constant 384 : index
    %247 = vector.load %arg6[%c1_106, %c0_107, %c384_108] : memref<2x1x640xf32, #tpu.memory_space<vmem>>, vector<1x1x64xf32>
    %248 = vector.shape_cast %247 : vector<1x1x64xf32> to vector<1x64xf32>
    %249 = vector.broadcast %248 : vector<1x64xf32> to vector<4x64xf32>
    %250 = arith.addf %246, %249 : vector<4x64xf32>
    %cst_109 = arith.constant 0.000000e+00 : f32
    %251 = vector.broadcast %cst_109 : f32 to vector<4x64xf32>
    %252 = arith.maximumf %250, %251 : vector<4x64xf32>
    %253 = arith.truncf %252 : vector<4x64xf32> to vector<4x64xbf16>
    %c1_110 = arith.constant 1 : index
    %c0_111 = arith.constant 0 : index
    %c320_112 = arith.constant 320 : index
    %254 = vector.load %arg5[%c1_110, %c0_111, %c320_112] : memref<2x64x384xbf16, #tpu.memory_space<vmem>>, vector<1x64x64xbf16>
    %255 = vector.shape_cast %254 : vector<1x64x64xbf16> to vector<64x64xbf16>
    %cst_113 = arith.constant dense<0.000000e+00> : vector<4x64xf32>
    %256 = tpu.matmul %253, %255, %cst_113 {dimension_numbers = #tpu.dot_dimension_numbers<[1], [0], [0], [1], [0, 0, 1, 1], [], []>} : vector<4x64xbf16>, vector<64x64xbf16>, vector<4x64xf32> -> vector<4x64xf32>
    %c1_114 = arith.constant 1 : index
    %c0_115 = arith.constant 0 : index
    %c448_116 = arith.constant 448 : index
    %257 = vector.load %arg6[%c1_114, %c0_115, %c448_116] : memref<2x1x640xf32, #tpu.memory_space<vmem>>, vector<1x1x64xf32>
    %258 = vector.shape_cast %257 : vector<1x1x64xf32> to vector<1x64xf32>
    %259 = vector.broadcast %258 : vector<1x64xf32> to vector<4x64xf32>
    %260 = arith.addf %256, %259 : vector<4x64xf32>
    %261 = arith.addf %242, %260 : vector<4x64xf32>
    %c1_117 = arith.constant 1 : index
    %c0_118 = arith.constant 0 : index
    %c512_119 = arith.constant 512 : index
    %262 = vector.load %arg6[%c1_117, %c0_118, %c512_119] : memref<2x1x640xf32, #tpu.memory_space<vmem>>, vector<1x1x64xf32>
    %263 = vector.shape_cast %262 : vector<1x1x64xf32> to vector<1x64xf32>
    %c1_120 = arith.constant 1 : index
    %c0_121 = arith.constant 0 : index
    %c576_122 = arith.constant 576 : index
    %264 = vector.load %arg6[%c1_120, %c0_121, %c576_122] : memref<2x1x640xf32, #tpu.memory_space<vmem>>, vector<1x1x64xf32>
    %265 = vector.shape_cast %264 : vector<1x1x64xf32> to vector<1x64xf32>
    %cst_123 = arith.constant dense<0.000000e+00> : vector<4xf32>
    %266 = vector.multi_reduction <add>, %261, %cst_123 [1] : vector<4x64xf32> to vector<4xf32>
    %267 = vector.shape_cast %266 : vector<4xf32> to vector<4x1xf32>
    %cst_124 = arith.constant 6.400000e+01 : f32
    %268 = vector.broadcast %cst_124 : f32 to vector<4x1xf32>
    %269 = arith.divf %267, %268 : vector<4x1xf32>
    %270 = vector.broadcast %269 : vector<4x1xf32> to vector<4x64xf32>
    %271 = arith.subf %261, %270 : vector<4x64xf32>
    %272 = arith.mulf %271, %271 : vector<4x64xf32>
    %cst_125 = arith.constant dense<0.000000e+00> : vector<4xf32>
    %273 = vector.multi_reduction <add>, %272, %cst_125 [1] : vector<4x64xf32> to vector<4xf32>
    %274 = vector.shape_cast %273 : vector<4xf32> to vector<4x1xf32>
    %cst_126 = arith.constant 6.400000e+01 : f32
    %275 = vector.broadcast %cst_126 : f32 to vector<4x1xf32>
    %276 = arith.divf %274, %275 : vector<4x1xf32>
    %277 = vector.broadcast %269 : vector<4x1xf32> to vector<4x64xf32>
    %278 = arith.subf %261, %277 : vector<4x64xf32>
    %cst_127 = arith.constant 9.99999974E-6 : f32
    %279 = vector.broadcast %cst_127 : f32 to vector<4x1xf32>
    %280 = arith.addf %276, %279 : vector<4x1xf32>
    %281 = math.rsqrt %280 : vector<4x1xf32>
    %282 = vector.broadcast %281 : vector<4x1xf32> to vector<4x64xf32>
    %283 = arith.mulf %278, %282 : vector<4x64xf32>
    %284 = vector.broadcast %263 : vector<1x64xf32> to vector<4x64xf32>
    %285 = arith.mulf %283, %284 : vector<4x64xf32>
    %286 = vector.broadcast %265 : vector<1x64xf32> to vector<4x64xf32>
    %287 = arith.addf %285, %286 : vector<4x64xf32>
    %288 = arith.truncf %287 : vector<4x64xf32> to vector<4x64xbf16>
    %c288 = arith.constant 288 : index
    %c0_128 = arith.constant 0 : index
    %289 = vector.load %arg3[%c288, %c0_128] : memref<352x64xbf16, #tpu.memory_space<vmem>>, vector<64x64xbf16>
    %cst_129 = arith.constant dense<0.000000e+00> : vector<4x64xf32>
    %290 = tpu.matmul %288, %289, %cst_129 {dimension_numbers = #tpu.dot_dimension_numbers<[1], [0], [0], [1], [0, 0, 1, 1], [], []>} : vector<4x64xbf16>, vector<64x64xbf16>, vector<4x64xf32> -> vector<4x64xf32>
    %c5 = arith.constant 5 : index
    %c0_130 = arith.constant 0 : index
    %291 = vector.load %arg4[%c5, %c0_130] : memref<6x64xf32, #tpu.memory_space<vmem>>, vector<1x64xf32>
    %292 = vector.broadcast %291 : vector<1x64xf32> to vector<4x64xf32>
    %293 = arith.addf %290, %292 : vector<4x64xf32>
    %294 = vector.extract_strided_slice %293 {offsets = [0, 0], sizes = [4, 16], strides = [1, 1]} : vector<4x64xf32> to vector<4x16xf32>
    %c0_131 = arith.constant 0 : index
    %c0_132 = arith.constant 0 : index
    %295 = vector.load %arg7[%c0_131, %c0_132] : memref<4x16xf32, #tpu.memory_space<vmem>>, vector<4x16xf32>
    tpu.vector_store %arg7[%c0_131, %c0_132], %294 {strides = array<i32>} : memref<4x16xf32, #tpu.memory_space<vmem>>, vector<4x16xf32>,
    return
  }
}

</mosaic_0001>

<bundles_post_ra>
// kernel: _actron_forward.1
= control target key start
LH: loop header
LB: loop body
LE: loop exit
PB: predicated region body
PF: predicated region fallthrough
CT: control target
= control target key end

     0   :  { %s13321_s0 = inlined_call_operand.vmem [shape: bf16[4,3072], index: 0, kind: input, shape index: {}]   ;;  %s13322_s1 = inlined_call_operand.vmem [shape: bf16[3072,288], index: 1, kind: input, shape index: {}]   ;;  %s13323_s2 = inlined_call_operand.vmem [shape: f32[1,288], index: 2, kind: input, shape index: {}]   ;;  %s13324_s3 = inlined_call_operand.vmem [shape: bf16[352,64], index: 3, kind: input, shape index: {}]   ;;  %s13325_s4 = inlined_call_operand.vmem [shape: f32[6,64], index: 4, kind: input, shape index: {}]   ;;  %s13326_s5 = inlined_call_operand.vmem [shape: bf16[2,64,384], index: 5, kind: input, shape index: {}]   ;;  %s13327_s6 = inlined_call_operand.vmem [shape: f32[2,1,640], index: 6, kind: input, shape index: {}]   ;;  %s13328_s7 = inlined_call_operand.hbm [shape: f32[4,16], index: 7, kind: output, shape index: {}]  }
   0x1   :  { %v6079_v0 = vld [vmem:[%s13322_s1 + $0xa8] sm:$0xf]  ;;  %v8584_v1 = vld [vmem:[%s13322_s1 + $0xb0] sm:$0xf0]  ;;  %v6067_v11 = vld [vmem:[%s13322_s1 + $0x90] sm:$0xf] }
   0x2   :  { %v6175_v2 = vld [vmem:[%s13322_s1 + $0x168] sm:$0xf]  ;;  %v6080_v3 = vor.u32 %v8584_v1, %v6079_v0  ;;  %v8608_v4 = vld [vmem:[%s13322_s1 + $0x170] sm:$0xf0]  ;;  %v8581_v13 = vld [vmem:[%s13322_s1 + $0x98] sm:$0xf0] }
   0x3   :  { %v6271_v5 = vld [vmem:[%s13322_s1 + $0x228] sm:$0xf]  ;;  %v8632_v6 = vld [vmem:[%s13322_s1 + $0x230] sm:$0xf0]  ;;  %v6176_v7 = vor.u32 %v8608_v4, %v6175_v2  ;;  %v6163_v14 = vld [vmem:[%s13322_s1 + $0x150] sm:$0xf]  ;;  %v6068_v16 = vor.u32 %v8581_v13, %v6067_v11 }
   0x4   :  { %v6272_v8 = vor.u32 %v8632_v6, %v6271_v5  ;;  %v6367_v9 = vld [vmem:[%s13322_s1 + $0x2e8] sm:$0xf]  ;;  %v8656_v10 = vld [vmem:[%s13322_s1 + $0x2f0] sm:$0xf0]  ;;  %3943 = vmatpush.bf16.msra.mxu0 %v6080_v3  ;;  %v8605_v15 = vld [vmem:[%s13322_s1 + $0x158] sm:$0xf0] }
   0x5   :  { %v6368_v12 = vor.u32 %v8656_v10, %v6367_v9  ;;  %3956 = vmatpush.bf16.msra.mxu1 %v6176_v7  ;;  %v6164_v17 = vor.u32 %v8605_v15, %v6163_v14  ;;  %v6259_v18 = vld [vmem:[%s13322_s1 + $0x210] sm:$0xf]  ;;  %v8629_v19 = vld [vmem:[%s13322_s1 + $0x218] sm:$0xf0]  ;;  %v6055_v23 = vld [vmem:[%s13322_s1 + $0x78] sm:$0xf] }
   0x6   :  { %3969 = vmatpush.bf16.msra.mxu2 %v6272_v8  ;;  %v6355_v20 = vld [vmem:[%s13322_s1 + $0x2d0] sm:$0xf]  ;;  %v6260_v21 = vor.u32 %v8629_v19, %v6259_v18  ;;  %v8653_v22 = vld [vmem:[%s13322_s1 + $0x2d8] sm:$0xf0]  ;;  %v8578_v24 = vld [vmem:[%s13322_s1 + $0x80] sm:$0xf0] }
   0x7   :  { %3982 = vmatpush.bf16.msra.mxu3 %v6368_v12  ;;  %v6356_v25 = vor.u32 %v8653_v22, %v6355_v20  ;;  %v6151_v26 = vld [vmem:[%s13322_s1 + $0x138] sm:$0xf]  ;;  %v8602_v27 = vld [vmem:[%s13322_s1 + $0x140] sm:$0xf0]  ;;  %v6056_v29 = vor.u32 %v8578_v24, %v6055_v23  ;;  %v6043_v35 = vld [vmem:[%s13322_s1 + $0x60] sm:$0xf] }
   0x8   :  { %v6247_v28 = vld [vmem:[%s13322_s1 + $0x1f8] sm:$0xf]  ;;  %3944 = vmatpush.bf16.msra.mxu0 %v6068_v16  ;;  %v8626_v30 = vld [vmem:[%s13322_s1 + $0x200] sm:$0xf0]  ;;  %v6152_v33 = vor.u32 %v8602_v27, %v6151_v26  ;;  %v8575_v36 = vld [vmem:[%s13322_s1 + $0x68] sm:$0xf0] }
   0x9   :  { %v6343_v31 = vld [vmem:[%s13322_s1 + $0x2b8] sm:$0xf]  ;;  %v8650_v32 = vld [vmem:[%s13322_s1 + $0x2c0] sm:$0xf0]  ;;  %3957 = vmatpush.bf16.msra.mxu1 %v6164_v17  ;;  %v6248_v34 = vor.u32 %v8626_v30, %v6247_v28  ;;  %v6139_v37 = vld [vmem:[%s13322_s1 + $0x120] sm:$0xf]  ;;  %v6044_v44 = vor.u32 %v8575_v36, %v6043_v35 }
   0xa   :  { %3970 = vmatpush.bf16.msra.mxu2 %v6260_v21  ;;  %v6344_v38 = vor.u32 %v8650_v32, %v6343_v31  ;;  %v8599_v39 = vld [vmem:[%s13322_s1 + $0x128] sm:$0xf0]  ;;  %v6235_v40 = vld [vmem:[%s13322_s1 + $0x1e0] sm:$0xf]  ;;  %v6031_v47 = vld [vmem:[%s13322_s1 + $0x48] sm:$0xf] }
   0xb   :  { %3983 = vmatpush.bf16.msra.mxu3 %v6356_v25  ;;  %v8623_v41 = vld [vmem:[%s13322_s1 + $0x1e8] sm:$0xf0]  ;;  %v6331_v42 = vld [vmem:[%s13322_s1 + $0x2a0] sm:$0xf]  ;;  %v6140_v45 = vor.u32 %v8599_v39, %v6139_v37  ;;  %v8572_v48 = vld [vmem:[%s13322_s1 + $0x50] sm:$0xf0] }
   0xc   :  { %v8647_v43 = vld [vmem:[%s13322_s1 + $0x2a8] sm:$0xf0]  ;;  %3945 = vmatpush.bf16.msra.mxu0 %v6056_v29  ;;  %v6236_v46 = vor.u32 %v8623_v41, %v6235_v40  ;;  %v6127_v49 = vld [vmem:[%s13322_s1 + $0x108] sm:$0xf]  ;;  %v8596_v51 = vld [vmem:[%s13322_s1 + $0x110] sm:$0xf0]  ;;  %v6032_v56 = vor.u32 %v8572_v48, %v6031_v47 }
   0xd   :  { %3958 = vmatpush.bf16.msra.mxu1 %v6152_v33  ;;  %v6332_v50 = vor.u32 %v8647_v43, %v6331_v42  ;;  %v6223_v52 = vld [vmem:[%s13322_s1 + $0x1c8] sm:$0xf]  ;;  %v8620_v53 = vld [vmem:[%s13322_s1 + $0x1d0] sm:$0xf0]  ;;  %v6128_v57 = vor.u32 %v8596_v51, %v6127_v49  ;;  %v6019_v59 = vld [vmem:[%s13322_s1 + $0x30] sm:$0xf] }
   0xe   :  { %3971 = vmatpush.bf16.msra.mxu2 %v6248_v34  ;;  %v6319_v54 = vld [vmem:[%s13322_s1 + $0x288] sm:$0xf]  ;;  %v8644_v55 = vld [vmem:[%s13322_s1 + $0x290] sm:$0xf0]  ;;  %v6224_v58 = vor.u32 %v8620_v53, %v6223_v52  ;;  %v8569_v60 = vld [vmem:[%s13322_s1 + $0x38] sm:$0xf0] }
   0xf   :  { %3984 = vmatpush.bf16.msra.mxu3 %v6344_v38  ;;  %v6115_v61 = vld [vmem:[%s13322_s1 + $0xf0] sm:$0xf]  ;;  %v6320_v62 = vor.u32 %v8644_v55, %v6319_v54  ;;  %v8593_v63 = vld [vmem:[%s13322_s1 + $0xf8] sm:$0xf0]  ;;  %v6020_v4 = vor.u32 %v8569_v60, %v6019_v59  ;;  %v6007_v7 = vld [vmem:[%s13322_s1 + $0x18] sm:$0xf] }
  0x10   :  { %3946 = vmatpush.bf16.msra.mxu0 %v6044_v44  ;;  %v6211_v0 = vld [vmem:[%s13322_s1 + $0x1b0] sm:$0xf]  ;;  %v8617_v1 = vld [vmem:[%s13322_s1 + $0x1b8] sm:$0xf0]  ;;  %v6116_v5 = vor.u32 %v8593_v63, %v6115_v61  ;;  %v8566_v8 = vld [vmem:[%s13322_s1 + $0x20] sm:$0xf0] }
  0x11   :  { %3959 = vmatpush.bf16.msra.mxu1 %v6140_v45  ;;  %v6307_v2 = vld [vmem:[%s13322_s1 + $0x270] sm:$0xf]  ;;  %v8641_v3 = vld [vmem:[%s13322_s1 + $0x278] sm:$0xf0]  ;;  %v6212_v6 = vor.u32 %v8617_v1, %v6211_v0  ;;  %v6103_v9 = vld [vmem:[%s13322_s1 + $0xd8] sm:$0xf]  ;;  %v6008_v16 = vor.u32 %v8566_v8, %v6007_v7 }
  0x12   :  { %3972 = vmatpush.bf16.msra.mxu2 %v6236_v46  ;;  %v6308_v10 = vor.u32 %v8641_v3, %v6307_v2  ;;  %v8590_v11 = vld [vmem:[%s13322_s1 + $0xe0] sm:$0xf0]  ;;  %v6199_v12 = vld [vmem:[%s13322_s1 + $0x198] sm:$0xf]  ;;  %v5995_v17 = vld [vmem:[%s13322_s1] sm:$0xf] }
  0x13   :  { %3985 = vmatpush.bf16.msra.mxu3 %v6332_v50  ;;  %v8614_v13 = vld [vmem:[%s13322_s1 + $0x1a0] sm:$0xf0]  ;;  %v6295_v14 = vld [vmem:[%s13322_s1 + $0x258] sm:$0xf]  ;;  %v8563_v18 = vld [vmem:[%s13322_s1 + $0x8] sm:$0xf0]  ;;  %v6104_v19 = vor.u32 %v8590_v11, %v6103_v9 }
  0x14   :  { %3947 = vmatpush.bf16.msra.mxu0 %v6032_v56  ;;  %v8638_v15 = vld [vmem:[%s13322_s1 + $0x260] sm:$0xf0]  ;;  %v6200_v20 = vor.u32 %v8614_v13, %v6199_v12  ;;  %v6091_v21 = vld [vmem:[%s13322_s1 + $0xc0] sm:$0xf]  ;;  %v8587_v22 = vld [vmem:[%s13322_s1 + $0xc8] sm:$0xf0]  ;;  %v5996_v31 = vor.u32 %v8563_v18, %v5995_v17 }
  0x15   :  { %3960 = vmatpush.bf16.msra.mxu1 %v6128_v57  ;;  %v6187_v23 = vld [vmem:[%s13322_s1 + $0x180] sm:$0xf]  ;;  %v6296_v24 = vor.u32 %v8638_v15, %v6295_v14  ;;  %v8611_v25 = vld [vmem:[%s13322_s1 + $0x188] sm:$0xf0]  ;;  %v6463_v28 = vld [vmem:[%s13322_s1 + $0x3a8] sm:$0xf]  ;;  %v6092_v35 = vor.u32 %v8587_v22, %v6091_v21 }
  0x16   :  { %3973 = vmatpush.bf16.msra.mxu2 %v6224_v58  ;;  %v6283_v26 = vld [vmem:[%s13322_s1 + $0x240] sm:$0xf]  ;;  %v8635_v27 = vld [vmem:[%s13322_s1 + $0x248] sm:$0xf0]  ;;  %v8680_v29 = vld [vmem:[%s13322_s1 + $0x3b0] sm:$0xf0]  ;;  %v6188_v36 = vor.u32 %v8611_v25, %v6187_v23 }
  0x17   :  { %3986 = vmatpush.bf16.msra.mxu3 %v6320_v62  ;;  %v6559_v30 = vld [vmem:[%s13322_s1 + $0x468] sm:$0xf]  ;;  %v8704_v32 = vld [vmem:[%s13322_s1 + $0x470] sm:$0xf0]  ;;  %v6284_v39 = vor.u32 %v8635_v27, %v6283_v26  ;;  %v6464_v40 = vor.u32 %v8680_v29, %v6463_v28  ;;  %v6451_v43 = vld [vmem:[%s13322_s1 + $0x390] sm:$0xf] }
  0x18   :  { %3948 = vmatpush.bf16.msra.mxu0 %v6020_v4  ;;  %v6655_v33 = vld [vmem:[%s13322_s1 + $0x528] sm:$0xf]  ;;  %v8728_v34 = vld [vmem:[%s13322_s1 + $0x530] sm:$0xf0]  ;;  %v6560_v41 = vor.u32 %v8704_v32, %v6559_v30  ;;  %v8677_v44 = vld [vmem:[%s13322_s1 + $0x398] sm:$0xf0] }
  0x19   :  { %3961 = vmatpush.bf16.msra.mxu1 %v6116_v5  ;;  %v6751_v37 = vld [vmem:[%s13322_s1 + $0x5e8] sm:$0xf]  ;;  %v8752_v38 = vld [vmem:[%s13322_s1 + $0x5f0] sm:$0xf0]  ;;  %v6656_v42 = vor.u32 %v8728_v34, %v6655_v33  ;;  %v6547_v45 = vld [vmem:[%s13322_s1 + $0x450] sm:$0xf]  ;;  %v6452_v52 = vor.u32 %v8677_v44, %v6451_v43 }
  0x1a   :  { %3974 = vmatpush.bf16.msra.mxu2 %v6212_v6  ;;  %v6752_v46 = vor.u32 %v8752_v38, %v6751_v37  ;;  %v8701_v47 = vld [vmem:[%s13322_s1 + $0x458] sm:$0xf0]  ;;  %v6643_v48 = vld [vmem:[%s13322_s1 + $0x510] sm:$0xf]  ;;  %v6439_v55 = vld [vmem:[%s13322_s1 + $0x378] sm:$0xf] }
  0x1b   :  { %3987 = vmatpush.bf16.msra.mxu3 %v6308_v10  ;;  %v8725_v49 = vld [vmem:[%s13322_s1 + $0x518] sm:$0xf0]  ;;  %v6739_v50 = vld [vmem:[%s13322_s1 + $0x5d0] sm:$0xf]  ;;  %v6548_v53 = vor.u32 %v8701_v47, %v6547_v45  ;;  %v8674_v56 = vld [vmem:[%s13322_s1 + $0x380] sm:$0xf0] }
  0x1c   :  { %3949 = vmatpush.bf16.msra.mxu0 %v6008_v16  ;;  %v8749_v51 = vld [vmem:[%s13322_s1 + $0x5d8] sm:$0xf0]  ;;  %v6644_v54 = vor.u32 %v8725_v49, %v6643_v48  ;;  %v6535_v57 = vld [vmem:[%s13322_s1 + $0x438] sm:$0xf]  ;;  %v8698_v59 = vld [vmem:[%s13322_s1 + $0x440] sm:$0xf0]  ;;  %v6440_v0 = vor.u32 %v8674_v56, %v6439_v55 }
  0x1d   :  { %3962 = vmatpush.bf16.msra.mxu1 %v6104_v19  ;;  %v6740_v58 = vor.u32 %v8749_v51, %v6739_v50  ;;  %v6631_v60 = vld [vmem:[%s13322_s1 + $0x4f8] sm:$0xf]  ;;  %v8722_v61 = vld [vmem:[%s13322_s1 + $0x500] sm:$0xf0]  ;;  %v6427_v1 = vld [vmem:[%s13322_s1 + $0x360] sm:$0xf]  ;;  %v6536_v3 = vor.u32 %v8698_v59, %v6535_v57 }
  0x1e   :  { %3975 = vmatpush.bf16.msra.mxu2 %v6200_v20  ;;  %v6727_v62 = vld [vmem:[%s13322_s1 + $0x5b8] sm:$0xf]  ;;  %v8746_v63 = vld [vmem:[%s13322_s1 + $0x5c0] sm:$0xf0]  ;;  %v6632_v4 = vor.u32 %v8722_v61, %v6631_v60  ;;  %v8671_v5 = vld [vmem:[%s13322_s1 + $0x368] sm:$0xf0] }
  0x1f   :  { %3988 = vmatpush.bf16.msra.mxu3 %v6296_v24  ;;  %v28_v2 = vld [vmem:[%s13321_s0] sm:$0xff]  ;;  %v6728_v7 = vor.u32 %v8746_v63, %v6727_v62  ;;  %v8695_v8 = vld [vmem:[%s13322_s1 + $0x428] sm:$0xf0]  ;;  %v6428_v13 = vor.u32 %v8671_v5, %v6427_v1  ;;  %v6415_v14 = vld [vmem:[%s13322_s1 + $0x348] sm:$0xf] }
  0x20   :  { %3950 = vmatpush.bf16.msra.mxu0 %v5996_v31  ;;  %v6523_v6 = vld [vmem:[%s13322_s1 + $0x420] sm:$0xf]  ;;  %811 = vst [vmem:[#allocation1] ss:$4 sm:$0xff] %v28_v2  ;;  %v8719_v10 = vld [vmem:[%s13322_s1 + $0x4e8] sm:$0xf0] }
  0x21   :  { %3963 = vmatpush.bf16.msra.mxu1 %v6092_v35  ;;  %v6619_v9 = vld [vmem:[%s13322_s1 + $0x4e0] sm:$0xf]  ;;  %v8743_v12 = vld [vmem:[%s13322_s1 + $0x5a8] sm:$0xf0]  ;;  %v8668_v15 = vld [vmem:[%s13322_s1 + $0x350] sm:$0xf0]  ;;  %v6524_v16 = vor.u32 %v8695_v8, %v6523_v6 }
  0x22   :  { %3976 = vmatpush.bf16.msra.mxu2 %v6188_v36  ;;  %v6715_v11 = vld [vmem:[%s13322_s1 + $0x5a0] sm:$0xf]  ;;  %v6620_v17 = vor.u32 %v8719_v10, %v6619_v9  ;;  %v6511_v18 = vld [vmem:[%s13322_s1 + $0x408] sm:$0xf]  ;;  %v8692_v19 = vld [vmem:[%s13322_s1 + $0x410] sm:$0xf0]  ;;  %v6416_v28 = vor.u32 %v8668_v15, %v6415_v14 }
  0x23   :  { %3989 = vmatpush.bf16.msra.mxu3 %v6284_v39  ;;  %v6607_v20 = vld [vmem:[%s13322_s1 + $0x4c8] sm:$0xf]  ;;  %v6716_v21 = vor.u32 %v8743_v12, %v6715_v11  ;;  %v8716_v22 = vld [vmem:[%s13322_s1 + $0x4d0] sm:$0xf0]  ;;  %v6403_v25 = vld [vmem:[%s13322_s1 + $0x330] sm:$0xf]  ;;  %v6512_v33 = vor.u32 %v8692_v19, %v6511_v18 }
  0x24   :  { %3995 = vmatpush.bf16.msrb.mxu0 %v6464_v40  ;;  %v6703_v23 = vld [vmem:[%s13322_s1 + $0x588] sm:$0xf]  ;;  %v8740_v24 = vld [vmem:[%s13322_s1 + $0x590] sm:$0xf0]  ;;  %v8665_v26 = vld [vmem:[%s13322_s1 + $0x338] sm:$0xf0]  ;;  %v6608_v34 = vor.u32 %v8716_v22, %v6607_v20 }
  0x25   :  { %4008 = vmatpush.bf16.msrb.mxu1 %v6560_v41  ;;  %v30_v27 = vld [vmem:[%s13321_s0 + $0x10] sm:$0xff]  ;;  %v8689_v30 = vld [vmem:[%s13322_s1 + $0x3f8] sm:$0xf0]  ;;  %v6704_v37 = vor.u32 %v8740_v24, %v6703_v23  ;;  %v6391_v43 = vld [vmem:[%s13322_s1 + $0x318] sm:$0xf] }
  0x26   :  { %4021 = vmatpush.bf16.msrb.mxu2 %v6656_v42  ;;  %v6499_v29 = vld [vmem:[%s13322_s1 + $0x3f0] sm:$0xf]  ;;  %v8713_v39 = vld [vmem:[%s13322_s1 + $0x4b8] sm:$0xf0]  ;;  %v6404_v42 = vor.u32 %v8665_v26, %v6403_v25  ;;  %v8662_v44 = vld [vmem:[%s13322_s1 + $0x320] sm:$0xf0] }
  0x27   :  { %4034 = vmatpush.bf16.msrb.mxu3 %v6752_v46  ;;  %v9652_v31 = vld.sshfl [vmem:[#allocation1 + $0x10] sm:$0xff pattern:$0x73625140]  ;;  %v9654_v32 = vld.sshfl [vmem:[#allocation1] sm:$0xff pattern:$0x73625140]  ;;  %v6500_v45 = vor.u32 %v8689_v30, %v6499_v29  ;;  %v6392_v56 = vor.u32 %v8662_v44, %v6391_v43 }
  0x28   :  { %3996 = vmatpush.bf16.msrb.mxu0 %v6452_v52  ;;  %v9656_v35 = vld.sshfl [vmem:[#allocation1 + $0x18] sm:$0xff pattern:$0x73625140]  ;;  %v9658_v36 = vld.sshfl [vmem:[#allocation1 + $0x8] sm:$0xff pattern:$0x73625140]  ;;  %3977 = vmatmul.bf16.vlgmr.msra.gmra.mxu2 %v9652_v31 }
  0x29   :  { %4009 = vmatpush.bf16.msrb.mxu1 %v6548_v53  ;;  %v6595_v38 = vld [vmem:[%s13322_s1 + $0x4b0] sm:$0xf]  ;;  %824 = vst [vmem:[#allocation1] ss:$4 sm:$0xff] %v30_v27  ;;  %v8737_v41 = vld [vmem:[%s13322_s1 + $0x578] sm:$0xf0]  ;;  %3951 = vmatmul.bf16.vlgmr.msra.gmra.mxu0 %v9654_v32 }
  0x2a   :  { %4022 = vmatpush.bf16.msrb.mxu2 %v6644_v54  ;;  %v6691_v40 = vld [vmem:[%s13322_s1 + $0x570] sm:$0xf]  ;;  %3990 = vmatmul.bf16.vlgmr.msra.gmra.mxu3 %v9656_v35  ;;  %v6596_v46 = vor.u32 %v8713_v39, %v6595_v38  ;;  %v6487_v47 = vld [vmem:[%s13322_s1 + $0x3d8] sm:$0xf]  ;;  %v8686_v48 = vld [vmem:[%s13322_s1 + $0x3e0] sm:$0xf0] }
  0x2b   :  { %4035 = vmatpush.bf16.msrb.mxu3 %v6740_v58  ;;  %3964 = vmatmul.bf16.vlgmr.msra.gmra.mxu1 %v9658_v36  ;;  %v6583_v49 = vld [vmem:[%s13322_s1 + $0x498] sm:$0xf]  ;;  %v6692_v50 = vor.u32 %v8737_v41, %v6691_v40  ;;  %v8710_v51 = vld [vmem:[%s13322_s1 + $0x4a0] sm:$0xf0]  ;;  %v29_v53 = vld [vmem:[%s13321_s0 + $0x8] sm:$0xff]  ;;  %v6488_v60 = vor.u32 %v8686_v48, %v6487_v47 }
  0x2c   :  { %3997 = vmatpush.bf16.msrb.mxu0 %v6440_v0  ;;  %v6679_v52 = vld [vmem:[%s13322_s1 + $0x558] sm:$0xf]  ;;  %v8734_v54 = vld [vmem:[%s13322_s1 + $0x560] sm:$0xf0]  ;;  %v6379_v55 = vld [vmem:[%s13322_s1 + $0x300] sm:$0xf]  ;;  %v6584_v61 = vor.u32 %v8710_v51, %v6583_v49 }
  0x2d   :  { %4010 = vmatpush.bf16.msrb.mxu1 %v6536_v3  ;;  %814 = vst [vmem:[#allocation1 + $0x20] ss:$4 sm:$0xff] %v29_v53  ;;  %v8659_v57 = vld [vmem:[%s13322_s1 + $0x308] sm:$0xf0]  ;;  %v6475_v58 = vld [vmem:[%s13322_s1 + $0x3c0] sm:$0xf]  ;;  %v6680_v1 = vor.u32 %v8734_v54, %v6679_v52 }
  0x2e   :  { %4023 = vmatpush.bf16.msrb.mxu2 %v6632_v4  ;;  %v8683_v59 = vld [vmem:[%s13322_s1 + $0x3c8] sm:$0xf0]  ;;  %v6571_v62 = vld [vmem:[%s13322_s1 + $0x480] sm:$0xf]  ;;  %v6847_v3 = vld [vmem:[%s13322_s1 + $0x6a8] sm:$0xf]  ;;  %v6380_v8 = vor.u32 %v8659_v57, %v6379_v55 }
  0x2f   :  { %4036 = vmatpush.bf16.msrb.mxu3 %v6728_v7  ;;  %v8707_v63 = vld [vmem:[%s13322_s1 + $0x488] sm:$0xf0]  ;;  %v6667_v0 = vld [vmem:[%s13322_s1 + $0x540] sm:$0xf]  ;;  %v8776_v4 = vld [vmem:[%s13322_s1 + $0x6b0] sm:$0xf0]  ;;  %v6476_v12 = vor.u32 %v8683_v59, %v6475_v58 }
  0x30   :  { %3998 = vmatpush.bf16.msrb.mxu0 %v6428_v13  ;;  %v8731_v2 = vld [vmem:[%s13322_s1 + $0x548] sm:$0xf0]  ;;  %v6943_v5 = vld [vmem:[%s13322_s1 + $0x768] sm:$0xf]  ;;  %v8800_v6 = vld [vmem:[%s13322_s1 + $0x770] sm:$0xf0]  ;;  %v6572_v13 = vor.u32 %v8707_v63, %v6571_v62  ;;  %v6848_v18 = vor.u32 %v8776_v4, %v6847_v3 }
  0x31   :  { %4011 = vmatpush.bf16.msrb.mxu1 %v6524_v16  ;;  %v7039_v7 = vld [vmem:[%s13322_s1 + $0x828] sm:$0xf]  ;;  %v8824_v9 = vld [vmem:[%s13322_s1 + $0x830] sm:$0xf0]  ;;  %v6835_v14 = vld [vmem:[%s13322_s1 + $0x690] sm:$0xf]  ;;  %v6944_v23 = vor.u32 %v8800_v6, %v6943_v5 }
  0x32   :  { %4024 = vmatpush.bf16.msrb.mxu2 %v6620_v17  ;;  %v7135_v10 = vld [vmem:[%s13322_s1 + $0x8e8] sm:$0xf]  ;;  %v8848_v11 = vld [vmem:[%s13322_s1 + $0x8f0] sm:$0xf0]  ;;  %v8773_v15 = vld [vmem:[%s13322_s1 + $0x698] sm:$0xf0]  ;;  %v6668_v17 = vor.u32 %v8731_v2, %v6667_v0  ;;  %v7040_v24 = vor.u32 %v8824_v9, %v7039_v7 }
  0x33   :  { %4037 = vmatpush.bf16.msrb.mxu3 %v6716_v21  ;;  %v31_v16 = vld [vmem:[%s13321_s0 + $0x18] sm:$0xff]  ;;  %v6931_v19 = vld [vmem:[%s13322_s1 + $0x750] sm:$0xf]  ;;  %v7136_v27 = vor.u32 %v8848_v11, %v7135_v10  ;;  %v8770_v40 = vld [vmem:[%s13322_s1 + $0x680] sm:$0xf0] }
  0x34   :  { %3999 = vmatpush.bf16.msrb.mxu0 %v6416_v28  ;;  %v8797_v20 = vld [vmem:[%s13322_s1 + $0x758] sm:$0xf0]  ;;  %v9766_v21 = vld.sshfl [vmem:[#allocation1 + $0x30] sm:$0xff pattern:$0x73625140] }
  0x35   :  { %4012 = vmatpush.bf16.msrb.mxu1 %v6512_v33  ;;  %v9768_v22 = vld.sshfl [vmem:[#allocation1 + $0x20] sm:$0xff pattern:$0x73625140]  ;;  %v9770_v25 = vld.sshfl [vmem:[#allocation1 + $0x38] sm:$0xff pattern:$0x73625140] }
  0x36   :  { %4025 = vmatpush.bf16.msrb.mxu2 %v6608_v34  ;;  %v9772_v26 = vld.sshfl [vmem:[#allocation1 + $0x28] sm:$0xff pattern:$0x73625140]  ;;  %v7027_v28 = vld [vmem:[%s13322_s1 + $0x810] sm:$0xf]  ;;  %v6836_v34 = vor.u32 %v8773_v15, %v6835_v14 }
  0x37   :  { %4038 = vmatpush.bf16.msrb.mxu3 %v6704_v37  ;;  %v8821_v29 = vld [vmem:[%s13322_s1 + $0x818] sm:$0xf0]  ;;  %826 = vst [vmem:[#allocation1 + $0x20] ss:$4 sm:$0xff] %v31_v16  ;;  %v7123_v30 = vld [vmem:[%s13322_s1 + $0x8d0] sm:$0xf]  ;;  %v6932_v37 = vor.u32 %v8797_v20, %v6931_v19 }
  0x38   :  { %4000 = vmatpush.bf16.msrb.mxu0 %v6404_v42  ;;  %v8845_v33 = vld [vmem:[%s13322_s1 + $0x8d8] sm:$0xf0]  ;;  %v7028_v38 = vor.u32 %v8821_v29, %v7027_v28  ;;  %v6823_v39 = vld [vmem:[%s13322_s1 + $0x678] sm:$0xf]  ;;  %v8794_v43 = vld [vmem:[%s13322_s1 + $0x740] sm:$0xf0] }
  0x39   :  { %4013 = vmatpush.bf16.msrb.mxu1 %v6500_v45  ;;  %v6919_v41 = vld [vmem:[%s13322_s1 + $0x738] sm:$0xf]  ;;  %v7124_v42 = vor.u32 %v8845_v33, %v7123_v30  ;;  %v8818_v45 = vld [vmem:[%s13322_s1 + $0x800] sm:$0xf0]  ;;  %v6824_v48 = vor.u32 %v8770_v40, %v6823_v39  ;;  %v6811_v51 = vld [vmem:[%s13322_s1 + $0x660] sm:$0xf] }
  0x3a   :  { %4026 = vmatpush.bf16.msrb.mxu2 %v6596_v46  ;;  %v7015_v44 = vld [vmem:[%s13322_s1 + $0x7f8] sm:$0xf]  ;;  %v8842_v47 = vld [vmem:[%s13322_s1 + $0x8c0] sm:$0xf0]  ;;  %v6920_v49 = vor.u32 %v8794_v43, %v6919_v41  ;;  %v8767_v52 = vld [vmem:[%s13322_s1 + $0x668] sm:$0xf0] }
  0x3b   :  { %4039 = vmatpush.bf16.msrb.mxu3 %v6692_v50  ;;  %v7111_v46 = vld [vmem:[%s13322_s1 + $0x8b8] sm:$0xf]  ;;  %v7016_v50 = vor.u32 %v8818_v45, %v7015_v44  ;;  %v6907_v53 = vld [vmem:[%s13322_s1 + $0x720] sm:$0xf]  ;;  %v8791_v55 = vld [vmem:[%s13322_s1 + $0x728] sm:$0xf0] }
  0x3c   :  { %4001 = vmatpush.bf16.msrb.mxu0 %v6392_v56  ;;  %v7112_v54 = vor.u32 %v8842_v47, %v7111_v46  ;;  %v7003_v56 = vld [vmem:[%s13322_s1 + $0x7e0] sm:$0xf]  ;;  %v8815_v57 = vld [vmem:[%s13322_s1 + $0x7e8] sm:$0xf0]  ;;  %v8764_v62 = vld [vmem:[%s13322_s1 + $0x650] sm:$0xf0]  ;;  %v6908_v0 = vor.u32 %v8791_v55, %v6907_v53 }
  0x3d   :  { %4014 = vmatpush.bf16.msrb.mxu1 %v6488_v60  ;;  %v7099_v58 = vld [vmem:[%s13322_s1 + $0x8a0] sm:$0xf]  ;;  %v8839_v59 = vld [vmem:[%s13322_s1 + $0x8a8] sm:$0xf0]  ;;  %v6812_v60 = vor.u32 %v8767_v52, %v6811_v51  ;;  %v6895_v63 = vld [vmem:[%s13322_s1 + $0x708] sm:$0xf] }
  0x3e   :  { %4027 = vmatpush.bf16.msrb.mxu2 %v6584_v61  ;;  %v6799_v61 = vld [vmem:[%s13322_s1 + $0x648] sm:$0xf]  ;;  %v8788_v2 = vld [vmem:[%s13322_s1 + $0x710] sm:$0xf0]  ;;  %v7100_v5 = vor.u32 %v8839_v59, %v7099_v58  ;;  %v6787_v9 = vld [vmem:[%s13322_s1 + $0x630] sm:$0xf] }
  0x3f   :  { %4040 = vmatpush.bf16.msrb.mxu3 %v6680_v1  ;;  %v7004_v1 = vor.u32 %v8815_v57, %v7003_v56  ;;  %v6991_v3 = vld [vmem:[%s13322_s1 + $0x7c8] sm:$0xf]  ;;  %v8812_v4 = vld [vmem:[%s13322_s1 + $0x7d0] sm:$0xf0]  ;;  %v6896_v15 = vor.u32 %v8788_v2, %v6895_v63  ;;  %v8785_v20 = vld [vmem:[%s13322_s1 + $0x6f8] sm:$0xf0] }
  0x40   :  { %4002 = vmatpush.bf16.msrb.mxu0 %v6380_v8  ;;  %v7087_v6 = vld [vmem:[%s13322_s1 + $0x888] sm:$0xf]  ;;  %v8836_v7 = vld [vmem:[%s13322_s1 + $0x890] sm:$0xf0]  ;;  %v32_v8 = vld [vmem:[%s13321_s0 + $0x20] sm:$0xff]  ;;  %v6992_v16 = vor.u32 %v8812_v4, %v6991_v3 }
  0x41   :  { %4015 = vmatpush.bf16.msrb.mxu1 %v6476_v12  ;;  %v9868_v10 = vld.sshfl [vmem:[#allocation1] sm:$0xff pattern:$0x73625140]  ;;  %v9870_v11 = vld.sshfl [vmem:[#allocation1 + $0x10] sm:$0xff pattern:$0x73625140]  ;;  %v6800_v12 = vor.u32 %v8764_v62, %v6799_v61  ;;  %v7088_v19 = vor.u32 %v8836_v7, %v7087_v6 }
  0x42   :  { %4028 = vmatpush.bf16.msrb.mxu2 %v6572_v13  ;;  %v9872_v13 = vld.sshfl [vmem:[#allocation1 + $0x8] sm:$0xff pattern:$0x73625140]  ;;  %v9874_v14 = vld.sshfl [vmem:[#allocation1 + $0x18] sm:$0xff pattern:$0x73625140] }
  0x43   :  { %4041 = vmatpush.bf16.msrb.mxu3 %v6668_v17  ;;  %4003 = vmatmul.bf16.vlgmr.msrb.gmra.mxu0 %v9768_v22  ;;  %v8761_v17 = vld [vmem:[%s13322_s1 + $0x638] sm:$0xf0]  ;;  %836 = vst [vmem:[#allocation1] ss:$4 sm:$0xff] %v32_v8  ;;  %v8782_v40 = vld [vmem:[%s13322_s1 + $0x6e0] sm:$0xf0] }
  0x44   :  { %4047 = vmatpush.bf16.msra.mxu0 %v6848_v18  ;;  %4016 = vmatmul.bf16.vlgmr.msrb.gmra.mxu1 %v9772_v26  ;;  %v6883_v18 = vld [vmem:[%s13322_s1 + $0x6f0] sm:$0xf]  ;;  %v8833_v28 = vld [vmem:[%s13322_s1 + $0x878] sm:$0xf0]  ;;  %v6788_v29 = vor.u32 %v8761_v17, %v6787_v9  ;;  %v6967_v41 = vld [vmem:[%s13322_s1 + $0x798] sm:$0xf] }
  0x45   :  { %4060 = vmatpush.bf16.msra.mxu1 %v6944_v23  ;;  %4029 = vmatmul.bf16.vlgmr.msrb.gmra.mxu2 %v9766_v21  ;;  %v6979_v23 = vld [vmem:[%s13322_s1 + $0x7b0] sm:$0xf]  ;;  %v6884_v30 = vor.u32 %v8785_v20, %v6883_v18  ;;  %v7063_v43 = vld [vmem:[%s13322_s1 + $0x858] sm:$0xf]  ;;  %v8830_v44 = vld [vmem:[%s13322_s1 + $0x860] sm:$0xf0] }
  0x46   :  { %4073 = vmatpush.bf16.msra.mxu2 %v7040_v24  ;;  %4042 = vmatmul.bf16.vlgmr.msrb.gmra.mxu3 %v9770_v25  ;;  %v8809_v24 = vld [vmem:[%s13322_s1 + $0x7b8] sm:$0xf0]  ;;  %v6763_v46 = vld [vmem:[%s13322_s1 + $0x600] sm:$0xf]  ;;  %v8755_v47 = vld [vmem:[%s13322_s1 + $0x608] sm:$0xf0]  ;;  %v7064_v53 = vor.u32 %v8830_v44, %v7063_v43 }
  0x47   :  { %4086 = vmatpush.bf16.msra.mxu3 %v7136_v27  ;;  %v7075_v27 = vld [vmem:[%s13322_s1 + $0x870] sm:$0xf]  ;;  %v6980_v33 = vor.u32 %v8809_v24, %v6979_v23  ;;  %v8779_v51 = vld [vmem:[%s13322_s1 + $0x6c8] sm:$0xf0]  ;;  %v6955_v52 = vld [vmem:[%s13322_s1 + $0x780] sm:$0xf] }
  0x48   :  { %4048 = vmatpush.bf16.msra.mxu0 %v6836_v34  ;;  %v6775_v34 = vld [vmem:[%s13322_s1 + $0x618] sm:$0xf]  ;;  %v7076_v39 = vor.u32 %v8833_v28, %v7075_v27  ;;  %v7051_v55 = vld [vmem:[%s13322_s1 + $0x840] sm:$0xf]  ;;  %v8827_v56 = vld [vmem:[%s13322_s1 + $0x848] sm:$0xf0] }
  0x49   :  { %4061 = vmatpush.bf16.msra.mxu1 %v6932_v37  ;;  %v8758_v37 = vld [vmem:[%s13322_s1 + $0x620] sm:$0xf0]  ;;  %v7231_v57 = vld [vmem:[%s13322_s1 + $0x9a8] sm:$0xf]  ;;  %v8872_v58 = vld [vmem:[%s13322_s1 + $0x9b0] sm:$0xf0]  ;;  %v7052_v4 = vor.u32 %v8827_v56, %v7051_v55 }
  0x4a   :  { %4074 = vmatpush.bf16.msra.mxu2 %v7028_v38  ;;  %v6871_v38 = vld [vmem:[%s13322_s1 + $0x6d8] sm:$0xf]  ;;  %v6776_v45 = vor.u32 %v8758_v37, %v6775_v34  ;;  %v7327_v59 = vld [vmem:[%s13322_s1 + $0xa68] sm:$0xf]  ;;  %v8896_v61 = vld [vmem:[%s13322_s1 + $0xa70] sm:$0xf0] }
  0x4b   :  { %4087 = vmatpush.bf16.msra.mxu3 %v7124_v42  ;;  %v8806_v42 = vld [vmem:[%s13322_s1 + $0x7a0] sm:$0xf0]  ;;  %v7423_v62 = vld [vmem:[%s13322_s1 + $0xb28] sm:$0xf]  ;;  %v8920_v63 = vld [vmem:[%s13322_s1 + $0xb30] sm:$0xf0]  ;;  %v7328_v6 = vor.u32 %v8896_v61, %v7327_v59 }
  0x4c   :  { %4049 = vmatpush.bf16.msra.mxu0 %v6824_v48  ;;  %v6872_v48 = vor.u32 %v8782_v40, %v6871_v38  ;;  %v7519_v2 = vld [vmem:[%s13322_s1 + $0xbe8] sm:$0xf]  ;;  %v8944_v3 = vld [vmem:[%s13322_s1 + $0xbf0] sm:$0xf0]  ;;  %v7424_v7 = vor.u32 %v8920_v63, %v7423_v62  ;;  %v7219_v8 = vld [vmem:[%s13322_s1 + $0x990] sm:$0xf] }
  0x4d   :  { %4062 = vmatpush.bf16.msra.mxu1 %v6920_v49  ;;  %v6968_v49 = vor.u32 %v8806_v42, %v6967_v41  ;;  %v8869_v9 = vld [vmem:[%s13322_s1 + $0x998] sm:$0xf0]  ;;  %v7411_v17 = vld [vmem:[%s13322_s1 + $0xb10] sm:$0xf]  ;;  %v7207_v24 = vld [vmem:[%s13322_s1 + $0x978] sm:$0xf] }
  0x4e   :  { %4075 = vmatpush.bf16.msra.mxu2 %v7016_v50  ;;  %v6859_v50 = vld [vmem:[%s13322_s1 + $0x6c0] sm:$0xf]  ;;  %v8917_v18 = vld [vmem:[%s13322_s1 + $0xb18] sm:$0xf0]  ;;  %v7220_v23 = vor.u32 %v8869_v9, %v7219_v8  ;;  %v7399_v37 = vld [vmem:[%s13322_s1 + $0xaf8] sm:$0xf] }
  0x4f   :  { %4088 = vmatpush.bf16.msra.mxu3 %v7112_v54  ;;  %v8803_v54 = vld [vmem:[%s13322_s1 + $0x788] sm:$0xf0]  ;;  %v8941_v20 = vld [vmem:[%s13322_s1 + $0xbd8] sm:$0xf0]  ;;  %v7412_v28 = vor.u32 %v8917_v18, %v7411_v17  ;;  %v8914_v38 = vld [vmem:[%s13322_s1 + $0xb00] sm:$0xf0] }
  0x50   :  { %4050 = vmatpush.bf16.msra.mxu0 %v6812_v60  ;;  %v6764_v60 = vor.u32 %v8755_v47, %v6763_v46  ;;  %v8938_v40 = vld [vmem:[%s13322_s1 + $0xbc0] sm:$0xf0]  ;;  %v7195_v41 = vld [vmem:[%s13322_s1 + $0x960] sm:$0xf]  ;;  %v8863_v42 = vld [vmem:[%s13322_s1 + $0x968] sm:$0xf0] }
  0x51   :  { %4063 = vmatpush.bf16.msra.mxu1 %v6908_v0  ;;  %v6860_v0 = vor.u32 %v8779_v51, %v6859_v50  ;;  %v7291_v44 = vld [vmem:[%s13322_s1 + $0xa20] sm:$0xf]  ;;  %v8911_v47 = vld [vmem:[%s13322_s1 + $0xae8] sm:$0xf0]  ;;  %v7400_v50 = vor.u32 %v8914_v38, %v7399_v37  ;;  %v7183_v61 = vld [vmem:[%s13322_s1 + $0x948] sm:$0xf] }
  0x52   :  { %4076 = vmatpush.bf16.msra.mxu2 %v7004_v1  ;;  %v6956_v1 = vor.u32 %v8803_v54, %v6955_v52  ;;  %v7387_v46 = vld [vmem:[%s13322_s1 + $0xae0] sm:$0xf]  ;;  %v10044_v52 = vld.sshfl [vmem:[#allocation1 + $0x30] sm:$0xff pattern:$0x73625140] }
  0x53   :  { %4089 = vmatpush.bf16.msra.mxu3 %v7100_v5  ;;  %v7232_v5 = vor.u32 %v8872_v58, %v7231_v57  ;;  %v10042_v51 = vld.sshfl [vmem:[#allocation1 + $0x20] sm:$0xff pattern:$0x73625140]  ;;  %v10046_v54 = vld.sshfl [vmem:[#allocation1 + $0x28] sm:$0xff pattern:$0x73625140]  ;;  %v7196_v58 = vor.u32 %v8863_v42, %v7195_v41 }
  0x54   :  { %4051 = vmatpush.bf16.msra.mxu0 %v6800_v12  ;;  %v7315_v12 = vld [vmem:[%s13322_s1 + $0xa50] sm:$0xf]  ;;  %v10048_v55 = vld.sshfl [vmem:[#allocation1 + $0x38] sm:$0xff pattern:$0x73625140] }
  0x55   :  { %4064 = vmatpush.bf16.msra.mxu1 %v6896_v15  ;;  %v7520_v15 = vor.u32 %v8944_v3, %v7519_v2  ;;  %v7483_v56 = vld [vmem:[%s13322_s1 + $0xba0] sm:$0xf]  ;;  %v8935_v57 = vld [vmem:[%s13322_s1 + $0xba8] sm:$0xf0]  ;;  %v8860_v62 = vld [vmem:[%s13322_s1 + $0x950] sm:$0xf0] }
  0x56   :  { %4077 = vmatpush.bf16.msra.mxu2 %v6992_v16  ;;  %v8893_v16 = vld [vmem:[%s13322_s1 + $0xa58] sm:$0xf0]  ;;  %v7279_v63 = vld [vmem:[%s13322_s1 + $0xa08] sm:$0xf]  ;;  %v8908_v3 = vld [vmem:[%s13322_s1 + $0xad0] sm:$0xf0] }
  0x57   :  { %4090 = vmatpush.bf16.msra.mxu3 %v7088_v19  ;;  %v7507_v19 = vld [vmem:[%s13322_s1 + $0xbd0] sm:$0xf]  ;;  %v7316_v27 = vor.u32 %v8893_v16, %v7315_v12  ;;  %v7375_v2 = vld [vmem:[%s13322_s1 + $0xac8] sm:$0xf]  ;;  %v8857_v12 = vld [vmem:[%s13322_s1 + $0x938] sm:$0xf0] }
  0x58   :  { %4052 = vmatpush.bf16.msra.mxu0 %v6788_v29  ;;  %v8866_v29 = vld [vmem:[%s13322_s1 + $0x980] sm:$0xf0]  ;;  %v7508_v34 = vor.u32 %v8941_v20, %v7507_v19  ;;  %v7376_v8 = vor.u32 %v8908_v3, %v7375_v2  ;;  %v7171_v9 = vld [vmem:[%s13322_s1 + $0x930] sm:$0xf]  ;;  %v8881_v17 = vld [vmem:[%s13322_s1 + $0x9f8] sm:$0xf0] }
  0x59   :  { %4065 = vmatpush.bf16.msra.mxu1 %v6884_v30  ;;  %v7303_v30 = vld [vmem:[%s13322_s1 + $0xa38] sm:$0xf]  ;;  %v7208_v43 = vor.u32 %v8866_v29, %v7207_v24  ;;  %v7363_v18 = vld [vmem:[%s13322_s1 + $0xab0] sm:$0xf]  ;;  %v8905_v19 = vld [vmem:[%s13322_s1 + $0xab8] sm:$0xf0]  ;;  %v7172_v24 = vor.u32 %v8857_v12, %v7171_v9 }
  0x5a   :  { %4078 = vmatpush.bf16.msra.mxu2 %v6980_v33  ;;  %v8890_v33 = vld [vmem:[%s13322_s1 + $0xa40] sm:$0xf0]  ;;  %v7459_v20 = vld [vmem:[%s13322_s1 + $0xb70] sm:$0xf]  ;;  %v7364_v29 = vor.u32 %v8905_v19, %v7363_v18  ;;  %v7351_v38 = vld [vmem:[%s13322_s1 + $0xa98] sm:$0xf] }
  0x5b   :  { %4091 = vmatpush.bf16.msra.mxu3 %v7076_v39  ;;  %v7495_v39 = vld [vmem:[%s13322_s1 + $0xbb8] sm:$0xf]  ;;  %v8926_v41 = vld [vmem:[%s13322_s1 + $0xb60] sm:$0xf0]  ;;  %v7147_v42 = vld [vmem:[%s13322_s1 + $0x900] sm:$0xf] }
  0x5c   :  { %4053 = vmatpush.bf16.msra.mxu0 %v6776_v45  ;;  %v8887_v45 = vld [vmem:[%s13322_s1 + $0xa28] sm:$0xf0]  ;;  %v7903_v3 = vld [vmem:[%s13322_s1 + $0xee8] sm:$0xf]  ;;  %v7603_v9 = vld [vmem:[%s13322_s1 + $0xc90] sm:$0xf] }
  0x5d   :  { %4066 = vmatpush.bf16.msra.mxu1 %v6872_v48  ;;  %v33_v48 = vld [vmem:[%s13321_s0 + $0x28] sm:$0xff]  ;;  %v7292_v59 = vor.u32 %v8887_v45, %v7291_v44  ;;  %v7243_v45 = vld [vmem:[%s13322_s1 + $0x9c0] sm:$0xf]  ;;  %v8965_v12 = vld [vmem:[%s13322_s1 + $0xc98] sm:$0xf0] }
  0x5e   :  { %4079 = vmatpush.bf16.msra.mxu2 %v6968_v49  ;;  %v7304_v49 = vor.u32 %v8890_v33, %v7303_v30  ;;  %838 = vst [vmem:[#allocation1 + $0x20] ss:$4 sm:$0xff] %v33_v48  ;;  %v8854_v30 = vld [vmem:[%s13322_s1 + $0x920] sm:$0xf0]  ;;  %v7255_v33 = vld [vmem:[%s13322_s1 + $0x9d8] sm:$0xf] }
  0x5f   :  { %4092 = vmatpush.bf16.msra.mxu3 %v7064_v53  ;;  %v7496_v53 = vor.u32 %v8938_v40, %v7495_v39  ;;  %v8902_v39 = vld [vmem:[%s13322_s1 + $0xaa0] sm:$0xf0]  ;;  %v7447_v40 = vld [vmem:[%s13322_s1 + $0xb58] sm:$0xf]  ;;  %v8899_v48 = vld [vmem:[%s13322_s1 + $0xa88] sm:$0xf0] }
  0x60   :  { %4054 = vmatpush.bf16.msra.mxu0 %v6764_v60  ;;  %v7388_v60 = vor.u32 %v8911_v47, %v7387_v46  ;;  %v8875_v46 = vld [vmem:[%s13322_s1 + $0x9c8] sm:$0xf0]  ;;  %v7339_v47 = vld [vmem:[%s13322_s1 + $0xa80] sm:$0xf]  ;;  %v7795_v18 = vld [vmem:[%s13322_s1 + $0xe10] sm:$0xf] }
  0x61   :  { %4067 = vmatpush.bf16.msra.mxu1 %v6860_v0  ;;  %v7484_v0 = vor.u32 %v8935_v57, %v7483_v56  ;;  %v8923_v56 = vld [vmem:[%s13322_s1 + $0xb48] sm:$0xf0]  ;;  %v7615_v57 = vld [vmem:[%s13322_s1 + $0xca8] sm:$0xf]  ;;  %v7340_v2 = vor.u32 %v8899_v48, %v7339_v47  ;;  %v9013_v19 = vld [vmem:[%s13322_s1 + $0xe18] sm:$0xf0] }
  0x62   :  { %4080 = vmatpush.bf16.msra.mxu2 %v6956_v1  ;;  %v8884_v1 = vld [vmem:[%s13322_s1 + $0xa10] sm:$0xf0]  ;;  %v7675_v47 = vld [vmem:[%s13322_s1 + $0xd20] sm:$0xf]  ;;  %v8983_v48 = vld [vmem:[%s13322_s1 + $0xd28] sm:$0xf0] }
  0x63   :  { %4093 = vmatpush.bf16.msra.mxu3 %v7052_v4  ;;  %4055 = vmatmul.bf16.vlgmr.msra.gmra.mxu0 %v9868_v10  ;;  %v7471_v4 = vld [vmem:[%s13322_s1 + $0xb88] sm:$0xf] }
  0x64   :  { %4099 = vmatpush.bf16.msrb.mxu0 %v7232_v5  ;;  %4068 = vmatmul.bf16.vlgmr.msra.gmra.mxu1 %v9872_v13  ;;  %v8932_v5 = vld [vmem:[%s13322_s1 + $0xb90] sm:$0xf0] }
  0x65   :  { %4112 = vmatpush.bf16.msrb.mxu1 %v7328_v6  ;;  %4081 = vmatmul.bf16.vlgmr.msra.gmra.mxu2 %v9870_v11  ;;  %v7184_v6 = vor.u32 %v8860_v62, %v7183_v61  ;;  %v7472_v16 = vor.u32 %v8932_v5, %v7471_v4  ;;  %v8992_v61 = vld [vmem:[%s13322_s1 + $0xd70] sm:$0xf0] }
  0x66   :  { %4125 = vmatpush.bf16.msrb.mxu2 %v7424_v7  ;;  %4094 = vmatmul.bf16.vlgmr.msra.gmra.mxu3 %v9874_v14  ;;  %v7280_v7 = vor.u32 %v8884_v1, %v7279_v63  ;;  %v7807_v63 = vld [vmem:[%s13322_s1 + $0xe28] sm:$0xf]  ;;  %v7244_v1 = vor.u32 %v8875_v46, %v7243_v45  ;;  %v9040_v4 = vld [vmem:[%s13322_s1 + $0xef0] sm:$0xf0]  ;;  %v8959_v46 = vld [vmem:[%s13322_s1 + $0xc68] sm:$0xf0] }
  0x67   :  { %4138 = vmatpush.bf16.msrb.mxu3 %v7520_v15  ;;  %v7267_v15 = vld [vmem:[%s13322_s1 + $0x9f0] sm:$0xf] }
  0x68   :  { %4100 = vmatpush.bf16.msrb.mxu0 %v7220_v23  ;;  %v8929_v23 = vld [vmem:[%s13322_s1 + $0xb78] sm:$0xf0] }
  0x69   :  { %4113 = vmatpush.bf16.msrb.mxu1 %v7316_v27  ;;  %v7159_v27 = vld [vmem:[%s13322_s1 + $0x918] sm:$0xf]  ;;  %v7460_v37 = vor.u32 %v8929_v23, %v7459_v20  ;;  %v7891_v20 = vld [vmem:[%s13322_s1 + $0xed0] sm:$0xf]  ;;  %v9037_v23 = vld [vmem:[%s13322_s1 + $0xed8] sm:$0xf0] }
  0x6a   :  { %4126 = vmatpush.bf16.msrb.mxu2 %v7412_v28  ;;  %v7268_v28 = vor.u32 %v8881_v17, %v7267_v15  ;;  %v7160_v44 = vor.u32 %v8854_v30, %v7159_v27  ;;  %v7699_v15 = vld [vmem:[%s13322_s1 + $0xd50] sm:$0xf]  ;;  %v8989_v17 = vld [vmem:[%s13322_s1 + $0xd58] sm:$0xf0]  ;;  %v8962_v30 = vld [vmem:[%s13322_s1 + $0xc80] sm:$0xf0] }
  0x6b   :  { %4139 = vmatpush.bf16.msrb.mxu3 %v7508_v34  ;;  %v8878_v34 = vld [vmem:[%s13322_s1 + $0x9e0] sm:$0xf0]  ;;  %v7700_v27 = vor.u32 %v8989_v17, %v7699_v15 }
  0x6c   :  { %4101 = vmatpush.bf16.msrb.mxu0 %v7208_v43  ;;  %v8851_v43 = vld [vmem:[%s13322_s1 + $0x908] sm:$0xf0] }
  0x6d   :  { %4114 = vmatpush.bf16.msrb.mxu1 %v7304_v49  ;;  %v7256_v49 = vor.u32 %v8878_v34, %v7255_v33  ;;  %v7148_v62 = vor.u32 %v8851_v43, %v7147_v42  ;;  %v7687_v33 = vld [vmem:[%s13322_s1 + $0xd38] sm:$0xf]  ;;  %v7892_v34 = vor.u32 %v9037_v23, %v7891_v20  ;;  %v7579_v43 = vld [vmem:[%s13322_s1 + $0xc60] sm:$0xf] }
  0x6e   :  { %4127 = vmatpush.bf16.msrb.mxu2 %v7400_v50  ;;  %v7352_v50 = vor.u32 %v8902_v39, %v7351_v38  ;;  %v7783_v38 = vld [vmem:[%s13322_s1 + $0xdf8] sm:$0xf]  ;;  %v9010_v39 = vld [vmem:[%s13322_s1 + $0xe00] sm:$0xf0] }
  0x6f   :  { %4140 = vmatpush.bf16.msrb.mxu3 %v7496_v53  ;;  %v7435_v53 = vld [vmem:[%s13322_s1 + $0xb40] sm:$0xf]  ;;  %v7784_v45 = vor.u32 %v9010_v39, %v7783_v38 }
  0x70   :  { %4102 = vmatpush.bf16.msrb.mxu0 %v7196_v58  ;;  %v7448_v58 = vor.u32 %v8926_v41, %v7447_v40  ;;  %v7436_v5 = vor.u32 %v8923_v56, %v7435_v53  ;;  %v7879_v40 = vld [vmem:[%s13322_s1 + $0xeb8] sm:$0xf]  ;;  %v9034_v41 = vld [vmem:[%s13322_s1 + $0xec0] sm:$0xf0]  ;;  %v9007_v53 = vld [vmem:[%s13322_s1 + $0xde8] sm:$0xf0] }
  0x71   :  { %4115 = vmatpush.bf16.msrb.mxu1 %v7292_v59  ;;  %v8968_v59 = vld [vmem:[%s13322_s1 + $0xcb0] sm:$0xf0]  ;;  %v7867_v56 = vld [vmem:[%s13322_s1 + $0xea0] sm:$0xf] }
  0x72   :  { %4128 = vmatpush.bf16.msrb.mxu2 %v7388_v60  ;;  %v7711_v60 = vld [vmem:[%s13322_s1 + $0xd68] sm:$0xf] }
  0x73   :  { %4141 = vmatpush.bf16.msrb.mxu3 %v7484_v0  ;;  %v9016_v0 = vld [vmem:[%s13322_s1 + $0xe30] sm:$0xf0] }
  0x74   :  { %4103 = vmatpush.bf16.msrb.mxu0 %v7184_v6  ;;  %v7616_v6 = vor.u32 %v8968_v59, %v7615_v57  ;;  %v9031_v57 = vld [vmem:[%s13322_s1 + $0xea8] sm:$0xf0]  ;;  %v7567_v59 = vld [vmem:[%s13322_s1 + $0xc48] sm:$0xf] }
  0x75   :  { %4116 = vmatpush.bf16.msrb.mxu1 %v7280_v7  ;;  %v7712_v7 = vor.u32 %v8992_v61, %v7711_v60  ;;  %v8956_v60 = vld [vmem:[%s13322_s1 + $0xc50] sm:$0xf0]  ;;  %v7676_v61 = vor.u32 %v8983_v48, %v7675_v47 }
  0x76   :  { %4129 = vmatpush.bf16.msrb.mxu2 %v7376_v8  ;;  %v7808_v8 = vor.u32 %v9016_v0, %v7807_v63  ;;  %v7663_v63 = vld [vmem:[%s13322_s1 + $0xd08] sm:$0xf]  ;;  %v8980_v0 = vld [vmem:[%s13322_s1 + $0xd10] sm:$0xf0] }
  0x77   :  { %4142 = vmatpush.bf16.msrb.mxu3 %v7472_v16  ;;  %v7904_v16 = vor.u32 %v9040_v4, %v7903_v3  ;;  %v9004_v3 = vld [vmem:[%s13322_s1 + $0xdd0] sm:$0xf0]  ;;  %v7855_v4 = vld [vmem:[%s13322_s1 + $0xe88] sm:$0xf] }
  0x78   :  { %4104 = vmatpush.bf16.msrb.mxu0 %v7172_v24  ;;  %v7604_v24 = vor.u32 %v8965_v12, %v7603_v9 }
  0x79   :  { %4117 = vmatpush.bf16.msrb.mxu1 %v7268_v28  ;;  %v7796_v28 = vor.u32 %v9013_v19, %v7795_v18 }
  0x7a   :  { %4130 = vmatpush.bf16.msrb.mxu2 %v7364_v29  ;;  %v7591_v29 = vld [vmem:[%s13322_s1 + $0xc78] sm:$0xf] }
  0x7b   :  { %4143 = vmatpush.bf16.msrb.mxu3 %v7460_v37  ;;  %v8986_v37 = vld [vmem:[%s13322_s1 + $0xd40] sm:$0xf0]  ;;  %v7592_v42 = vor.u32 %v8962_v30, %v7591_v29 }
  0x7c   :  { %4105 = vmatpush.bf16.msrb.mxu0 %v7160_v44  ;;  %v7688_v44 = vor.u32 %v8986_v37, %v7687_v33 }
  0x7d   :  { %4118 = vmatpush.bf16.msrb.mxu1 %v7256_v49  ;;  %v7880_v49 = vor.u32 %v9034_v41, %v7879_v40 }
  0x7e   :  { %4131 = vmatpush.bf16.msrb.mxu2 %v7352_v50  ;;  %v7771_v50 = vld [vmem:[%s13322_s1 + $0xde0] sm:$0xf] }
  0x7f   :  { %4144 = vmatpush.bf16.msrb.mxu3 %v7448_v58  ;;  %v7580_v58 = vor.u32 %v8959_v46, %v7579_v43 }
  0x80   :  { %4106 = vmatpush.bf16.msrb.mxu0 %v7148_v62  ;;  %v7772_v62 = vor.u32 %v9007_v53, %v7771_v50 }
  0x81   :  { %4119 = vmatpush.bf16.msrb.mxu1 %v7244_v1  ;;  %v7759_v1 = vld [vmem:[%s13322_s1 + $0xdc8] sm:$0xf] }
  0x82   :  { %4132 = vmatpush.bf16.msrb.mxu2 %v7340_v2  ;;  %v7868_v2 = vor.u32 %v9031_v57, %v7867_v56 }
  0x83   :  { %4145 = vmatpush.bf16.msrb.mxu3 %v7436_v5  ;;  %4107 = vmatmul.bf16.vlgmr.msrb.gmra.mxu0 %v10042_v51  ;;  %v9028_v5 = vld [vmem:[%s13322_s1 + $0xe90] sm:$0xf0] }
  0x84   :  { %4151 = vmatpush.bf16.msra.mxu0 %v7616_v6  ;;  %4120 = vmatmul.bf16.vlgmr.msrb.gmra.mxu1 %v10046_v54 }
  0x85   :  { %4164 = vmatpush.bf16.msra.mxu1 %v7712_v7  ;;  %4133 = vmatmul.bf16.vlgmr.msrb.gmra.mxu2 %v10044_v52 }
  0x86   :  { %4177 = vmatpush.bf16.msra.mxu2 %v7808_v8  ;;  %4146 = vmatmul.bf16.vlgmr.msrb.gmra.mxu3 %v10048_v55 }
  0x87   :  { %4190 = vmatpush.bf16.msra.mxu3 %v7904_v16 }
  0x88   :  { %4152 = vmatpush.bf16.msra.mxu0 %v7604_v24 }
  0x89   :  { %4165 = vmatpush.bf16.msra.mxu1 %v7700_v27 }
  0x8a   :  { %4178 = vmatpush.bf16.msra.mxu2 %v7796_v28 }
  0x8b   :  { %4191 = vmatpush.bf16.msra.mxu3 %v7892_v34 }
  0x8c   :  { %4153 = vmatpush.bf16.msra.mxu0 %v7592_v42 }
  0x8d   :  { %4166 = vmatpush.bf16.msra.mxu1 %v7688_v44 }
  0x8e   :  { %4179 = vmatpush.bf16.msra.mxu2 %v7784_v45 }
  0x8f   :  { %4192 = vmatpush.bf16.msra.mxu3 %v7880_v49 }
  0x90   :  { %12 = vsyncpa [#allocation3], 0  ;;  %4154 = vmatpush.bf16.msra.mxu0 %v7580_v58  ;;  %v7568_v6 = vor.u32 %v8956_v60, %v7567_v59  ;;  %v7664_v7 = vor.u32 %v8980_v0, %v7663_v63  ;;  %v7760_v8 = vor.u32 %v9004_v3, %v7759_v1  ;;  %v7555_v9 = vld [vmem:[%s13322_s1 + $0xc30] sm:$0xf]  ;;  %v8953_v12 = vld [vmem:[%s13322_s1 + $0xc38] sm:$0xf0]  ;;  %v7856_v16 = vor.u32 %v9028_v5, %v7855_v4 }
  0x91   :  { %4167 = vmatpush.bf16.msra.mxu1 %v7676_v61  ;;  %v7651_v15 = vld [vmem:[%s13322_s1 + $0xcf0] sm:$0xf]  ;;  %v8977_v17 = vld [vmem:[%s13322_s1 + $0xcf8] sm:$0xf0]  ;;  %v7556_v24 = vor.u32 %v8953_v12, %v7555_v9  ;;  %v7543_v29 = vld [vmem:[%s13322_s1 + $0xc18] sm:$0xf] }
  0x92   :  { %4180 = vmatpush.bf16.msra.mxu2 %v7772_v62  ;;  %v7747_v18 = vld [vmem:[%s13322_s1 + $0xdb0] sm:$0xf]  ;;  %v9001_v19 = vld [vmem:[%s13322_s1 + $0xdb8] sm:$0xf0]  ;;  %v7652_v27 = vor.u32 %v8977_v17, %v7651_v15  ;;  %v8950_v30 = vld [vmem:[%s13322_s1 + $0xc20] sm:$0xf0] }
  0x93   :  { %4193 = vmatpush.bf16.msra.mxu3 %v7868_v2  ;;  %v7843_v20 = vld [vmem:[%s13322_s1 + $0xe70] sm:$0xf]  ;;  %v9025_v23 = vld [vmem:[%s13322_s1 + $0xe78] sm:$0xf0]  ;;  %v7748_v28 = vor.u32 %v9001_v19, %v7747_v18  ;;  %v7639_v33 = vld [vmem:[%s13322_s1 + $0xcd8] sm:$0xf]  ;;  %v7544_v42 = vor.u32 %v8950_v30, %v7543_v29 }
  0x94   :  { %4155 = vmatpush.bf16.msra.mxu0 %v7568_v6  ;;  %v7844_v34 = vor.u32 %v9025_v23, %v7843_v20  ;;  %v8974_v37 = vld [vmem:[%s13322_s1 + $0xce0] sm:$0xf0]  ;;  %v7735_v38 = vld [vmem:[%s13322_s1 + $0xd98] sm:$0xf]  ;;  %v7531_v43 = vld [vmem:[%s13322_s1 + $0xc00] sm:$0xf] }
  0x95   :  { %4168 = vmatpush.bf16.msra.mxu1 %v7664_v7  ;;  %v8998_v39 = vld [vmem:[%s13322_s1 + $0xda0] sm:$0xf0]  ;;  %v7831_v40 = vld [vmem:[%s13322_s1 + $0xe58] sm:$0xf]  ;;  %v8947_v44 = vld [vmem:[%s13322_s1 + $0xc08] sm:$0xf0]  ;;  %v7640_v45 = vor.u32 %v8974_v37, %v7639_v33 }
  0x96   :  { %4181 = vmatpush.bf16.msra.mxu2 %v7760_v8  ;;  %v9022_v41 = vld [vmem:[%s13322_s1 + $0xe60] sm:$0xf0]  ;;  %v7736_v46 = vor.u32 %v8998_v39, %v7735_v38  ;;  %v7627_v47 = vld [vmem:[%s13322_s1 + $0xcc0] sm:$0xf]  ;;  %v8971_v48 = vld [vmem:[%s13322_s1 + $0xcc8] sm:$0xf0]  ;;  %v7532_v61 = vor.u32 %v8947_v44, %v7531_v43 }
  0x97   :  { %4194 = vmatpush.bf16.msra.mxu3 %v7856_v16  ;;  %v7723_v49 = vld [vmem:[%s13322_s1 + $0xd80] sm:$0xf]  ;;  %v7832_v50 = vor.u32 %v9022_v41, %v7831_v40  ;;  %v8995_v53 = vld [vmem:[%s13322_s1 + $0xd88] sm:$0xf0]  ;;  %v7999_v58 = vld [vmem:[%s13322_s1 + $0xfa8] sm:$0xf]  ;;  %v7628_v1 = vor.u32 %v8971_v48, %v7627_v47 }
  0x98   :  { %4156 = vmatpush.bf16.msra.mxu0 %v7556_v24  ;;  %v7819_v56 = vld [vmem:[%s13322_s1 + $0xe40] sm:$0xf]  ;;  %v9019_v57 = vld [vmem:[%s13322_s1 + $0xe48] sm:$0xf0]  ;;  %v9064_v59 = vld [vmem:[%s13322_s1 + $0xfb0] sm:$0xf0]  ;;  %v7724_v2 = vor.u32 %v8995_v53, %v7723_v49 }
  0x99   :  { %4169 = vmatpush.bf16.msra.mxu1 %v7652_v27  ;;  %v8095_v60 = vld [vmem:[%s13322_s1 + $0x1068] sm:$0xf]  ;;  %v9088_v62 = vld [vmem:[%s13322_s1 + $0x1070] sm:$0xf0]  ;;  %v7820_v5 = vor.u32 %v9019_v57, %v7819_v56  ;;  %v8000_v6 = vor.u32 %v9064_v59, %v7999_v58  ;;  %v7987_v12 = vld [vmem:[%s13322_s1 + $0xf90] sm:$0xf] }
  0x9a   :  { %4182 = vmatpush.bf16.msra.mxu2 %v7748_v28  ;;  %v8191_v63 = vld [vmem:[%s13322_s1 + $0x1128] sm:$0xf]  ;;  %v9112_v0 = vld [vmem:[%s13322_s1 + $0x1130] sm:$0xf0]  ;;  %v8096_v7 = vor.u32 %v9088_v62, %v8095_v60  ;;  %v9061_v15 = vld [vmem:[%s13322_s1 + $0xf98] sm:$0xf0] }
  0x9b   :  { %4195 = vmatpush.bf16.msra.mxu3 %v7844_v34  ;;  %v8287_v3 = vld [vmem:[%s13322_s1 + $0x11e8] sm:$0xf]  ;;  %v9136_v4 = vld [vmem:[%s13322_s1 + $0x11f0] sm:$0xf0]  ;;  %v8192_v8 = vor.u32 %v9112_v0, %v8191_v63  ;;  %v8083_v16 = vld [vmem:[%s13322_s1 + $0x1050] sm:$0xf]  ;;  %v7988_v30 = vor.u32 %v9061_v15, %v7987_v12 }
  0x9c   :  { %4157 = vmatpush.bf16.msra.mxu0 %v7544_v42  ;;  %v839_v9 = vld.sshfl [vmem:[#allocation1] sm:$0xff pattern:$0x73625140]  ;;  %v8288_v17 = vor.u32 %v9136_v4, %v8287_v3  ;;  %v841_v18 = vld.sshfl [vmem:[#allocation1 + $0x10] sm:$0xff pattern:$0x73625140] }
  0x9d   :  { %4170 = vmatpush.bf16.msra.mxu1 %v7640_v45  ;;  %v9085_v19 = vld [vmem:[%s13322_s1 + $0x1058] sm:$0xf0]  ;;  %v8179_v20 = vld [vmem:[%s13322_s1 + $0x1110] sm:$0xf]  ;;  %v7975_v37 = vld [vmem:[%s13322_s1 + $0xf78] sm:$0xf] }
  0x9e   :  { %4183 = vmatpush.bf16.msra.mxu2 %v7736_v46  ;;  %v9109_v23 = vld [vmem:[%s13322_s1 + $0x1118] sm:$0xf0]  ;;  %v8275_v24 = vld [vmem:[%s13322_s1 + $0x11d0] sm:$0xf]  ;;  %v8084_v33 = vor.u32 %v9085_v19, %v8083_v16  ;;  %v9058_v38 = vld [vmem:[%s13322_s1 + $0xf80] sm:$0xf0] }
  0x9f   :  { %4196 = vmatpush.bf16.msra.mxu3 %v7832_v50  ;;  %v9133_v27 = vld [vmem:[%s13322_s1 + $0x11d8] sm:$0xf0]  ;;  %v840_v28 = vld.sshfl [vmem:[#allocation1 + $0x8] sm:$0xff pattern:$0x73625140]  ;;  %v8180_v34 = vor.u32 %v9109_v23, %v8179_v20  ;;  %v7976_v46 = vor.u32 %v9058_v38, %v7975_v37  ;;  %vm5031_vm0 = vcmask 261120  }
  0xa0   :  { %4158 = vmatpush.bf16.msra.mxu0 %v7532_v61  ;;  %v842_v29 = vld.sshfl [vmem:[#allocation1 + $0x18] sm:$0xff pattern:$0x73625140]  ;;  %v8276_v40 = vor.u32 %v9133_v27, %v8275_v24  ;;  %v9082_v41 = vld [vmem:[%s13322_s1 + $0x1040] sm:$0xf0]  ;;  %vm5133_vm1 = vcmask 523264  }
  0xa1   :  { %4171 = vmatpush.bf16.msra.mxu1 %v7628_v1  ;;  %v8071_v39 = vld [vmem:[%s13322_s1 + $0x1038] sm:$0xf]  ;;  %v9106_v43 = vld [vmem:[%s13322_s1 + $0x1100] sm:$0xf0]  ;;  %v7963_v49 = vld [vmem:[%s13322_s1 + $0xf60] sm:$0xf] }
  0xa2   :  { %4184 = vmatpush.bf16.msra.mxu2 %v7724_v2  ;;  %v8167_v42 = vld [vmem:[%s13322_s1 + $0x10f8] sm:$0xf]  ;;  %v9130_v45 = vld [vmem:[%s13322_s1 + $0x11c0] sm:$0xf0]  ;;  %v8072_v47 = vor.u32 %v9082_v41, %v8071_v39  ;;  %v9055_v50 = vld [vmem:[%s13322_s1 + $0xf68] sm:$0xf0] }
  0xa3   :  { %4197 = vmatpush.bf16.msra.mxu3 %v7820_v5  ;;  %4159 = vmatmul.bf16.vlgmr.msra.gmra.mxu0 %v839_v9  ;;  %v8263_v44 = vld [vmem:[%s13322_s1 + $0x11b8] sm:$0xf]  ;;  %v8168_v48 = vor.u32 %v9106_v43, %v8167_v42  ;;  %v8059_v53 = vld [vmem:[%s13322_s1 + $0x1020] sm:$0xf]  ;;  %v9079_v57 = vld [vmem:[%s13322_s1 + $0x1028] sm:$0xf0]  ;;  %v7964_v62 = vor.u32 %v9055_v50, %v7963_v49 }
  0xa4   :  { %4203 = vmatpush.bf16.msrb.mxu0 %v8000_v6  ;;  %4172 = vmatmul.bf16.vlgmr.msra.gmra.mxu1 %v840_v28  ;;  %v8264_v56 = vor.u32 %v9130_v45, %v8263_v44  ;;  %v8155_v58 = vld [vmem:[%s13322_s1 + $0x10e0] sm:$0xf]  ;;  %v9103_v59 = vld [vmem:[%s13322_s1 + $0x10e8] sm:$0xf0]  ;;  %v8060_v63 = vor.u32 %v9079_v57, %v8059_v53  ;;  %v7951_v1 = vld [vmem:[%s13322_s1 + $0xf48] sm:$0xf] }
  0xa5   :  { %4216 = vmatpush.bf16.msrb.mxu1 %v8096_v7  ;;  %4185 = vmatmul.bf16.vlgmr.msra.gmra.mxu2 %v841_v18  ;;  %v8251_v60 = vld [vmem:[%s13322_s1 + $0x11a0] sm:$0xf]  ;;  %v9127_v61 = vld [vmem:[%s13322_s1 + $0x11a8] sm:$0xf0]  ;;  %v8156_v0 = vor.u32 %v9103_v59, %v8155_v58  ;;  %v9052_v2 = vld [vmem:[%s13322_s1 + $0xf50] sm:$0xf0] }
  0xa6   :  { %4229 = vmatpush.bf16.msrb.mxu2 %v8192_v8  ;;  %4198 = vmatmul.bf16.vlgmr.msra.gmra.mxu3 %v842_v29  ;;  %v8047_v3 = vld [vmem:[%s13322_s1 + $0x1008] sm:$0xf]  ;;  %v8252_v4 = vor.u32 %v9127_v61, %v8251_v60  ;;  %v9076_v5 = vld [vmem:[%s13322_s1 + $0x1010] sm:$0xf0]  ;;  %v7952_v12 = vor.u32 %v9052_v2, %v7951_v1  ;;  %v7939_v15 = vld [vmem:[%s13322_s1 + $0xf30] sm:$0xf]  ;;  %v3952_v53 = vpop.f32.mrf.mxu0 }
  0xa7   :  { %4242 = vmatpush.bf16.msrb.mxu3 %v8288_v17  ;;  %v8143_v6 = vld [vmem:[%s13322_s1 + $0x10c8] sm:$0xf]  ;;  %v9100_v7 = vld [vmem:[%s13322_s1 + $0x10d0] sm:$0xf0]  ;;  %v8048_v16 = vor.u32 %v9076_v5, %v8047_v3  ;;  %v9049_v18 = vld [vmem:[%s13322_s1 + $0xf38] sm:$0xf0] }
  0xa8   :  { %4204 = vmatpush.bf16.msrb.mxu0 %v7988_v30  ;;  %v8239_v8 = vld [vmem:[%s13322_s1 + $0x1188] sm:$0xf]  ;;  %v9124_v9 = vld [vmem:[%s13322_s1 + $0x1190] sm:$0xf0]  ;;  %v8144_v17 = vor.u32 %v9100_v7, %v8143_v6  ;;  %v8035_v19 = vld [vmem:[%s13322_s1 + $0xff0] sm:$0xf] }
  0xa9   :  { %4217 = vmatpush.bf16.msrb.mxu1 %v8084_v33  ;;  %v9073_v20 = vld [vmem:[%s13322_s1 + $0xff8] sm:$0xf0]  ;;  %v8240_v23 = vor.u32 %v9124_v9, %v8239_v8  ;;  %v8131_v24 = vld [vmem:[%s13322_s1 + $0x10b0] sm:$0xf]  ;;  %v802_v28 = vld [vmem:[%s13323_s2] sm:$0x7]  ;;  %v7940_v33 = vor.u32 %v9049_v18, %v7939_v15 }
  0xaa   :  { %4230 = vmatpush.bf16.msrb.mxu2 %v8180_v34  ;;  %v9097_v27 = vld [vmem:[%s13322_s1 + $0x10b8] sm:$0xf0]  ;;  %v8227_v29 = vld [vmem:[%s13322_s1 + $0x1170] sm:$0xf]  ;;  %v7927_v34 = vld [vmem:[%s13322_s1 + $0xf18] sm:$0xf]  ;;  %v8036_v37 = vor.u32 %v9073_v20, %v8035_v19 }
  0xab   :  { %4243 = vmatpush.bf16.msrb.mxu3 %v8276_v40  ;;  %v9121_v30 = vld [vmem:[%s13322_s1 + $0x1178] sm:$0xf0]  ;;  %v8132_v38 = vor.u32 %v9097_v27, %v8131_v24  ;;  %v9046_v39 = vld [vmem:[%s13322_s1 + $0xf20] sm:$0xf0]  ;;  %v8023_v40 = vld [vmem:[%s13322_s1 + $0xfd8] sm:$0xf]  ;;  %v3978_v19 = vpop.f32.mrf.mxu2 }
  0xac   :  { %4205 = vmatpush.bf16.msrb.mxu0 %v7976_v46  ;;  %v804_v41 = vperm.slane %v802_v28, 0  ;;  %v8228_v42 = vor.u32 %v9121_v30, %v8227_v29  ;;  %v9070_v43 = vld [vmem:[%s13322_s1 + $0xfe0] sm:$0xf0]  ;;  %v8119_v44 = vld [vmem:[%s13322_s1 + $0x1098] sm:$0xf]  ;;  %vm5205_vm2 = vcmask 1041408  }
  0xad   :  { %4218 = vmatpush.bf16.msrb.mxu1 %v8072_v47  ;;  %v9094_v45 = vld [vmem:[%s13322_s1 + $0x10a0] sm:$0xf0]  ;;  %v8215_v46 = vld [vmem:[%s13322_s1 + $0x1158] sm:$0xf]  ;;  %v7915_v49 = vld [vmem:[%s13322_s1 + $0xf00] sm:$0xf]  ;;  %v3991_v27 = vpop.f32.mrf.mxu3 }
  0xae   :  { %4231 = vmatpush.bf16.msrb.mxu2 %v8168_v48  ;;  %v9118_v47 = vld [vmem:[%s13322_s1 + $0x1160] sm:$0xf0]  ;;  %v7928_v48 = vor.u32 %v9046_v39, %v7927_v34  ;;  %v9043_v50 = vld [vmem:[%s13322_s1 + $0xf08] sm:$0xf0]  ;;  %v8120_v57 = vor.u32 %v9094_v45, %v8119_v44  ;;  %v8011_v58 = vld [vmem:[%s13322_s1 + $0xfc0] sm:$0xf]  ;;  %v3953_v61 = vadd.f32 %v3952_v53, %v804_v41  ;;  %v3954_v44 = vpop.f32.mrf.mxu0 }
  0xaf   :  { %4244 = vmatpush.bf16.msrb.mxu3 %v8264_v56  ;;  %v8024_v56 = vor.u32 %v9070_v43, %v8023_v40  ;;  %v9067_v59 = vld [vmem:[%s13322_s1 + $0xfc8] sm:$0xf0]  ;;  %v8107_v60 = vld [vmem:[%s13322_s1 + $0x1080] sm:$0xf]  ;;  %v7916_v7 = vor.u32 %v9043_v50, %v7915_v49  ;;  %v6177_v8 = vld [vmem:[%s13322_s1 + $0x174] sm:$0xf0] }
  0xb0   :  { %4206 = vmatpush.bf16.msrb.mxu0 %v7964_v62  ;;  %v3965_v62 = vpop.f32.mrf.mxu1  ;;  %v8203_v1 = vld [vmem:[%s13322_s1 + $0x1140] sm:$0xf]  ;;  %v9115_v2 = vld [vmem:[%s13322_s1 + $0x1148] sm:$0xf0]  ;;  %v8012_v15 = vor.u32 %v9067_v59, %v8011_v58  ;;  %v6369_v18 = vld [vmem:[%s13322_s1 + $0x2f4] sm:$0xf0] }
  0xb1   :  { %4219 = vmatpush.bf16.msrb.mxu1 %v8060_v63  ;;  %v8216_v63 = vor.u32 %v9118_v47, %v8215_v46  ;;  %v8583_v3 = vld [vmem:[%s13322_s1 + $0xac] sm:$0xf]  ;;  %v3966_v6 = vadd.f32 %v3965_v62, %v3953_v61  ;;  %v8204_v20 = vor.u32 %v9115_v2, %v8203_v1  ;;  %v843_v30 = vld.sshfl [vmem:[#allocation1 + $0x20] sm:$0xff pattern:$0x73625140]  ;;  %s9277_s30 = smov 64  }
  0xb2   :  { %4232 = vmatpush.bf16.msrb.mxu2 %v8156_v0  ;;  %v9091_v0 = vld [vmem:[%s13322_s1 + $0x1088] sm:$0xf0]  ;;  %v6069_v34 = vld [vmem:[%s13322_s1 + $0x9c] sm:$0xf0]  ;;  %v8628_v41 = vld [vmem:[%s13322_s1 + $0x214] sm:$0xf] }
  0xb3   :  { %4245 = vmatpush.bf16.msrb.mxu3 %v8252_v4  ;;  %v6081_v4 = vld [vmem:[%s13322_s1 + $0xb4] sm:$0xf0]  ;;  %v8607_v5 = vld [vmem:[%s13322_s1 + $0x16c] sm:$0xf]  ;;  %v3979_v24 = vadd.f32 %v3978_v19, %v3966_v6  ;;  %v6165_v40 = vld [vmem:[%s13322_s1 + $0x15c] sm:$0xf0]  ;;  %v3980_v2 = vpop.f32.mrf.mxu2 }
  0xb4   :  { %4207 = vmatpush.bf16.msrb.mxu0 %v7952_v12  ;;  %v8631_v9 = vld [vmem:[%s13322_s1 + $0x22c] sm:$0xf]  ;;  %v6273_v12 = vld [vmem:[%s13322_s1 + $0x234] sm:$0xf0]  ;;  %v6180_v28 = vor.u32 %v8607_v5, %v6177_v8  ;;  %v8652_v45 = vld [vmem:[%s13322_s1 + $0x2d4] sm:$0xf] }
  0xb5   :  { %4220 = vmatpush.bf16.msrb.mxu1 %v8048_v16  ;;  %v8108_v16 = vor.u32 %v9091_v0, %v8107_v60  ;;  %v6276_v29 = vor.u32 %v8631_v9, %v6273_v12  ;;  %v845_v39 = vld.sshfl [vmem:[#allocation1 + $0x30] sm:$0xff pattern:$0x73625140]  ;;  %v3992_v43 = vadd.f32 %v3991_v27, %v3979_v24  ;;  %v6357_v46 = vld [vmem:[%s13322_s1 + $0x2dc] sm:$0xf0]  ;;  %s9278_s8 = smov 32  }
  0xb6   :  { %4233 = vmatpush.bf16.msrb.mxu2 %v8144_v17  ;;  %v8655_v17 = vld [vmem:[%s13322_s1 + $0x2ec] sm:$0xf]  ;;  %v846_v49 = vld.sshfl [vmem:[#allocation1 + $0x38] sm:$0xff pattern:$0x73625140]  ;;  %v6360_v60 = vor.u32 %v8652_v45, %v6357_v46  ;;  %s9279_s9 = smov 96  }
  0xb7   :  { %4246 = vmatpush.bf16.msrb.mxu3 %v8240_v23  ;;  %v6084_v23 = vor.u32 %v8583_v3, %v6081_v4  ;;  %v6057_v58 = vld [vmem:[%s13322_s1 + $0x84] sm:$0xf0]  ;;  %v8601_v59 = vld [vmem:[%s13322_s1 + $0x13c] sm:$0xf]  ;;  %v3993_v4 = vpop.f32.mrf.mxu3  ;;  %v6045_v8 = vld [vmem:[%s13322_s1 + $0x6c] sm:$0xf0] }
  0xb8   :  { %4208 = vmatpush.bf16.msrb.mxu0 %v7940_v33  ;;  %v8580_v33 = vld [vmem:[%s13322_s1 + $0x94] sm:$0xf]  ;;  %v3967_v47 = vpop.f32.mrf.mxu1  ;;  %v6153_v61 = vld [vmem:[%s13322_s1 + $0x144] sm:$0xf0]  ;;  %v8625_v62 = vld [vmem:[%s13322_s1 + $0x1fc] sm:$0xf] }
  0xb9   :  { %4221 = vmatpush.bf16.msrb.mxu1 %v8036_v37  ;;  %v8604_v37 = vld [vmem:[%s13322_s1 + $0x154] sm:$0xf]  ;;  %v6072_v50 = vor.u32 %v8580_v33, %v6069_v34  ;;  %v8649_v0 = vld [vmem:[%s13322_s1 + $0x2bc] sm:$0xf]  ;;  %v6345_v1 = vld [vmem:[%s13322_s1 + $0x2c4] sm:$0xf0]  ;;  %v6156_v5 = vor.u32 %v8601_v59, %v6153_v61 }
  0xba   :  { %4234 = vmatpush.bf16.msrb.mxu2 %v8132_v38  ;;  %v6372_v38 = vor.u32 %v8655_v17, %v6369_v18  ;;  %v6168_v53 = vor.u32 %v8604_v37, %v6165_v40  ;;  %v8598_v9 = vld [vmem:[%s13322_s1 + $0x124] sm:$0xf]  ;;  %v6348_v12 = vor.u32 %v8649_v0, %v6345_v1  ;;  %v6237_v17 = vld [vmem:[%s13322_s1 + $0x1ec] sm:$0xf0]  ;;  %v6225_v40 = vld [vmem:[%s13322_s1 + $0x1d4] sm:$0xf0] }
  0xbb   :  { %4247 = vmatpush.bf16.msrb.mxu3 %v8228_v42  ;;  %v6261_v42 = vld [vmem:[%s13322_s1 + $0x21c] sm:$0xf0]  ;;  %v8646_v18 = vld [vmem:[%s13322_s1 + $0x2a4] sm:$0xf]  ;;  %v6333_v19 = vld [vmem:[%s13322_s1 + $0x2ac] sm:$0xf0] }
  0xbc   :  { %4209 = vmatpush.bf16.msrb.mxu0 %v7928_v48  ;;  %v844_v48 = vld.sshfl [vmem:[#allocation1 + $0x28] sm:$0xff pattern:$0x73625140]  ;;  %v6336_v37 = vor.u32 %v8646_v18, %v6333_v19  ;;  %v8568_v47 = vld [vmem:[%s13322_s1 + $0x34] sm:$0xf]  ;;  %vm5188_vm3 = vcmask 27648  }
  0xbd   :  { %4222 = vmatpush.bf16.msrb.mxu1 %v8024_v56  ;;  %v6264_v56 = vor.u32 %v8628_v41, %v6261_v42  ;;  %v8643_v41 = vld [vmem:[%s13322_s1 + $0x28c] sm:$0xf]  ;;  %v6321_v42 = vld [vmem:[%s13322_s1 + $0x294] sm:$0xf0]  ;;  %v8640_v61 = vld [vmem:[%s13322_s1 + $0x274] sm:$0xf] }
  0xbe   :  { %4235 = vmatpush.bf16.msrb.mxu2 %v8120_v57  ;;  %v8577_v57 = vld [vmem:[%s13322_s1 + $0x7c] sm:$0xf]  ;;  %v8562_v19 = vld [vmem:[%s13322_s1 + $0x4] sm:$0xf]  ;;  %vm5201_vm4 = vcmask 31744   ;;  %vm5350_vm5 = vcmask 519168  }
  0xbf   :  { %4248 = vmatpush.bf16.msrb.mxu3 %v8216_v63  ;;  %v6249_v63 = vld [vmem:[%s13322_s1 + $0x204] sm:$0xf0]  ;;  %v6060_v3 = vor.u32 %v8577_v57, %v6057_v58  ;;  %v8616_v57 = vld [vmem:[%s13322_s1 + $0x1b4] sm:$0xf]  ;;  %v6213_v58 = vld [vmem:[%s13322_s1 + $0x1bc] sm:$0xf0] }
  0xc0   :  { %4210 = vmatpush.bf16.msrb.mxu0 %v7916_v7  ;;  %v6252_v6 = vor.u32 %v8625_v62, %v6249_v63  ;;  %v8574_v7 = vld [vmem:[%s13322_s1 + $0x64] sm:$0xf]  ;;  %v6309_v62 = vld [vmem:[%s13322_s1 + $0x27c] sm:$0xf0]  ;;  %v8565_v4 = vld [vmem:[%s13322_s1 + $0x1c] sm:$0xf] }
  0xc1   :  { %4223 = vmatpush.bf16.msrb.mxu1 %v8012_v15  ;;  %v6141_v15 = vld [vmem:[%s13322_s1 + $0x12c] sm:$0xf0]  ;;  %v4017_v34 = vpop.f32.mrf.mxu1  ;;  %s9281_s11 = smov [#allocation2]  }
  0xc2   :  { %4236 = vmatpush.bf16.msrb.mxu2 %v8108_v16  ;;  %v8622_v16 = vld [vmem:[%s13322_s1 + $0x1e4] sm:$0xf]  ;;  %v6144_v24 = vor.u32 %v8598_v9, %v6141_v15  ;;  %v6105_v9 = vld [vmem:[%s13322_s1 + $0xe4] sm:$0xf0]  ;;  %s5982_s12 = sshll.u32 %s9281_s11, 4  ;;  %s5983_s12 = int_to_ptr.vmem [resolvable:$true] %s5982_s12 }
  0xc3   :  { %4249 = vmatpush.bf16.msrb.mxu3 %v8204_v20  ;;  %4211 = vmatmul.bf16.vlgmr.msrb.gmra.mxu0 %v843_v30  ;;  %v6048_v20 = vor.u32 %v8574_v7, %v6045_v8  ;;  %v6240_v27 = vor.u32 %v8622_v16, %v6237_v17  ;;  %v8595_v30 = vld [vmem:[%s13322_s1 + $0x10c] sm:$0xf]  ;;  %v6312_v8 = vor.u32 %v8640_v61, %v6309_v62  ;;  %v6201_v15 = vld [vmem:[%s13322_s1 + $0x1a4] sm:$0xf0]  ;;  %v8637_v16 = vld [vmem:[%s13322_s1 + $0x25c] sm:$0xf] }
  0xc4   :  { %4255 = vmatpush.bf16.msra.mxu0 %v6084_v23  ;;  %4224 = vmatmul.bf16.vlgmr.msrb.gmra.mxu1 %v844_v48  ;;  %v4004_v23 = vpop.f32.mrf.mxu0  ;;  %v6021_v48 = vld [vmem:[%s13322_s1 + $0x3c] sm:$0xf0]  ;;  %v6297_v17 = vld [vmem:[%s13322_s1 + $0x264] sm:$0xf0]  ;;  %v8700_v61 = vld [vmem:[%s13322_s1 + $0x454] sm:$0xf] }
  0xc5   :  { %4268 = vmatpush.bf16.msra.mxu1 %v6180_v28  ;;  %4237 = vmatmul.bf16.vlgmr.msrb.gmra.mxu2 %v845_v39  ;;  %v8571_v28 = vld [vmem:[%s13322_s1 + $0x4c] sm:$0xf]  ;;  %v4005_v33 = vadd.f32 %v4004_v23, %v3992_v43  ;;  %v6024_v63 = vor.u32 %v8568_v47, %v6021_v48 }
  0xc6   :  { %4281 = vmatpush.bf16.msra.mxu2 %v6276_v29  ;;  %4250 = vmatmul.bf16.vlgmr.msrb.gmra.mxu3 %v846_v49  ;;  %v6033_v29 = vld [vmem:[%s13322_s1 + $0x54] sm:$0xf0]  ;;  %v8619_v39 = vld [vmem:[%s13322_s1 + $0x1cc] sm:$0xf]  ;;  %v8592_v49 = vld [vmem:[%s13322_s1 + $0xf4] sm:$0xf] }
  0xc7   :  { %4294 = vmatpush.bf16.msra.mxu3 %v6372_v38  ;;  %v6129_v38 = vld [vmem:[%s13322_s1 + $0x114] sm:$0xf0]  ;;  %v4018_v43 = vadd.f32 %v4017_v34, %v4005_v33  ;;  %v6036_v44 = vor.u32 %v8571_v28, %v6033_v29  ;;  %v6228_v46 = vor.u32 %v8619_v39, %v6225_v40  ;;  %v6093_v28 = vld [vmem:[%s13322_s1 + $0xcc] sm:$0xf0]  ;;  %v8610_v29 = vld [vmem:[%s13322_s1 + $0x184] sm:$0xf]  ;;  %v6300_v33 = vor.u32 %v8637_v16, %v6297_v17 }
  0xc8   :  { %4256 = vmatpush.bf16.msra.mxu0 %v6072_v50  ;;  %v6132_v45 = vor.u32 %v8595_v30, %v6129_v38  ;;  %v4030_v50 = vpop.f32.mrf.mxu2  ;;  %v6189_v34 = vld [vmem:[%s13322_s1 + $0x18c] sm:$0xf0]  ;;  %v8679_v40 = vld [vmem:[%s13322_s1 + $0x3ac] sm:$0xf]  ;;  %v6537_v16 = vld [vmem:[%s13322_s1 + $0x444] sm:$0xf0] }
  0xc9   :  { %4269 = vmatpush.bf16.msra.mxu1 %v6168_v53  ;;  %v6324_v53 = vor.u32 %v8643_v41, %v6321_v42  ;;  %v4031_v59 = vadd.f32 %v4030_v50, %v4018_v43  ;;  %v4019_v7 = vpop.f32.mrf.mxu1  ;;  %v6285_v38 = vld [vmem:[%s13322_s1 + $0x24c] sm:$0xf0]  ;;  %v6465_v41 = vld [vmem:[%s13322_s1 + $0x3b4] sm:$0xf0]  ;;  %v8703_v42 = vld [vmem:[%s13322_s1 + $0x46c] sm:$0xf]  ;;  %v6192_v48 = vor.u32 %v8610_v29, %v6189_v34 }
  0xca   :  { %4282 = vmatpush.bf16.msra.mxu2 %v6264_v56  ;;  %v6117_v56 = vld [vmem:[%s13322_s1 + $0xfc] sm:$0xf0]  ;;  %v6753_v50 = vld [vmem:[%s13322_s1 + $0x5f4] sm:$0xf0]  ;;  %v8721_v17 = vld [vmem:[%s13322_s1 + $0x4fc] sm:$0xf] }
  0xcb   :  { %4295 = vmatpush.bf16.msra.mxu3 %v6360_v60  ;;  %v4043_v60 = vpop.f32.mrf.mxu3  ;;  %v6120_v2 = vor.u32 %v8592_v49, %v6117_v56  ;;  %v8751_v49 = vld [vmem:[%s13322_s1 + $0x5ec] sm:$0xf]  ;;  %v6468_v56 = vor.u32 %v8679_v40, %v6465_v41  ;;  %v6429_v29 = vld [vmem:[%s13322_s1 + $0x36c] sm:$0xf0]  ;;  %v8742_v40 = vld [vmem:[%s13322_s1 + $0x5a4] sm:$0xf] }
  0xcc   :  { %4257 = vmatpush.bf16.msra.mxu0 %v6060_v3  ;;  %v10687_v0 = vadd.f32 %v4043_v60, %v4031_v59  ;;  %v4006_v1 = vpop.f32.mrf.mxu0  ;;  %v6216_v3 = vor.u32 %v8616_v57, %v6213_v58  ;;  %v8676_v59 = vld [vmem:[%s13322_s1 + $0x394] sm:$0xf]  ;;  %v6453_v60 = vld [vmem:[%s13322_s1 + $0x39c] sm:$0xf0]  ;;  %v6756_v62 = vor.u32 %v8751_v49, %v6753_v50  ;;  %v6525_v34 = vld [vmem:[%s13322_s1 + $0x42c] sm:$0xf0] }
  0xcd   :  { %4270 = vmatpush.bf16.msra.mxu1 %v6156_v5  ;;  %v6009_v5 = vld [vmem:[%s13322_s1 + $0x24] sm:$0xf0]  ;;  %v8724_v1 = vld [vmem:[%s13322_s1 + $0x514] sm:$0xf]  ;;  %v6717_v41 = vld [vmem:[%s13322_s1 + $0x5ac] sm:$0xf0] }
  0xce   :  { %4283 = vmatpush.bf16.msra.mxu2 %v6252_v6  ;;  %v8589_v6 = vld [vmem:[%s13322_s1 + $0xdc] sm:$0xf]  ;;  %v6012_v18 = vor.u32 %v8565_v4, %v6009_v5  ;;  %v6741_v4 = vld [vmem:[%s13322_s1 + $0x5dc] sm:$0xf0]  ;;  %v6456_v5 = vor.u32 %v8676_v59, %v6453_v60  ;;  %v8691_v49 = vld [vmem:[%s13322_s1 + $0x40c] sm:$0xf] }
  0xcf   :  { %4296 = vmatpush.bf16.msra.mxu3 %v6348_v12  ;;  %v8613_v12 = vld [vmem:[%s13322_s1 + $0x19c] sm:$0xf]  ;;  %v6108_v23 = vor.u32 %v8589_v6, %v6105_v9  ;;  %v6441_v9 = vld [vmem:[%s13322_s1 + $0x384] sm:$0xf0]  ;;  %v6705_v59 = vld [vmem:[%s13322_s1 + $0x594] sm:$0xf0] }
  0xd0   :  { %4258 = vmatpush.bf16.msra.mxu0 %v6048_v20  ;;  %v5997_v20 = vld [vmem:[%s13322_s1 + $0xc] sm:$0xf0]  ;;  %v4032_v30 = vpop.f32.mrf.mxu2 }
  0xd1   :  { %4271 = vmatpush.bf16.msra.mxu1 %v6144_v24  ;;  %v6204_v24 = vor.u32 %v8613_v12, %v6201_v15  ;;  %v6000_v43 = vor.u32 %v8562_v19, %v5997_v20  ;;  %v8697_v12 = vld [vmem:[%s13322_s1 + $0x43c] sm:$0xf]  ;;  %v6729_v20 = vld [vmem:[%s13322_s1 + $0x5c4] sm:$0xf0]  ;;  %v8694_v30 = vld [vmem:[%s13322_s1 + $0x424] sm:$0xf] }
  0xd2   :  { %4284 = vmatpush.bf16.msra.mxu2 %v6240_v27  ;;  %v8586_v27 = vld [vmem:[%s13322_s1 + $0xc4] sm:$0xf]  ;;  %v8745_v19 = vld [vmem:[%s13322_s1 + $0x5bc] sm:$0xf] }
  0xd3   :  { %4297 = vmatpush.bf16.msra.mxu3 %v6336_v37  ;;  %v8634_v37 = vld [vmem:[%s13322_s1 + $0x244] sm:$0xf]  ;;  %v4045_v39 = vpop.f32.mrf.mxu3  ;;  %v6096_v47 = vor.u32 %v8586_v27, %v6093_v28 }
  0xd4   :  { %4259 = vmatpush.bf16.msra.mxu0 %v6036_v44  ;;  %v6561_v44 = vld [vmem:[%s13322_s1 + $0x474] sm:$0xf0]  ;;  %v8670_v28 = vld [vmem:[%s13322_s1 + $0x364] sm:$0xf] }
  0xd5   :  { %4272 = vmatpush.bf16.msra.mxu1 %v6132_v45  ;;  %v8727_v45 = vld [vmem:[%s13322_s1 + $0x52c] sm:$0xf]  ;;  %v6564_v57 = vor.u32 %v8703_v42, %v6561_v44 }
  0xd6   :  { %4285 = vmatpush.bf16.msra.mxu2 %v6228_v46  ;;  %v6657_v46 = vld [vmem:[%s13322_s1 + $0x534] sm:$0xf0] }
  0xd7   :  { %4298 = vmatpush.bf16.msra.mxu3 %v6324_v53  ;;  %v6288_v53 = vor.u32 %v8634_v37, %v6285_v38  ;;  %v6660_v58 = vor.u32 %v8727_v45, %v6657_v46  ;;  %v8718_v37 = vld [vmem:[%s13322_s1 + $0x4e4] sm:$0xf]  ;;  %v6621_v38 = vld [vmem:[%s13322_s1 + $0x4ec] sm:$0xf0]  ;;  %v6528_v45 = vor.u32 %v8694_v30, %v6525_v34  ;;  %v6489_v30 = vld [vmem:[%s13322_s1 + $0x3e4] sm:$0xf0] }
  0xd8   :  { %4260 = vmatpush.bf16.msra.mxu0 %v6024_v63  ;;  %v6549_v63 = vld [vmem:[%s13322_s1 + $0x45c] sm:$0xf0]  ;;  %v6624_v46 = vor.u32 %v8718_v37, %v6621_v38  ;;  %v6585_v34 = vld [vmem:[%s13322_s1 + $0x4a4] sm:$0xf0]  ;;  %v8733_v37 = vld [vmem:[%s13322_s1 + $0x55c] sm:$0xf] }
  0xd9   :  { %4273 = vmatpush.bf16.msra.mxu1 %v6120_v2  ;;  %v6645_v2 = vld [vmem:[%s13322_s1 + $0x51c] sm:$0xf0]  ;;  %v6552_v6 = vor.u32 %v8700_v61, %v6549_v63  ;;  %v8664_v63 = vld [vmem:[%s13322_s1 + $0x334] sm:$0xf]  ;;  %v6681_v38 = vld [vmem:[%s13322_s1 + $0x564] sm:$0xf0] }
  0xda   :  { %4286 = vmatpush.bf16.msra.mxu2 %v6216_v3  ;;  %v8748_v3 = vld [vmem:[%s13322_s1 + $0x5d4] sm:$0xf]  ;;  %v6648_v7 = vor.u32 %v8724_v1, %v6645_v2  ;;  %v6405_v1 = vld [vmem:[%s13322_s1 + $0x33c] sm:$0xf0] }
  0xdb   :  { %4299 = vmatpush.bf16.msra.mxu3 %v6312_v8  ;;  %v8673_v8 = vld [vmem:[%s13322_s1 + $0x37c] sm:$0xf]  ;;  %v6744_v15 = vor.u32 %v8748_v3, %v6741_v4  ;;  %v8688_v2 = vld [vmem:[%s13322_s1 + $0x3f4] sm:$0xf] }
  0xdc   :  { %4261 = vmatpush.bf16.msra.mxu0 %v6012_v18  ;;  %v6633_v18 = vld [vmem:[%s13322_s1 + $0x504] sm:$0xf0] }
  0xdd   :  { %4274 = vmatpush.bf16.msra.mxu1 %v6108_v23  ;;  %v6444_v23 = vor.u32 %v8673_v8, %v6441_v9  ;;  %v6636_v27 = vor.u32 %v8721_v17, %v6633_v18  ;;  %v6408_v17 = vor.u32 %v8664_v63, %v6405_v1 }
  0xde   :  { %4287 = vmatpush.bf16.msra.mxu2 %v6204_v24  ;;  %v6540_v24 = vor.u32 %v8697_v12, %v6537_v16  ;;  %v8736_v12 = vld [vmem:[%s13322_s1 + $0x574] sm:$0xf] }
  0xdf   :  { %4300 = vmatpush.bf16.msra.mxu3 %v6300_v33  ;;  %v6732_v33 = vor.u32 %v8745_v19, %v6729_v20 }
  0xe0   :  { %4262 = vmatpush.bf16.msra.mxu0 %v6000_v43  ;;  %v4056_v39 = vpop.f32.mrf.mxu0  ;;  %v6432_v43 = vor.u32 %v8670_v28, %v6429_v29  ;;  %v8685_v28 = vld [vmem:[%s13322_s1 + $0x3dc] sm:$0xf] }
  0xe1   :  { %4275 = vmatpush.bf16.msra.mxu1 %v6096_v47  ;;  %v4057_v42 = vadd.f32 %v4056_v39, %v10687_v0  ;;  %v4069_v44 = vpop.f32.mrf.mxu1  ;;  %v8667_v47 = vld [vmem:[%s13322_s1 + $0x34c] sm:$0xf]  ;;  %v6720_v0 = vor.u32 %v8742_v40, %v6717_v41  ;;  %v8658_v40 = vld [vmem:[%s13322_s1 + $0x304] sm:$0xf]  ;;  %v6381_v41 = vld [vmem:[%s13322_s1 + $0x30c] sm:$0xf0] }
  0xe2   :  { %4288 = vmatpush.bf16.msra.mxu2 %v6192_v48  ;;  %v6417_v48 = vld [vmem:[%s13322_s1 + $0x354] sm:$0xf0] }
  0xe3   :  { %4301 = vmatpush.bf16.msra.mxu3 %v6288_v53  ;;  %4263 = vmatmul.bf16.vlgmr.msra.gmra.mxu0 %v9654_v32  ;;  %v4070_v50 = vadd.f32 %v4069_v44, %v4057_v42  ;;  %v6513_v53 = vld [vmem:[%s13322_s1 + $0x414] sm:$0xf0]  ;;  %v6420_v60 = vor.u32 %v8667_v47, %v6417_v48  ;;  %v6492_v42 = vor.u32 %v8685_v28, %v6489_v30  ;;  %v8682_v44 = vld [vmem:[%s13322_s1 + $0x3c4] sm:$0xf]  ;;  %v6573_v48 = vld [vmem:[%s13322_s1 + $0x48c] sm:$0xf0] }
  0xe4   :  { %4307 = vmatpush.bf16.msrb.mxu0 %v6468_v56  ;;  %4276 = vmatmul.bf16.vlgmr.msra.gmra.mxu1 %v9658_v36  ;;  %v8715_v56 = vld [vmem:[%s13322_s1 + $0x4cc] sm:$0xf]  ;;  %v6516_v61 = vor.u32 %v8691_v49, %v6513_v53  ;;  %v6684_v47 = vor.u32 %v8733_v37, %v6681_v38  ;;  %v8730_v49 = vld [vmem:[%s13322_s1 + $0x544] sm:$0xf]  ;;  %v6825_v30 = vld [vmem:[%s13322_s1 + $0x684] sm:$0xf0] }
  0xe5   :  { %4320 = vmatpush.bf16.msrb.mxu1 %v6564_v57  ;;  %4289 = vmatmul.bf16.vlgmr.msra.gmra.mxu2 %v9652_v31  ;;  %v6609_v57 = vld [vmem:[%s13322_s1 + $0x4d4] sm:$0xf0]  ;;  %v8775_v53 = vld [vmem:[%s13322_s1 + $0x6ac] sm:$0xf]  ;;  %v6921_v37 = vld [vmem:[%s13322_s1 + $0x744] sm:$0xf0] }
  0xe6   :  { %4333 = vmatpush.bf16.msrb.mxu2 %v6660_v58  ;;  %4302 = vmatmul.bf16.vlgmr.msra.gmra.mxu3 %v9656_v35  ;;  %v8739_v58 = vld [vmem:[%s13322_s1 + $0x58c] sm:$0xf]  ;;  %v8817_v38 = vld [vmem:[%s13322_s1 + $0x7fc] sm:$0xf] }
  0xe7   :  { %4346 = vmatpush.bf16.msrb.mxu3 %v6756_v62  ;;  %v6612_v62 = vor.u32 %v8715_v56, %v6609_v57  ;;  %v6708_v3 = vor.u32 %v8739_v58, %v6705_v59  ;;  %v6849_v56 = vld [vmem:[%s13322_s1 + $0x6b4] sm:$0xf0]  ;;  %v8799_v57 = vld [vmem:[%s13322_s1 + $0x76c] sm:$0xf]  ;;  %v6384_v59 = vor.u32 %v8658_v40, %v6381_v41  ;;  %v8841_v40 = vld [vmem:[%s13322_s1 + $0x8bc] sm:$0xf] }
  0xe8   :  { %4308 = vmatpush.bf16.msrb.mxu0 %v6456_v5  ;;  %v4082_v4 = vpop.f32.mrf.mxu2  ;;  %v6501_v5 = vld [vmem:[%s13322_s1 + $0x3fc] sm:$0xf0]  ;;  %v4058_v16 = vpop.f32.mrf.mxu0  ;;  %v7113_v41 = vld [vmem:[%s13322_s1 + $0x8c4] sm:$0xf0] }
  0xe9   :  { %4321 = vmatpush.bf16.msrb.mxu1 %v6552_v6  ;;  %v8712_v6 = vld [vmem:[%s13322_s1 + $0x4b4] sm:$0xf]  ;;  %v4083_v8 = vadd.f32 %v4082_v4, %v4070_v50  ;;  %v4095_v9 = vpop.f32.mrf.mxu3  ;;  %v4071_v18 = vpop.f32.mrf.mxu1  ;;  %v6504_v20 = vor.u32 %v8688_v2, %v6501_v5  ;;  %v8847_v2 = vld [vmem:[%s13322_s1 + $0x8ec] sm:$0xf]  ;;  %v6852_v5 = vor.u32 %v8775_v53, %v6849_v56  ;;  %v6933_v16 = vld [vmem:[%s13322_s1 + $0x75c] sm:$0xf0] }
  0xea   :  { %4334 = vmatpush.bf16.msrb.mxu2 %v6648_v7  ;;  %v6597_v7 = vld [vmem:[%s13322_s1 + $0x4bc] sm:$0xf0]  ;;  %v8838_v56 = vld [vmem:[%s13322_s1 + $0x8a4] sm:$0xf] }
  0xeb   :  { %4347 = vmatpush.bf16.msrb.mxu3 %v6744_v15  ;;  %v6693_v15 = vld [vmem:[%s13322_s1 + $0x57c] sm:$0xf0]  ;;  %v10886_v19 = vadd.f32 %v4095_v9, %v4083_v8  ;;  %v8772_v8 = vld [vmem:[%s13322_s1 + $0x694] sm:$0xf] }
  0xec   :  { %4309 = vmatpush.bf16.msrb.mxu0 %v6444_v23  ;;  %v6600_v23 = vor.u32 %v8712_v6, %v6597_v7  ;;  %v6696_v29 = vor.u32 %v8736_v12, %v6693_v15  ;;  %v6837_v9 = vld [vmem:[%s13322_s1 + $0x69c] sm:$0xf0]  ;;  %v8796_v12 = vld [vmem:[%s13322_s1 + $0x754] sm:$0xf] }
  0xed   :  { %4322 = vmatpush.bf16.msrb.mxu1 %v6540_v24  ;;  %v8661_v24 = vld [vmem:[%s13322_s1 + $0x31c] sm:$0xf]  ;;  %v7029_v18 = vld [vmem:[%s13322_s1 + $0x81c] sm:$0xf0] }
  0xee   :  { %4335 = vmatpush.bf16.msrb.mxu2 %v6636_v27  ;;  %v6393_v27 = vld [vmem:[%s13322_s1 + $0x324] sm:$0xf0] }
  0xef   :  { %4348 = vmatpush.bf16.msrb.mxu3 %v6732_v33  ;;  %v8709_v33 = vld [vmem:[%s13322_s1 + $0x49c] sm:$0xf]  ;;  %v6396_v39 = vor.u32 %v8661_v24, %v6393_v27  ;;  %v6840_v24 = vor.u32 %v8772_v8, %v6837_v9  ;;  %v6936_v27 = vor.u32 %v8796_v12, %v6933_v16  ;;  %v7089_v8 = vld [vmem:[%s13322_s1 + $0x894] sm:$0xf0]  ;;  %v8760_v16 = vld [vmem:[%s13322_s1 + $0x634] sm:$0xf] }
  0xf0   :  { %4310 = vmatpush.bf16.msrb.mxu0 %v6432_v43  ;;  %v6588_v43 = vor.u32 %v8709_v33, %v6585_v34  ;;  %v4084_v50 = vpop.f32.mrf.mxu2  ;;  %v8793_v33 = vld [vmem:[%s13322_s1 + $0x73c] sm:$0xf] }
  0xf1   :  { %4323 = vmatpush.bf16.msrb.mxu1 %v6528_v45  ;;  %v6477_v45 = vld [vmem:[%s13322_s1 + $0x3cc] sm:$0xf0]  ;;  %v4097_v58 = vpop.f32.mrf.mxu3 }
  0xf2   :  { %4336 = vmatpush.bf16.msrb.mxu2 %v6624_v46  ;;  %v8706_v46 = vld [vmem:[%s13322_s1 + $0x484] sm:$0xf]  ;;  %v6480_v63 = vor.u32 %v8682_v44, %v6477_v45  ;;  %v7005_v50 = vld [vmem:[%s13322_s1 + $0x7ec] sm:$0xf0] }
  0xf3   :  { %4349 = vmatpush.bf16.msrb.mxu3 %v6720_v0  ;;  %v6669_v0 = vld [vmem:[%s13322_s1 + $0x54c] sm:$0xf0]  ;;  %v6576_v1 = vor.u32 %v8706_v46, %v6573_v48  ;;  %v8766_v45 = vld [vmem:[%s13322_s1 + $0x664] sm:$0xf]  ;;  %v7116_v48 = vor.u32 %v8841_v40, %v7113_v41 }
  0xf4   :  { %4311 = vmatpush.bf16.msrb.mxu0 %v6420_v60  ;;  %v6945_v60 = vld [vmem:[%s13322_s1 + $0x774] sm:$0xf0]  ;;  %v6672_v4 = vor.u32 %v8730_v49, %v6669_v0  ;;  %v6813_v46 = vld [vmem:[%s13322_s1 + $0x66c] sm:$0xf0]  ;;  %v8814_v0 = vld [vmem:[%s13322_s1 + $0x7e4] sm:$0xf] }
  0xf5   :  { %4324 = vmatpush.bf16.msrb.mxu1 %v6516_v61  ;;  %v8823_v61 = vld [vmem:[%s13322_s1 + $0x82c] sm:$0xf]  ;;  %v6948_v6 = vor.u32 %v8799_v57, %v6945_v60  ;;  %v6909_v49 = vld [vmem:[%s13322_s1 + $0x72c] sm:$0xf0] }
  0xf6   :  { %4337 = vmatpush.bf16.msrb.mxu2 %v6612_v62  ;;  %v7041_v62 = vld [vmem:[%s13322_s1 + $0x834] sm:$0xf0]  ;;  %v7101_v57 = vld [vmem:[%s13322_s1 + $0x8ac] sm:$0xf0] }
  0xf7   :  { %4350 = vmatpush.bf16.msrb.mxu3 %v6708_v3  ;;  %v7137_v3 = vld [vmem:[%s13322_s1 + $0x8f4] sm:$0xf0]  ;;  %v7044_v7 = vor.u32 %v8823_v61, %v7041_v62  ;;  %v7008_v62 = vor.u32 %v8814_v0, %v7005_v50  ;;  %v8829_v0 = vld [vmem:[%s13322_s1 + $0x85c] sm:$0xf]  ;;  %v7065_v50 = vld [vmem:[%s13322_s1 + $0x864] sm:$0xf0] }
  0xf8   :  { %4312 = vmatpush.bf16.msrb.mxu0 %v6408_v17  ;;  %v7140_v15 = vor.u32 %v8847_v2, %v7137_v3  ;;  %v8820_v17 = vld [vmem:[%s13322_s1 + $0x814] sm:$0xf]  ;;  %v8787_v2 = vld [vmem:[%s13322_s1 + $0x70c] sm:$0xf] }
  0xf9   :  { %4325 = vmatpush.bf16.msrb.mxu1 %v6504_v20  ;;  %v8844_v20 = vld [vmem:[%s13322_s1 + $0x8d4] sm:$0xf]  ;;  %v7032_v28 = vor.u32 %v8820_v17, %v7029_v18  ;;  %v6789_v17 = vld [vmem:[%s13322_s1 + $0x63c] sm:$0xf0] }
  0xfa   :  { %4338 = vmatpush.bf16.msrb.mxu2 %v6600_v23  ;;  %v7125_v23 = vld [vmem:[%s13322_s1 + $0x8dc] sm:$0xf0]  ;;  %v8784_v18 = vld [vmem:[%s13322_s1 + $0x6f4] sm:$0xf] }
  0xfb   :  { %4351 = vmatpush.bf16.msrb.mxu3 %v6696_v29  ;;  %v8769_v29 = vld [vmem:[%s13322_s1 + $0x67c] sm:$0xf]  ;;  %v7128_v34 = vor.u32 %v8844_v20, %v7125_v23 }
  0xfc   :  { %4313 = vmatpush.bf16.msrb.mxu0 %v6396_v39  ;;  %v7017_v39 = vld [vmem:[%s13322_s1 + $0x804] sm:$0xf0] }
  0xfd   :  { %4326 = vmatpush.bf16.msrb.mxu1 %v6492_v42  ;;  %v6828_v42 = vor.u32 %v8769_v29, %v6825_v30  ;;  %v7020_v44 = vor.u32 %v8817_v38, %v7017_v39  ;;  %v6792_v38 = vor.u32 %v8760_v16, %v6789_v17 }
  0xfe   :  { %4339 = vmatpush.bf16.msrb.mxu2 %v6588_v43  ;;  %v6924_v43 = vor.u32 %v8793_v33, %v6921_v37  ;;  %v8832_v33 = vld [vmem:[%s13322_s1 + $0x874] sm:$0xf] }
  0xff   :  { %4352 = vmatpush.bf16.msrb.mxu3 %v6684_v47  ;;  %v8790_v47 = vld [vmem:[%s13322_s1 + $0x724] sm:$0xf] }
 0x100   :  { %4314 = vmatpush.bf16.msrb.mxu0 %v6384_v59  ;;  %v4108_v53 = vpop.f32.mrf.mxu0  ;;  %v6816_v59 = vor.u32 %v8766_v45, %v6813_v46  ;;  %v6912_v61 = vor.u32 %v8790_v47, %v6909_v49  ;;  %v8781_v45 = vld [vmem:[%s13322_s1 + $0x6dc] sm:$0xf]  ;;  %v6873_v47 = vld [vmem:[%s13322_s1 + $0x6e4] sm:$0xf0] }
 0x101   :  { %4327 = vmatpush.bf16.msrb.mxu1 %v6480_v63  ;;  %v4109_v58 = vadd.f32 %v4108_v53, %v10886_v19  ;;  %v4121_v60 = vpop.f32.mrf.mxu1  ;;  %v8763_v63 = vld [vmem:[%s13322_s1 + $0x64c] sm:$0xf]  ;;  %v7104_v19 = vor.u32 %v8838_v56, %v7101_v57  ;;  %v6969_v49 = vld [vmem:[%s13322_s1 + $0x7a4] sm:$0xf0]  ;;  %v8754_v56 = vld [vmem:[%s13322_s1 + $0x604] sm:$0xf] }
 0x102   :  { %4340 = vmatpush.bf16.msrb.mxu2 %v6576_v1  ;;  %v6801_v1 = vld [vmem:[%s13322_s1 + $0x654] sm:$0xf0]  ;;  %v6765_v57 = vld [vmem:[%s13322_s1 + $0x60c] sm:$0xf0] }
 0x103   :  { %4353 = vmatpush.bf16.msrb.mxu3 %v6672_v4  ;;  %4315 = vmatmul.bf16.vlgmr.msrb.gmra.mxu0 %v9768_v22  ;;  %v4122_v3 = vadd.f32 %v4121_v60, %v4109_v58  ;;  %v6897_v4 = vld [vmem:[%s13322_s1 + $0x714] sm:$0xf0]  ;;  %v6804_v9 = vor.u32 %v8763_v63, %v6801_v1  ;;  %v6876_v58 = vor.u32 %v8781_v45, %v6873_v47  ;;  %v8778_v60 = vld [vmem:[%s13322_s1 + $0x6c4] sm:$0xf]  ;;  %v6957_v1 = vld [vmem:[%s13322_s1 + $0x78c] sm:$0xf0] }
 0x104   :  { %4359 = vmatpush.bf16.msra.mxu0 %v6852_v5  ;;  %4328 = vmatmul.bf16.vlgmr.msrb.gmra.mxu1 %v9772_v26  ;;  %v8811_v5 = vld [vmem:[%s13322_s1 + $0x7cc] sm:$0xf]  ;;  %v6900_v12 = vor.u32 %v8787_v2, %v6897_v4  ;;  %v7068_v63 = vor.u32 %v8829_v0, %v7065_v50  ;;  %v8826_v2 = vld [vmem:[%s13322_s1 + $0x844] sm:$0xf]  ;;  %v7209_v47 = vld [vmem:[%s13322_s1 + $0x984] sm:$0xf0] }
 0x105   :  { %4372 = vmatpush.bf16.msra.mxu1 %v6948_v6  ;;  %4341 = vmatmul.bf16.vlgmr.msrb.gmra.mxu2 %v9766_v21  ;;  %v6993_v6 = vld [vmem:[%s13322_s1 + $0x7d4] sm:$0xf0]  ;;  %v8871_v4 = vld [vmem:[%s13322_s1 + $0x9ac] sm:$0xf]  ;;  %v7305_v0 = vld [vmem:[%s13322_s1 + $0xa44] sm:$0xf0] }
 0x106   :  { %4385 = vmatpush.bf16.msra.mxu2 %v7044_v7  ;;  %4354 = vmatmul.bf16.vlgmr.msrb.gmra.mxu3 %v9770_v25  ;;  %v8835_v7 = vld [vmem:[%s13322_s1 + $0x88c] sm:$0xf]  ;;  %v8913_v50 = vld [vmem:[%s13322_s1 + $0xafc] sm:$0xf] }
 0x107   :  { %4398 = vmatpush.bf16.msra.mxu3 %v7140_v15  ;;  %v6996_v15 = vor.u32 %v8811_v5, %v6993_v6  ;;  %v7092_v20 = vor.u32 %v8835_v7, %v7089_v8  ;;  %v7233_v5 = vld [vmem:[%s13322_s1 + $0x9b4] sm:$0xf0]  ;;  %v8895_v6 = vld [vmem:[%s13322_s1 + $0xa6c] sm:$0xf]  ;;  %v6768_v8 = vor.u32 %v8754_v56, %v6765_v57  ;;  %v8937_v56 = vld [vmem:[%s13322_s1 + $0xbbc] sm:$0xf] }
 0x108   :  { %4360 = vmatpush.bf16.msra.mxu0 %v6840_v24  ;;  %v4134_v23 = vpop.f32.mrf.mxu2  ;;  %v6885_v24 = vld [vmem:[%s13322_s1 + $0x6fc] sm:$0xf0]  ;;  %v4110_v37 = vpop.f32.mrf.mxu0  ;;  %v7497_v57 = vld [vmem:[%s13322_s1 + $0xbc4] sm:$0xf0] }
 0x109   :  { %4373 = vmatpush.bf16.msra.mxu1 %v6936_v27  ;;  %v8808_v27 = vld [vmem:[%s13322_s1 + $0x7b4] sm:$0xf]  ;;  %v4135_v29 = vadd.f32 %v4134_v23, %v4122_v3  ;;  %v4147_v30 = vpop.f32.mrf.mxu3  ;;  %v4123_v39 = vpop.f32.mrf.mxu1  ;;  %v6888_v41 = vor.u32 %v8784_v18, %v6885_v24  ;;  %v8943_v18 = vld [vmem:[%s13322_s1 + $0xbec] sm:$0xf]  ;;  %v7236_v24 = vor.u32 %v8871_v4, %v7233_v5  ;;  %v7317_v37 = vld [vmem:[%s13322_s1 + $0xa5c] sm:$0xf0] }
 0x10a   :  { %4386 = vmatpush.bf16.msra.mxu2 %v7032_v28  ;;  %v6981_v28 = vld [vmem:[%s13322_s1 + $0x7bc] sm:$0xf0]  ;;  %v8934_v5 = vld [vmem:[%s13322_s1 + $0xba4] sm:$0xf] }
 0x10b   :  { %4399 = vmatpush.bf16.msra.mxu3 %v7128_v34  ;;  %v7077_v34 = vld [vmem:[%s13322_s1 + $0x87c] sm:$0xf0]  ;;  %v11085_v40 = vadd.f32 %v4147_v30, %v4135_v29  ;;  %v8868_v29 = vld [vmem:[%s13322_s1 + $0x994] sm:$0xf] }
 0x10c   :  { %4361 = vmatpush.bf16.msra.mxu0 %v6828_v42  ;;  %v6984_v42 = vor.u32 %v8808_v27, %v6981_v28  ;;  %v7080_v46 = vor.u32 %v8832_v33, %v7077_v34  ;;  %v7221_v30 = vld [vmem:[%s13322_s1 + $0x99c] sm:$0xf0]  ;;  %v8892_v33 = vld [vmem:[%s13322_s1 + $0xa54] sm:$0xf] }
 0x10d   :  { %4374 = vmatpush.bf16.msra.mxu1 %v6924_v43  ;;  %v8757_v43 = vld [vmem:[%s13322_s1 + $0x61c] sm:$0xf]  ;;  %v7413_v39 = vld [vmem:[%s13322_s1 + $0xb1c] sm:$0xf0] }
 0x10e   :  { %4387 = vmatpush.bf16.msra.mxu2 %v7020_v44  ;;  %v6777_v44 = vld [vmem:[%s13322_s1 + $0x624] sm:$0xf0] }
 0x10f   :  { %4400 = vmatpush.bf16.msra.mxu3 %v7116_v48  ;;  %v8805_v48 = vld [vmem:[%s13322_s1 + $0x79c] sm:$0xf]  ;;  %v6780_v53 = vor.u32 %v8757_v43, %v6777_v44  ;;  %v7224_v43 = vor.u32 %v8868_v29, %v7221_v30  ;;  %v7320_v44 = vor.u32 %v8892_v33, %v7317_v37  ;;  %v7473_v29 = vld [vmem:[%s13322_s1 + $0xb94] sm:$0xf0]  ;;  %v8856_v37 = vld [vmem:[%s13322_s1 + $0x934] sm:$0xf] }
 0x110   :  { %4362 = vmatpush.bf16.msra.mxu0 %v6816_v59  ;;  %v6972_v59 = vor.u32 %v8805_v48, %v6969_v49  ;;  %v4136_v3 = vpop.f32.mrf.mxu2  ;;  %v8889_v48 = vld [vmem:[%s13322_s1 + $0xa3c] sm:$0xf] }
 0x111   :  { %4375 = vmatpush.bf16.msra.mxu1 %v6912_v61  ;;  %v6861_v61 = vld [vmem:[%s13322_s1 + $0x6cc] sm:$0xf0]  ;;  %v4149_v7 = vpop.f32.mrf.mxu3 }
 0x112   :  { %4388 = vmatpush.bf16.msra.mxu2 %v7008_v62  ;;  %v8802_v62 = vld [vmem:[%s13322_s1 + $0x784] sm:$0xf]  ;;  %v6864_v16 = vor.u32 %v8778_v60, %v6861_v61  ;;  %v7389_v3 = vld [vmem:[%s13322_s1 + $0xaec] sm:$0xf0] }
 0x113   :  { %4401 = vmatpush.bf16.msra.mxu3 %v7104_v19  ;;  %v7053_v19 = vld [vmem:[%s13322_s1 + $0x84c] sm:$0xf0]  ;;  %v6960_v17 = vor.u32 %v8802_v62, %v6957_v1  ;;  %v8862_v61 = vld [vmem:[%s13322_s1 + $0x964] sm:$0xf]  ;;  %v7500_v1 = vor.u32 %v8937_v56, %v7497_v57 }
 0x114   :  { %4363 = vmatpush.bf16.msra.mxu0 %v6804_v9  ;;  %v7329_v9 = vld [vmem:[%s13322_s1 + $0xa74] sm:$0xf0]  ;;  %v7056_v23 = vor.u32 %v8826_v2, %v7053_v19  ;;  %v7197_v62 = vld [vmem:[%s13322_s1 + $0x96c] sm:$0xf0]  ;;  %v8910_v19 = vld [vmem:[%s13322_s1 + $0xae4] sm:$0xf] }
 0x115   :  { %4376 = vmatpush.bf16.msra.mxu1 %v6900_v12  ;;  %v8919_v12 = vld [vmem:[%s13322_s1 + $0xb2c] sm:$0xf]  ;;  %v7332_v27 = vor.u32 %v8895_v6, %v7329_v9  ;;  %v7293_v2 = vld [vmem:[%s13322_s1 + $0xa2c] sm:$0xf0] }
 0x116   :  { %4389 = vmatpush.bf16.msra.mxu2 %v6996_v15  ;;  %v7425_v15 = vld [vmem:[%s13322_s1 + $0xb34] sm:$0xf0]  ;;  %v7485_v6 = vld [vmem:[%s13322_s1 + $0xbac] sm:$0xf0] }
 0x117   :  { %4402 = vmatpush.bf16.msra.mxu3 %v7092_v20  ;;  %v7521_v20 = vld [vmem:[%s13322_s1 + $0xbf4] sm:$0xf0]  ;;  %v7428_v28 = vor.u32 %v8919_v12, %v7425_v15  ;;  %v7392_v15 = vor.u32 %v8910_v19, %v7389_v3  ;;  %v8925_v19 = vld [vmem:[%s13322_s1 + $0xb5c] sm:$0xf]  ;;  %v7449_v3 = vld [vmem:[%s13322_s1 + $0xb64] sm:$0xf0] }
 0x118   :  { %4364 = vmatpush.bf16.msra.mxu0 %v6792_v38  ;;  %v7524_v34 = vor.u32 %v8943_v18, %v7521_v20  ;;  %v8916_v38 = vld [vmem:[%s13322_s1 + $0xb14] sm:$0xf]  ;;  %v8883_v18 = vld [vmem:[%s13322_s1 + $0xa0c] sm:$0xf] }
 0x119   :  { %4377 = vmatpush.bf16.msra.mxu1 %v6888_v41  ;;  %v8940_v41 = vld [vmem:[%s13322_s1 + $0xbd4] sm:$0xf]  ;;  %v7416_v45 = vor.u32 %v8916_v38, %v7413_v39  ;;  %v7173_v38 = vld [vmem:[%s13322_s1 + $0x93c] sm:$0xf0] }
 0x11a   :  { %4390 = vmatpush.bf16.msra.mxu2 %v6984_v42  ;;  %v7509_v42 = vld [vmem:[%s13322_s1 + $0xbdc] sm:$0xf0]  ;;  %v8880_v39 = vld [vmem:[%s13322_s1 + $0x9f4] sm:$0xf] }
 0x11b   :  { %4403 = vmatpush.bf16.msra.mxu3 %v7080_v46  ;;  %v8865_v46 = vld [vmem:[%s13322_s1 + $0x97c] sm:$0xf]  ;;  %v7512_v49 = vor.u32 %v8940_v41, %v7509_v42 }
 0x11c   :  { %4365 = vmatpush.bf16.msra.mxu0 %v6780_v53  ;;  %v7401_v53 = vld [vmem:[%s13322_s1 + $0xb04] sm:$0xf0] }
 0x11d   :  { %4378 = vmatpush.bf16.msra.mxu1 %v6876_v58  ;;  %v7212_v58 = vor.u32 %v8865_v46, %v7209_v47  ;;  %v7404_v60 = vor.u32 %v8913_v50, %v7401_v53  ;;  %v7176_v50 = vor.u32 %v8856_v37, %v7173_v38 }
 0x11e   :  { %4391 = vmatpush.bf16.msra.mxu2 %v6972_v59  ;;  %v7308_v59 = vor.u32 %v8889_v48, %v7305_v0  ;;  %v8928_v48 = vld [vmem:[%s13322_s1 + $0xb74] sm:$0xf] }
 0x11f   :  { %4404 = vmatpush.bf16.msra.mxu3 %v7068_v63  ;;  %v8886_v63 = vld [vmem:[%s13322_s1 + $0xa24] sm:$0xf] }
 0x120   :  { %4366 = vmatpush.bf16.msra.mxu0 %v6768_v8  ;;  %v4160_v4 = vpop.f32.mrf.mxu0  ;;  %v7200_v8 = vor.u32 %v8862_v61, %v7197_v62  ;;  %v7296_v12 = vor.u32 %v8886_v63, %v7293_v2  ;;  %v8877_v61 = vld [vmem:[%s13322_s1 + $0x9dc] sm:$0xf]  ;;  %v7257_v63 = vld [vmem:[%s13322_s1 + $0x9e4] sm:$0xf0] }
 0x121   :  { %4379 = vmatpush.bf16.msra.mxu1 %v6864_v16  ;;  %v4161_v7 = vadd.f32 %v4160_v4, %v11085_v40  ;;  %v4173_v9 = vpop.f32.mrf.mxu1  ;;  %v8859_v16 = vld [vmem:[%s13322_s1 + $0x94c] sm:$0xf]  ;;  %v7488_v40 = vor.u32 %v8934_v5, %v7485_v6  ;;  %v7353_v2 = vld [vmem:[%s13322_s1 + $0xaa4] sm:$0xf0]  ;;  %v8850_v5 = vld [vmem:[%s13322_s1 + $0x904] sm:$0xf] }
 0x122   :  { %4392 = vmatpush.bf16.msra.mxu2 %v6960_v17  ;;  %v7185_v17 = vld [vmem:[%s13322_s1 + $0x954] sm:$0xf0]  ;;  %v7149_v6 = vld [vmem:[%s13322_s1 + $0x90c] sm:$0xf0] }
 0x123   :  { %4405 = vmatpush.bf16.msra.mxu3 %v7056_v23  ;;  %4367 = vmatmul.bf16.vlgmr.msra.gmra.mxu0 %v9868_v10  ;;  %v4174_v20 = vadd.f32 %v4173_v9, %v4161_v7  ;;  %v7281_v23 = vld [vmem:[%s13322_s1 + $0xa14] sm:$0xf0]  ;;  %v7188_v30 = vor.u32 %v8859_v16, %v7185_v17  ;;  %v7260_v7 = vor.u32 %v8877_v61, %v7257_v63  ;;  %v8874_v9 = vld [vmem:[%s13322_s1 + $0x9c4] sm:$0xf]  ;;  %v7341_v17 = vld [vmem:[%s13322_s1 + $0xa8c] sm:$0xf0] }
 0x124   :  { %4411 = vmatpush.bf16.msrb.mxu0 %v7236_v24  ;;  %4380 = vmatmul.bf16.vlgmr.msra.gmra.mxu1 %v9872_v13  ;;  %v8907_v24 = vld [vmem:[%s13322_s1 + $0xacc] sm:$0xf]  ;;  %v7284_v33 = vor.u32 %v8883_v18, %v7281_v23  ;;  %v7452_v16 = vor.u32 %v8925_v19, %v7449_v3  ;;  %v8922_v18 = vld [vmem:[%s13322_s1 + $0xb44] sm:$0xf]  ;;  %v7593_v63 = vld [vmem:[%s13322_s1 + $0xc84] sm:$0xf0] }
 0x125   :  { %4424 = vmatpush.bf16.msrb.mxu1 %v7332_v27  ;;  %4393 = vmatmul.bf16.vlgmr.msra.gmra.mxu2 %v9870_v11  ;;  %v7377_v27 = vld [vmem:[%s13322_s1 + $0xad4] sm:$0xf0]  ;;  %v8967_v23 = vld [vmem:[%s13322_s1 + $0xcac] sm:$0xf]  ;;  %v7689_v19 = vld [vmem:[%s13322_s1 + $0xd44] sm:$0xf0] }
 0x126   :  { %4437 = vmatpush.bf16.msrb.mxu2 %v7428_v28  ;;  %4406 = vmatmul.bf16.vlgmr.msra.gmra.mxu3 %v9874_v14  ;;  %v8931_v28 = vld [vmem:[%s13322_s1 + $0xb8c] sm:$0xf]  ;;  %v9009_v3 = vld [vmem:[%s13322_s1 + $0xdfc] sm:$0xf] }
 0x127   :  { %4450 = vmatpush.bf16.msrb.mxu3 %v7524_v34  ;;  %v7380_v34 = vor.u32 %v8907_v24, %v7377_v27  ;;  %v7476_v41 = vor.u32 %v8931_v28, %v7473_v29  ;;  %v7617_v24 = vld [vmem:[%s13322_s1 + $0xcb4] sm:$0xf0]  ;;  %v8991_v27 = vld [vmem:[%s13322_s1 + $0xd6c] sm:$0xf]  ;;  %v7152_v29 = vor.u32 %v8850_v5, %v7149_v6  ;;  %v9033_v5 = vld [vmem:[%s13322_s1 + $0xebc] sm:$0xf] }
 0x128   :  { %4412 = vmatpush.bf16.msrb.mxu0 %v7224_v43  ;;  %v4186_v42 = vpop.f32.mrf.mxu2  ;;  %v7269_v43 = vld [vmem:[%s13322_s1 + $0x9fc] sm:$0xf0]  ;;  %v4162_v0 = vpop.f32.mrf.mxu0  ;;  %v7881_v6 = vld [vmem:[%s13322_s1 + $0xec4] sm:$0xf0] }
 0x129   :  { %4425 = vmatpush.bf16.msrb.mxu1 %v7320_v44  ;;  %v8904_v44 = vld [vmem:[%s13322_s1 + $0xab4] sm:$0xf]  ;;  %v4187_v46 = vadd.f32 %v4186_v42, %v4174_v20  ;;  %v4199_v47 = vpop.f32.mrf.mxu3  ;;  %v4175_v53 = vpop.f32.mrf.mxu1  ;;  %v7272_v57 = vor.u32 %v8880_v39, %v7269_v43  ;;  %v9039_v39 = vld [vmem:[%s13322_s1 + $0xeec] sm:$0xf]  ;;  %v7620_v43 = vor.u32 %v8967_v23, %v7617_v24  ;;  %v7701_v0 = vld [vmem:[%s13322_s1 + $0xd5c] sm:$0xf0] }
 0x12a   :  { %4438 = vmatpush.bf16.msrb.mxu2 %v7416_v45  ;;  %v7365_v45 = vld [vmem:[%s13322_s1 + $0xabc] sm:$0xf0]  ;;  %v9030_v24 = vld [vmem:[%s13322_s1 + $0xea4] sm:$0xf] }
 0x12b   :  { %4451 = vmatpush.bf16.msrb.mxu3 %v7512_v49  ;;  %v7461_v49 = vld [vmem:[%s13322_s1 + $0xb7c] sm:$0xf0]  ;;  %v11284_v56 = vadd.f32 %v4199_v47, %v4187_v46  ;;  %v8964_v46 = vld [vmem:[%s13322_s1 + $0xc94] sm:$0xf] }
 0x12c   :  { %4413 = vmatpush.bf16.msrb.mxu0 %v7212_v58  ;;  %v7368_v58 = vor.u32 %v8904_v44, %v7365_v45  ;;  %v7464_v62 = vor.u32 %v8928_v48, %v7461_v49  ;;  %v7605_v47 = vld [vmem:[%s13322_s1 + $0xc9c] sm:$0xf0]  ;;  %v8988_v48 = vld [vmem:[%s13322_s1 + $0xd54] sm:$0xf] }
 0x12d   :  { %4426 = vmatpush.bf16.msrb.mxu1 %v7308_v59  ;;  %v8853_v59 = vld [vmem:[%s13322_s1 + $0x91c] sm:$0xf]  ;;  %v7797_v53 = vld [vmem:[%s13322_s1 + $0xe1c] sm:$0xf0] }
 0x12e   :  { %4439 = vmatpush.bf16.msrb.mxu2 %v7404_v60  ;;  %v7161_v60 = vld [vmem:[%s13322_s1 + $0x924] sm:$0xf0] }
 0x12f   :  { %4452 = vmatpush.bf16.msrb.mxu3 %v7500_v1  ;;  %v8901_v1 = vld [vmem:[%s13322_s1 + $0xa9c] sm:$0xf]  ;;  %v7164_v4 = vor.u32 %v8853_v59, %v7161_v60  ;;  %v7608_v59 = vor.u32 %v8964_v46, %v7605_v47  ;;  %v7704_v60 = vor.u32 %v8988_v48, %v7701_v0  ;;  %v7857_v46 = vld [vmem:[%s13322_s1 + $0xe94] sm:$0xf0]  ;;  %v8952_v0 = vld [vmem:[%s13322_s1 + $0xc34] sm:$0xf] }
 0x130   :  { %4414 = vmatpush.bf16.msrb.mxu0 %v7200_v8  ;;  %v7356_v8 = vor.u32 %v8901_v1, %v7353_v2  ;;  %v4188_v20 = vpop.f32.mrf.mxu2  ;;  %v8985_v1 = vld [vmem:[%s13322_s1 + $0xd3c] sm:$0xf] }
 0x131   :  { %4427 = vmatpush.bf16.msrb.mxu1 %v7296_v12  ;;  %v7245_v12 = vld [vmem:[%s13322_s1 + $0x9cc] sm:$0xf0]  ;;  %v4201_v28 = vpop.f32.mrf.mxu3 }
 0x132   :  { %4440 = vmatpush.bf16.msrb.mxu2 %v7392_v15  ;;  %v8898_v15 = vld [vmem:[%s13322_s1 + $0xa84] sm:$0xf]  ;;  %v7248_v37 = vor.u32 %v8874_v9, %v7245_v12  ;;  %v7773_v20 = vld [vmem:[%s13322_s1 + $0xdec] sm:$0xf0] }
 0x133   :  { %4453 = vmatpush.bf16.msrb.mxu3 %v7488_v40  ;;  %v7437_v40 = vld [vmem:[%s13322_s1 + $0xb4c] sm:$0xf0]  ;;  %v7344_v38 = vor.u32 %v8898_v15, %v7341_v17  ;;  %v8958_v12 = vld [vmem:[%s13322_s1 + $0xc64] sm:$0xf]  ;;  %v7884_v17 = vor.u32 %v9033_v5, %v7881_v6 }
 0x134   :  { %4415 = vmatpush.bf16.msrb.mxu0 %v7188_v30  ;;  %v7713_v30 = vld [vmem:[%s13322_s1 + $0xd74] sm:$0xf0]  ;;  %v7440_v42 = vor.u32 %v8922_v18, %v7437_v40  ;;  %v7581_v15 = vld [vmem:[%s13322_s1 + $0xc6c] sm:$0xf0]  ;;  %v9006_v40 = vld [vmem:[%s13322_s1 + $0xde4] sm:$0xf] }
 0x135   :  { %4428 = vmatpush.bf16.msrb.mxu1 %v7284_v33  ;;  %v9015_v33 = vld [vmem:[%s13322_s1 + $0xe2c] sm:$0xf]  ;;  %v7716_v44 = vor.u32 %v8991_v27, %v7713_v30  ;;  %v7677_v18 = vld [vmem:[%s13322_s1 + $0xd2c] sm:$0xf0] }
 0x136   :  { %4441 = vmatpush.bf16.msrb.mxu2 %v7380_v34  ;;  %v7809_v34 = vld [vmem:[%s13322_s1 + $0xe34] sm:$0xf0]  ;;  %v7869_v27 = vld [vmem:[%s13322_s1 + $0xeac] sm:$0xf0] }
 0x137   :  { %4454 = vmatpush.bf16.msrb.mxu3 %v7476_v41  ;;  %v7905_v41 = vld [vmem:[%s13322_s1 + $0xef4] sm:$0xf0]  ;;  %v7812_v45 = vor.u32 %v9015_v33, %v7809_v34  ;;  %v7776_v34 = vor.u32 %v9006_v40, %v7773_v20  ;;  %v9021_v40 = vld [vmem:[%s13322_s1 + $0xe5c] sm:$0xf]  ;;  %v7833_v20 = vld [vmem:[%s13322_s1 + $0xe64] sm:$0xf0] }
 0x138   :  { %4416 = vmatpush.bf16.msrb.mxu0 %v7176_v50  ;;  %v7908_v49 = vor.u32 %v9039_v39, %v7905_v41  ;;  %v9012_v50 = vld [vmem:[%s13322_s1 + $0xe14] sm:$0xf]  ;;  %v8979_v39 = vld [vmem:[%s13322_s1 + $0xd0c] sm:$0xf] }
 0x139   :  { %4429 = vmatpush.bf16.msrb.mxu1 %v7272_v57  ;;  %v9036_v57 = vld [vmem:[%s13322_s1 + $0xed4] sm:$0xf]  ;;  %v7800_v61 = vor.u32 %v9012_v50, %v7797_v53  ;;  %v7557_v50 = vld [vmem:[%s13322_s1 + $0xc3c] sm:$0xf0] }
 0x13a   :  { %4442 = vmatpush.bf16.msrb.mxu2 %v7368_v58  ;;  %v7893_v58 = vld [vmem:[%s13322_s1 + $0xedc] sm:$0xf0]  ;;  %v8976_v53 = vld [vmem:[%s13322_s1 + $0xcf4] sm:$0xf] }
 0x13b   :  { %4455 = vmatpush.bf16.msrb.mxu3 %v7464_v62  ;;  %v8961_v62 = vld [vmem:[%s13322_s1 + $0xc7c] sm:$0xf]  ;;  %v7896_v2 = vor.u32 %v9036_v57, %v7893_v58 }
 0x13c   :  { %4417 = vmatpush.bf16.msrb.mxu0 %v7164_v4  ;;  %v7785_v4 = vld [vmem:[%s13322_s1 + $0xe04] sm:$0xf0] }
 0x13d   :  { %4430 = vmatpush.bf16.msrb.mxu1 %v7260_v7  ;;  %v7596_v7 = vor.u32 %v8961_v62, %v7593_v63  ;;  %v7788_v9 = vor.u32 %v9009_v3, %v7785_v4  ;;  %v7560_v3 = vor.u32 %v8952_v0, %v7557_v50 }
 0x13e   :  { %4443 = vmatpush.bf16.msrb.mxu2 %v7356_v8  ;;  %v7692_v8 = vor.u32 %v8985_v1, %v7689_v19  ;;  %v9024_v1 = vld [vmem:[%s13322_s1 + $0xe74] sm:$0xf] }
 0x13f   :  { %4456 = vmatpush.bf16.msrb.mxu3 %v7452_v16  ;;  %v8982_v16 = vld [vmem:[%s13322_s1 + $0xd24] sm:$0xf] }
 0x140   :  { %4418 = vmatpush.bf16.msrb.mxu0 %v7152_v29  ;;  %v4212_v23 = vpop.f32.mrf.mxu0  ;;  %v7584_v29 = vor.u32 %v8958_v12, %v7581_v15  ;;  %v7680_v33 = vor.u32 %v8982_v16, %v7677_v18  ;;  %v8973_v12 = vld [vmem:[%s13322_s1 + $0xcdc] sm:$0xf]  ;;  %v7641_v16 = vld [vmem:[%s13322_s1 + $0xce4] sm:$0xf0] }
 0x141   :  { %4431 = vmatpush.bf16.msrb.mxu1 %v7248_v37  ;;  %v4213_v28 = vadd.f32 %v4212_v23, %v11284_v56  ;;  %v4225_v30 = vpop.f32.mrf.mxu1  ;;  %v8955_v37 = vld [vmem:[%s13322_s1 + $0xc4c] sm:$0xf]  ;;  %v7872_v56 = vor.u32 %v9030_v24, %v7869_v27  ;;  %v7737_v18 = vld [vmem:[%s13322_s1 + $0xda4] sm:$0xf0]  ;;  %v8946_v24 = vld [vmem:[%s13322_s1 + $0xc04] sm:$0xf] }
 0x142   :  { %4444 = vmatpush.bf16.msrb.mxu2 %v7344_v38  ;;  %v7569_v38 = vld [vmem:[%s13322_s1 + $0xc54] sm:$0xf0]  ;;  %v7533_v27 = vld [vmem:[%s13322_s1 + $0xc0c] sm:$0xf0] }
 0x143   :  { %4457 = vmatpush.bf16.msrb.mxu3 %v7440_v42  ;;  %4419 = vmatmul.bf16.vlgmr.msrb.gmra.mxu0 %v10042_v51  ;;  %v4226_v41 = vadd.f32 %v4225_v30, %v4213_v28  ;;  %v7665_v42 = vld [vmem:[%s13322_s1 + $0xd14] sm:$0xf0]  ;;  %v7572_v47 = vor.u32 %v8955_v37, %v7569_v38  ;;  %v7644_v28 = vor.u32 %v8973_v12, %v7641_v16  ;;  %v8970_v30 = vld [vmem:[%s13322_s1 + $0xcc4] sm:$0xf]  ;;  %v7725_v38 = vld [vmem:[%s13322_s1 + $0xd8c] sm:$0xf0] }
 0x144   :  { %4463 = vmatpush.bf16.msra.mxu0 %v7620_v43  ;;  %4432 = vmatmul.bf16.vlgmr.msrb.gmra.mxu1 %v10046_v54  ;;  %v9003_v43 = vld [vmem:[%s13322_s1 + $0xdcc] sm:$0xf]  ;;  %v7668_v48 = vor.u32 %v8979_v39, %v7665_v42  ;;  %v7836_v37 = vor.u32 %v9021_v40, %v7833_v20  ;;  %v9018_v39 = vld [vmem:[%s13322_s1 + $0xe44] sm:$0xf]  ;;  %v7977_v16 = vld [vmem:[%s13322_s1 + $0xf84] sm:$0xf0] }
 0x145   :  { %4476 = vmatpush.bf16.msra.mxu1 %v7716_v44  ;;  %4445 = vmatmul.bf16.vlgmr.msrb.gmra.mxu2 %v10044_v52  ;;  %v7761_v44 = vld [vmem:[%s13322_s1 + $0xdd4] sm:$0xf0]  ;;  %v9063_v42 = vld [vmem:[%s13322_s1 + $0xfac] sm:$0xf]  ;;  %v8073_v20 = vld [vmem:[%s13322_s1 + $0x1044] sm:$0xf0] }
 0x146   :  { %4489 = vmatpush.bf16.msra.mxu2 %v7812_v45  ;;  %4458 = vmatmul.bf16.vlgmr.msrb.gmra.mxu3 %v10048_v55  ;;  %v9027_v45 = vld [vmem:[%s13322_s1 + $0xe8c] sm:$0xf] }
 0x147   :  { %4502 = vmatpush.bf16.msra.mxu3 %v7908_v49  ;;  %v7764_v49 = vor.u32 %v9003_v43, %v7761_v44  ;;  %v7860_v57 = vor.u32 %v9027_v45, %v7857_v46  ;;  %v8001_v43 = vld [vmem:[%s13322_s1 + $0xfb4] sm:$0xf0]  ;;  %v9087_v44 = vld [vmem:[%s13322_s1 + $0x106c] sm:$0xf]  ;;  %v7536_v46 = vor.u32 %v8946_v24, %v7533_v27  ;;  %v8169_v24 = vld [vmem:[%s13322_s1 + $0x1104] sm:$0xf0] }
 0x148   :  { %4464 = vmatpush.bf16.msra.mxu0 %v7608_v59  ;;  %v4238_v58 = vpop.f32.mrf.mxu2  ;;  %v7653_v59 = vld [vmem:[%s13322_s1 + $0xcfc] sm:$0xf0]  ;;  %v4214_v19 = vpop.f32.mrf.mxu0  ;;  %v9234_v27 = vld.sshfl [vmem:[#allocation1 + $0x10] sm:$0xff pattern:$0x73625140] }
 0x149   :  { %4477 = vmatpush.bf16.msra.mxu1 %v7704_v60  ;;  %v9000_v60 = vld [vmem:[%s13322_s1 + $0xdb4] sm:$0xf]  ;;  %v4239_v62 = vadd.f32 %v4238_v58, %v4226_v41  ;;  %v4251_v63 = vpop.f32.mrf.mxu3  ;;  %v4227_v4 = vpop.f32.mrf.mxu1  ;;  %v7656_v6 = vor.u32 %v8976_v53, %v7653_v59  ;;  %v9135_v53 = vld [vmem:[%s13322_s1 + $0x11ec] sm:$0xf]  ;;  %v8004_v59 = vor.u32 %v9063_v42, %v8001_v43  ;;  %v8085_v19 = vld [vmem:[%s13322_s1 + $0x105c] sm:$0xf0] }
 0x14a   :  { %4490 = vmatpush.bf16.msra.mxu2 %v7800_v61  ;;  %v7749_v61 = vld [vmem:[%s13322_s1 + $0xdbc] sm:$0xf0] }
 0x14b   :  { %4503 = vmatpush.bf16.msra.mxu3 %v7896_v2  ;;  %v7845_v2 = vld [vmem:[%s13322_s1 + $0xe7c] sm:$0xf0]  ;;  %v11483_v5 = vadd.f32 %v4251_v63, %v4239_v62  ;;  %v9060_v62 = vld [vmem:[%s13322_s1 + $0xf94] sm:$0xf] }
 0x14c   :  { %4465 = vmatpush.bf16.msra.mxu0 %v7596_v7  ;;  %v7752_v7 = vor.u32 %v9000_v60, %v7749_v61  ;;  %v7848_v15 = vor.u32 %v9024_v1, %v7845_v2  ;;  %v7989_v63 = vld [vmem:[%s13322_s1 + $0xf9c] sm:$0xf0]  ;;  %v9084_v1 = vld [vmem:[%s13322_s1 + $0x1054] sm:$0xf] }
 0x14d   :  { %4478 = vmatpush.bf16.msra.mxu1 %v7692_v8  ;;  %v8949_v8 = vld [vmem:[%s13322_s1 + $0xc1c] sm:$0xf]  ;;  %v8181_v4 = vld [vmem:[%s13322_s1 + $0x111c] sm:$0xf0] }
 0x14e   :  { %4491 = vmatpush.bf16.msra.mxu2 %v7788_v9  ;;  %v7545_v9 = vld [vmem:[%s13322_s1 + $0xc24] sm:$0xf0]  ;;  %v9237_v42 = vld [vmem:[%s13323_s2] sm:$0x7] }
 0x14f   :  { %4504 = vmatpush.bf16.msra.mxu3 %v7884_v17  ;;  %v8997_v17 = vld [vmem:[%s13322_s1 + $0xd9c] sm:$0xf]  ;;  %v7548_v23 = vor.u32 %v8949_v8, %v7545_v9  ;;  %v7992_v8 = vor.u32 %v9060_v62, %v7989_v63  ;;  %v8088_v9 = vor.u32 %v9084_v1, %v8085_v19  ;;  %v805_v43 = vperm.slane %v9237_v42, 1  ;;  %v8049_v1 = vld [vmem:[%s13322_s1 + $0x1014] sm:$0xf0] }
 0x150   :  { %4466 = vmatpush.bf16.msra.mxu0 %v7584_v29  ;;  %v7740_v29 = vor.u32 %v8997_v17, %v7737_v18  ;;  %v4240_v41 = vpop.f32.mrf.mxu2  ;;  %v9081_v17 = vld [vmem:[%s13322_s1 + $0x103c] sm:$0xf]  ;;  %v9233_v18 = vld.sshfl [vmem:[#allocation1] sm:$0xff pattern:$0x73625140] }
 0x151   :  { %4479 = vmatpush.bf16.msra.mxu1 %v7680_v33  ;;  %v7629_v33 = vld [vmem:[%s13322_s1 + $0xccc] sm:$0xf0]  ;;  %v4253_v45 = vpop.f32.mrf.mxu3  ;;  %v9078_v41 = vld [vmem:[%s13322_s1 + $0x1024] sm:$0xf]  ;;  %v8145_v19 = vld [vmem:[%s13322_s1 + $0x10d4] sm:$0xf0] }
 0x152   :  { %4492 = vmatpush.bf16.msra.mxu2 %v7776_v34  ;;  %v8994_v34 = vld [vmem:[%s13322_s1 + $0xd84] sm:$0xf]  ;;  %v7632_v0 = vor.u32 %v8970_v30, %v7629_v33  ;;  %v8265_v30 = vld [vmem:[%s13322_s1 + $0x11c4] sm:$0xf0]  ;;  %v8061_v45 = vld [vmem:[%s13322_s1 + $0x102c] sm:$0xf0] }
 0x153   :  { %4505 = vmatpush.bf16.msra.mxu3 %v7872_v56  ;;  %v7821_v56 = vld [vmem:[%s13322_s1 + $0xe4c] sm:$0xf0]  ;;  %v7728_v50 = vor.u32 %v8994_v34, %v7725_v38  ;;  %v9236_v33 = vld.sshfl [vmem:[#allocation1 + $0x18] sm:$0xff pattern:$0x73625140]  ;;  %v8076_v38 = vor.u32 %v9081_v17, %v8073_v20 }
 0x154   :  { %4467 = vmatpush.bf16.msra.mxu0 %v7572_v47  ;;  %v8097_v47 = vld [vmem:[%s13322_s1 + $0x1074] sm:$0xf0]  ;;  %v7824_v58 = vor.u32 %v9018_v39, %v7821_v56  ;;  %v7965_v56 = vld [vmem:[%s13322_s1 + $0xf6c] sm:$0xf0]  ;;  %v9096_v20 = vld [vmem:[%s13322_s1 + $0x10b4] sm:$0xf] }
 0x155   :  { %4480 = vmatpush.bf16.msra.mxu1 %v7668_v48  ;;  %v9111_v48 = vld [vmem:[%s13322_s1 + $0x112c] sm:$0xf]  ;;  %v8100_v60 = vor.u32 %v9087_v44, %v8097_v47  ;;  %v8157_v47 = vld [vmem:[%s13322_s1 + $0x10ec] sm:$0xf0] }
 0x156   :  { %4493 = vmatpush.bf16.msra.mxu2 %v7764_v49  ;;  %v8193_v49 = vld [vmem:[%s13322_s1 + $0x1134] sm:$0xf0] }
 0x157   :  { %4506 = vmatpush.bf16.msra.mxu3 %v7860_v57  ;;  %v8289_v57 = vld [vmem:[%s13322_s1 + $0x11f4] sm:$0xf0]  ;;  %v8196_v61 = vor.u32 %v9111_v48, %v8193_v49  ;;  %v9126_v48 = vld [vmem:[%s13322_s1 + $0x11a4] sm:$0xf]  ;;  %v8253_v49 = vld [vmem:[%s13322_s1 + $0x11ac] sm:$0xf0] }
 0x158   :  { %4468 = vmatpush.bf16.msra.mxu0 %v7560_v3  ;;  %v8292_v2 = vor.u32 %v9135_v53, %v8289_v57  ;;  %v9108_v3 = vld [vmem:[%s13322_s1 + $0x1114] sm:$0xf]  ;;  %v8064_v53 = vor.u32 %v9078_v41, %v8061_v45  ;;  %v8256_v63 = vor.u32 %v9126_v48, %v8253_v49  ;;  %v9069_v41 = vld [vmem:[%s13322_s1 + $0xfdc] sm:$0xf]  ;;  %v8217_v48 = vld [vmem:[%s13322_s1 + $0x1164] sm:$0xf0] }
 0x159   :  { %4481 = vmatpush.bf16.msra.mxu1 %v7656_v6  ;;  %v9132_v6 = vld [vmem:[%s13322_s1 + $0x11d4] sm:$0xf]  ;;  %v8184_v12 = vor.u32 %v9108_v3, %v8181_v4  ;;  %v9123_v3 = vld [vmem:[%s13322_s1 + $0x118c] sm:$0xf]  ;;  %v8241_v4 = vld [vmem:[%s13322_s1 + $0x1194] sm:$0xf0] }
 0x15a   :  { %4494 = vmatpush.bf16.msra.mxu2 %v7752_v7  ;;  %v8277_v7 = vld [vmem:[%s13322_s1 + $0x11dc] sm:$0xf0]  ;;  %v9093_v45 = vld [vmem:[%s13322_s1 + $0x109c] sm:$0xf] }
 0x15b   :  { %4507 = vmatpush.bf16.msra.mxu3 %v7848_v15  ;;  %v9057_v15 = vld [vmem:[%s13322_s1 + $0xf7c] sm:$0xf]  ;;  %v8280_v40 = vor.u32 %v9132_v6, %v8277_v7 }
 0x15c   :  { %4469 = vmatpush.bf16.msra.mxu0 %v7548_v23  ;;  %v9105_v23 = vld [vmem:[%s13322_s1 + $0x10fc] sm:$0xf]  ;;  %v7980_v34 = vor.u32 %v9057_v15, %v7977_v16  ;;  %v7941_v15 = vld [vmem:[%s13322_s1 + $0xf3c] sm:$0xf0]  ;;  %v9072_v16 = vld [vmem:[%s13322_s1 + $0xff4] sm:$0xf] }
 0x15d   :  { %4482 = vmatpush.bf16.msra.mxu1 %v7644_v28  ;;  %v9235_v28 = vld.sshfl [vmem:[#allocation1 + $0x8] sm:$0xff pattern:$0x73625140]  ;;  %v8172_v39 = vor.u32 %v9105_v23, %v8169_v24  ;;  %v8133_v23 = vld [vmem:[%s13322_s1 + $0x10bc] sm:$0xf0] }
 0x15e   :  { %4495 = vmatpush.bf16.msra.mxu2 %v7740_v29  ;;  %v9129_v29 = vld [vmem:[%s13322_s1 + $0x11bc] sm:$0xf] }
 0x15f   :  { %4508 = vmatpush.bf16.msra.mxu3 %v7836_v37  ;;  %v9054_v37 = vld [vmem:[%s13322_s1 + $0xf64] sm:$0xf]  ;;  %v8268_v44 = vor.u32 %v9129_v29, %v8265_v30  ;;  %v8229_v29 = vld [vmem:[%s13322_s1 + $0x117c] sm:$0xf0] }
 0x160   :  { %4470 = vmatpush.bf16.msra.mxu0 %v7536_v46  ;;  %v9102_v46 = vld [vmem:[%s13322_s1 + $0x10e4] sm:$0xf] }
 0x161   :  { %4483 = vmatpush.bf16.msra.mxu1 %v7632_v0  ;;  %v7968_v0 = vor.u32 %v9054_v37, %v7965_v56  ;;  %v8160_v57 = vor.u32 %v9102_v46, %v8157_v47  ;;  %v4277_v62 = vpop.f32.mrf.mxu1  ;;  %v7929_v56 = vld [vmem:[%s13322_s1 + $0xf24] sm:$0xf0]  ;;  %v9117_v47 = vld [vmem:[%s13322_s1 + $0x115c] sm:$0xf] }
 0x162   :  { %4496 = vmatpush.bf16.msra.mxu2 %v7728_v50  ;;  %v4264_v50 = vpop.f32.mrf.mxu0  ;;  %v8121_v46 = vld [vmem:[%s13322_s1 + $0x10a4] sm:$0xf0] }
 0x163   :  { %4509 = vmatpush.bf16.msra.mxu3 %v7824_v58  ;;  %4471 = vmatmul.bf16.vlgmr.msra.gmra.mxu0 %v9233_v18  ;;  %v9051_v58 = vld [vmem:[%s13322_s1 + $0xf4c] sm:$0xf]  ;;  %v8244_v18 = vor.u32 %v9123_v3, %v8241_v4  ;;  %v6087_v3 = vld [vmem:[%s13322_s1 + $0xb0] sm:$0xf]  ;;  %v8585_v4 = vld [vmem:[%s13322_s1 + $0xb8] sm:$0xf0] }
 0x164   :  { %4515 = vmatpush.bf16.msrb.mxu0 %v8004_v59  ;;  %4484 = vmatmul.bf16.vlgmr.msra.gmra.mxu1 %v9235_v28  ;;  %v7953_v59 = vld [vmem:[%s13322_s1 + $0xf54] sm:$0xf0]  ;;  %v9120_v28 = vld [vmem:[%s13322_s1 + $0x1174] sm:$0xf] }
 0x165   :  { %4528 = vmatpush.bf16.msrb.mxu1 %v8100_v60  ;;  %4497 = vmatmul.bf16.vlgmr.msra.gmra.mxu2 %v9234_v27  ;;  %v9075_v60 = vld [vmem:[%s13322_s1 + $0x100c] sm:$0xf]  ;;  %v7956_v7 = vor.u32 %v9051_v58, %v7953_v59  ;;  %v9066_v58 = vld [vmem:[%s13322_s1 + $0xfc4] sm:$0xf]  ;;  %v8013_v59 = vld [vmem:[%s13322_s1 + $0xfcc] sm:$0xf0] }
 0x166   :  { %4541 = vmatpush.bf16.msrb.mxu2 %v8196_v61  ;;  %4510 = vmatmul.bf16.vlgmr.msra.gmra.mxu3 %v9236_v33  ;;  %v4265_v61 = vadd.f32 %v4264_v50, %v805_v43  ;;  %v8232_v43 = vor.u32 %v9120_v28, %v8229_v29  ;;  %v7917_v50 = vld [vmem:[%s13322_s1 + $0xf0c] sm:$0xf0]  ;;  %v8582_v28 = vld [vmem:[%s13322_s1 + $0xa0] sm:$0xf0]  ;;  %v6171_v29 = vld [vmem:[%s13322_s1 + $0x158] sm:$0xf] }
 0x167   :  { %4554 = vmatpush.bf16.msrb.mxu3 %v8292_v2  ;;  %v9099_v2 = vld [vmem:[%s13322_s1 + $0x10cc] sm:$0xf] }
 0x168   :  { %4516 = vmatpush.bf16.msrb.mxu0 %v7992_v8  ;;  %v4278_v6 = vadd.f32 %v4277_v62, %v4265_v61  ;;  %v8052_v8 = vor.u32 %v9075_v60, %v8049_v1  ;;  %v4290_v17 = vpop.f32.mrf.mxu2  ;;  %v9090_v60 = vld [vmem:[%s13322_s1 + $0x1084] sm:$0xf]  ;;  %v8220_v62 = vor.u32 %v9117_v47, %v8217_v48 }
 0x169   :  { %4529 = vmatpush.bf16.msrb.mxu1 %v8088_v9  ;;  %v8148_v9 = vor.u32 %v9099_v2, %v8145_v19  ;;  %v4303_v27 = vpop.f32.mrf.mxu3  ;;  %v4279_v42 = vpop.f32.mrf.mxu1  ;;  %v9114_v1 = vld [vmem:[%s13322_s1 + $0x1144] sm:$0xf]  ;;  %v8205_v2 = vld [vmem:[%s13322_s1 + $0x114c] sm:$0xf0] }
 0x16a   :  { %4542 = vmatpush.bf16.msrb.mxu2 %v8184_v12  ;;  %v9048_v12 = vld [vmem:[%s13322_s1 + $0xf34] sm:$0xf]  ;;  %v4291_v24 = vadd.f32 %v4290_v17, %v4278_v6  ;;  %v6183_v6 = vld [vmem:[%s13322_s1 + $0x170] sm:$0xf] }
 0x16b   :  { %4555 = vmatpush.bf16.msrb.mxu3 %v8280_v40  ;;  %v8037_v40 = vld [vmem:[%s13322_s1 + $0xffc] sm:$0xf0]  ;;  %v7944_v30 = vor.u32 %v9048_v12, %v7941_v15  ;;  %v8633_v12 = vld [vmem:[%s13322_s1 + $0x238] sm:$0xf0]  ;;  %v8016_v15 = vor.u32 %v9066_v58, %v8013_v59  ;;  %v6375_v17 = vld [vmem:[%s13322_s1 + $0x2f0] sm:$0xf] }
 0x16c   :  { %4517 = vmatpush.bf16.msrb.mxu0 %v7980_v34  ;;  %v11680_v33 = vadd.f32 %v4303_v27, %v4291_v24  ;;  %v4266_v34 = vpop.f32.mrf.mxu0  ;;  %v8040_v37 = vor.u32 %v9072_v16, %v8037_v40  ;;  %v8208_v40 = vor.u32 %v9114_v1, %v8205_v2  ;;  %v6075_v27 = vld [vmem:[%s13322_s1 + $0x98] sm:$0xf]  ;;  %v9238_v47 = vld.sshfl [vmem:[#allocation1 + $0x20] sm:$0xff pattern:$0x73625140] }
 0x16d   :  { %4530 = vmatpush.bf16.msrb.mxu1 %v8076_v38  ;;  %v8136_v38 = vor.u32 %v9096_v20, %v8133_v23  ;;  %v6088_v20 = vor.u32 %v8585_v4, %v6087_v3  ;;  %v8606_v34 = vld [vmem:[%s13322_s1 + $0x160] sm:$0xf0]  ;;  %v6351_v58 = vld [vmem:[%s13322_s1 + $0x2c0] sm:$0xf]  ;;  %v8651_v59 = vld [vmem:[%s13322_s1 + $0x2c8] sm:$0xf0] }
 0x16e   :  { %4543 = vmatpush.bf16.msrb.mxu2 %v8172_v39  ;;  %v9045_v39 = vld [vmem:[%s13322_s1 + $0xf1c] sm:$0xf]  ;;  %v6172_v42 = vor.u32 %v8606_v34, %v6171_v29  ;;  %v6051_v1 = vld [vmem:[%s13322_s1 + $0x68] sm:$0xf]  ;;  %v8576_v2 = vld [vmem:[%s13322_s1 + $0x70] sm:$0xf0]  ;;  %v6352_v3 = vor.u32 %v8651_v59, %v6351_v58 }
 0x16f   :  { %4556 = vmatpush.bf16.msrb.mxu3 %v8268_v44  ;;  %v8025_v44 = vld [vmem:[%s13322_s1 + $0xfe4] sm:$0xf0]  ;;  %v7932_v49 = vor.u32 %v9045_v39, %v7929_v56  ;;  %v6363_v39 = vld [vmem:[%s13322_s1 + $0x2d8] sm:$0xf]  ;;  %v8654_v56 = vld [vmem:[%s13322_s1 + $0x2e0] sm:$0xf0] }
 0x170   :  { %4518 = vmatpush.bf16.msrb.mxu0 %v7968_v0  ;;  %v9042_v0 = vld [vmem:[%s13322_s1 + $0xf04] sm:$0xf]  ;;  %v4292_v61 = vpop.f32.mrf.mxu2  ;;  %v6364_v48 = vor.u32 %v8654_v56, %v6363_v39  ;;  %v8600_v4 = vld [vmem:[%s13322_s1 + $0x130] sm:$0xf0]  ;;  %v6231_v29 = vld [vmem:[%s13322_s1 + $0x1d0] sm:$0xf] }
 0x171   :  { %4531 = vmatpush.bf16.msrb.mxu1 %v8064_v53  ;;  %v8028_v53 = vor.u32 %v9069_v41, %v8025_v44  ;;  %v4305_v19 = vpop.f32.mrf.mxu3  ;;  %v6076_v41 = vor.u32 %v8582_v28, %v6075_v27  ;;  %v6063_v44 = vld [vmem:[%s13322_s1 + $0x80] sm:$0xf]  ;;  %v8597_v28 = vld [vmem:[%s13322_s1 + $0x118] sm:$0xf0]  ;;  %v6327_v34 = vld [vmem:[%s13322_s1 + $0x290] sm:$0xf] }
 0x172   :  { %4544 = vmatpush.bf16.msrb.mxu2 %v8160_v57  ;;  %v8124_v57 = vor.u32 %v9093_v45, %v8121_v46  ;;  %v8579_v45 = vld [vmem:[%s13322_s1 + $0x88] sm:$0xf0]  ;;  %v6159_v46 = vld [vmem:[%s13322_s1 + $0x140] sm:$0xf]  ;;  %v6147_v19 = vld [vmem:[%s13322_s1 + $0x128] sm:$0xf] }
 0x173   :  { %4557 = vmatpush.bf16.msrb.mxu3 %v8256_v63  ;;  %v8109_v63 = vld [vmem:[%s13322_s1 + $0x108c] sm:$0xf0]  ;;  %v6064_v61 = vor.u32 %v8579_v45, %v6063_v44 }
 0x174   :  { %4519 = vmatpush.bf16.msrb.mxu0 %v7956_v7  ;;  %v7920_v7 = vor.u32 %v9042_v0, %v7917_v50  ;;  %v8112_v16 = vor.u32 %v9090_v60, %v8109_v63  ;;  %v6255_v0 = vld [vmem:[%s13322_s1 + $0x200] sm:$0xf]  ;;  %v8627_v50 = vld [vmem:[%s13322_s1 + $0x208] sm:$0xf0] }
 0x175   :  { %4532 = vmatpush.bf16.msrb.mxu1 %v8052_v8  ;;  %v8609_v8 = vld [vmem:[%s13322_s1 + $0x178] sm:$0xf0]  ;;  %v6256_v63 = vor.u32 %v8627_v50, %v6255_v0  ;;  %v6315_v50 = vld [vmem:[%s13322_s1 + $0x278] sm:$0xf] }
 0x176   :  { %4545 = vmatpush.bf16.msrb.mxu2 %v8148_v9  ;;  %v6279_v9 = vld [vmem:[%s13322_s1 + $0x230] sm:$0xf]  ;;  %v6184_v23 = vor.u32 %v8609_v8, %v6183_v6  ;;  %v9241_v60 = vld.sshfl [vmem:[#allocation1 + $0x38] sm:$0xff pattern:$0x73625140] }
 0x177   :  { %4558 = vmatpush.bf16.msrb.mxu3 %v8244_v18  ;;  %v8657_v18 = vld [vmem:[%s13322_s1 + $0x2f8] sm:$0xf0]  ;;  %v6280_v24 = vor.u32 %v8633_v12, %v6279_v9  ;;  %v6243_v6 = vld [vmem:[%s13322_s1 + $0x1e8] sm:$0xf]  ;;  %v8648_v9 = vld [vmem:[%s13322_s1 + $0x2b0] sm:$0xf0]  ;;  %v6052_v12 = vor.u32 %v8576_v2, %v6051_v1 }
 0x178   :  { %4520 = vmatpush.bf16.msrb.mxu0 %v7944_v30  ;;  %v6376_v30 = vor.u32 %v8657_v18, %v6375_v17  ;;  %v6339_v8 = vld [vmem:[%s13322_s1 + $0x2a8] sm:$0xf]  ;;  %v6039_v18 = vld [vmem:[%s13322_s1 + $0x50] sm:$0xf]  ;;  %v6111_v1 = vld [vmem:[%s13322_s1 + $0xe0] sm:$0xf] }
 0x179   :  { %4533 = vmatpush.bf16.msrb.mxu1 %v8040_v37  ;;  %v6267_v37 = vld [vmem:[%s13322_s1 + $0x218] sm:$0xf]  ;;  %v6340_v27 = vor.u32 %v8648_v9, %v6339_v8  ;;  %v8639_v8 = vld [vmem:[%s13322_s1 + $0x268] sm:$0xf0] }
 0x17a   :  { %4546 = vmatpush.bf16.msrb.mxu2 %v8136_v38  ;;  %v8630_v38 = vld [vmem:[%s13322_s1 + $0x220] sm:$0xf0] }
 0x17b   :  { %4559 = vmatpush.bf16.msrb.mxu3 %v8232_v43  ;;  %v6268_v43 = vor.u32 %v8630_v38, %v6267_v37 }
 0x17c   :  { %4521 = vmatpush.bf16.msrb.mxu0 %v7932_v49  ;;  %v8603_v49 = vld [vmem:[%s13322_s1 + $0x148] sm:$0xf0] }
 0x17d   :  { %4534 = vmatpush.bf16.msrb.mxu1 %v8028_v53  ;;  %v9239_v53 = vld.sshfl [vmem:[#allocation1 + $0x30] sm:$0xff pattern:$0x73625140] }
 0x17e   :  { %4547 = vmatpush.bf16.msrb.mxu2 %v8124_v57  ;;  %v9240_v57 = vld.sshfl [vmem:[#allocation1 + $0x28] sm:$0xff pattern:$0x73625140] }
 0x17f   :  { %4560 = vmatpush.bf16.msrb.mxu3 %v8220_v62  ;;  %v6160_v62 = vor.u32 %v8603_v49, %v6159_v46  ;;  %v8594_v46 = vld [vmem:[%s13322_s1 + $0x100] sm:$0xf0] }
 0x180   :  { %4522 = vmatpush.bf16.msrb.mxu0 %v7920_v7  ;;  %v8624_v7 = vld [vmem:[%s13322_s1 + $0x1f0] sm:$0xf0] }
 0x181   :  { %4535 = vmatpush.bf16.msrb.mxu1 %v8016_v15  ;;  %v4316_v15 = vpop.f32.mrf.mxu0  ;;  %v6244_v17 = vor.u32 %v8624_v7, %v6243_v6  ;;  %v8615_v6 = vld [vmem:[%s13322_s1 + $0x1a8] sm:$0xf0]  ;;  %v6303_v7 = vld [vmem:[%s13322_s1 + $0x260] sm:$0xf] }
 0x182   :  { %4548 = vmatpush.bf16.msrb.mxu2 %v8112_v16  ;;  %v6148_v16 = vor.u32 %v8600_v4, %v6147_v19  ;;  %v6207_v4 = vld [vmem:[%s13322_s1 + $0x1a0] sm:$0xf] }
 0x183   :  { %4561 = vmatpush.bf16.msrb.mxu3 %v8208_v40  ;;  %4523 = vmatmul.bf16.vlgmr.msrb.gmra.mxu0 %v9238_v47  ;;  %v8573_v40 = vld [vmem:[%s13322_s1 + $0x58] sm:$0xf0]  ;;  %v6219_v47 = vld [vmem:[%s13322_s1 + $0x1b8] sm:$0xf] }
 0x184   :  { %4567 = vmatpush.bf16.msra.mxu0 %v6088_v20  ;;  %4536 = vmatmul.bf16.vlgmr.msrb.gmra.mxu1 %v9240_v57  ;;  %v6135_v20 = vld [vmem:[%s13322_s1 + $0x110] sm:$0xf]  ;;  %v6040_v38 = vor.u32 %v8573_v40, %v6039_v18  ;;  %v6099_v18 = vld [vmem:[%s13322_s1 + $0xc8] sm:$0xf]  ;;  %v8588_v40 = vld [vmem:[%s13322_s1 + $0xd0] sm:$0xf0] }
 0x185   :  { %4580 = vmatpush.bf16.msra.mxu1 %v6184_v23  ;;  %4549 = vmatmul.bf16.vlgmr.msrb.gmra.mxu2 %v9239_v53  ;;  %v4317_v23 = vadd.f32 %v4316_v15, %v11680_v33  ;;  %v8645_v33 = vld [vmem:[%s13322_s1 + $0x298] sm:$0xf0]  ;;  %v6136_v39 = vor.u32 %v8597_v28, %v6135_v20  ;;  %v8642_v53 = vld [vmem:[%s13322_s1 + $0x280] sm:$0xf0]  ;;  %v8564_v15 = vld [vmem:[%s13322_s1 + $0x10] sm:$0xf0] }
 0x186   :  { %4593 = vmatpush.bf16.msra.mxu2 %v6280_v24  ;;  %4562 = vmatmul.bf16.vlgmr.msrb.gmra.mxu3 %v9241_v60  ;;  %v4329_v24 = vpop.f32.mrf.mxu1  ;;  %v6328_v45 = vor.u32 %v8645_v33, %v6327_v34  ;;  %v6316_v19 = vor.u32 %v8642_v53, %v6315_v50  ;;  %v6195_v20 = vld [vmem:[%s13322_s1 + $0x188] sm:$0xf]  ;;  %v6471_v34 = vld [vmem:[%s13322_s1 + $0x3b0] sm:$0xf]  ;;  %v8681_v33 = vld [vmem:[%s13322_s1 + $0x3b8] sm:$0xf0] }
 0x187   :  { %4606 = vmatpush.bf16.msra.mxu3 %v6376_v30  ;;  %v8621_v30 = vld [vmem:[%s13322_s1 + $0x1d8] sm:$0xf0]  ;;  %v4330_v37 = vadd.f32 %v4329_v24, %v4317_v23  ;;  %v6304_v24 = vor.u32 %v8639_v8, %v6303_v7  ;;  %v6291_v28 = vld [vmem:[%s13322_s1 + $0x248] sm:$0xf]  ;;  %v8678_v50 = vld [vmem:[%s13322_s1 + $0x3a0] sm:$0xf0] }
 0x188   :  { %4568 = vmatpush.bf16.msra.mxu0 %v6076_v41  ;;  %v6232_v56 = vor.u32 %v8621_v30, %v6231_v29  ;;  %v6027_v41 = vld [vmem:[%s13322_s1 + $0x38] sm:$0xf]  ;;  %v4342_v44 = vpop.f32.mrf.mxu2  ;;  %v8636_v29 = vld [vmem:[%s13322_s1 + $0x250] sm:$0xf0]  ;;  %v8699_v8 = vld [vmem:[%s13322_s1 + $0x448] sm:$0xf0] }
 0x189   :  { %4581 = vmatpush.bf16.msra.mxu1 %v6172_v42  ;;  %v8570_v42 = vld [vmem:[%s13322_s1 + $0x40] sm:$0xf0]  ;;  %v4343_v49 = vadd.f32 %v4342_v44, %v4330_v37  ;;  %v4355_v0 = vpop.f32.mrf.mxu3  ;;  %v4318_v59 = vpop.f32.mrf.mxu0  ;;  %v6567_v37 = vld [vmem:[%s13322_s1 + $0x470] sm:$0xf]  ;;  %v6555_v53 = vld [vmem:[%s13322_s1 + $0x458] sm:$0xf] }
 0x18a   :  { %4594 = vmatpush.bf16.msra.mxu2 %v6268_v43  ;;  %v6123_v43 = vld [vmem:[%s13322_s1 + $0xf8] sm:$0xf]  ;;  %v6028_v57 = vor.u32 %v8570_v42, %v6027_v41  ;;  %v8729_v41 = vld [vmem:[%s13322_s1 + $0x538] sm:$0xf0]  ;;  %v6100_v42 = vor.u32 %v8588_v40, %v6099_v18  ;;  %v6759_v44 = vld [vmem:[%s13322_s1 + $0x5f0] sm:$0xf] }
 0x18b   :  { %4607 = vmatpush.bf16.msra.mxu3 %v6364_v48  ;;  %v8618_v48 = vld [vmem:[%s13322_s1 + $0x1c0] sm:$0xf0]  ;;  %v11875_v58 = vadd.f32 %v4355_v0, %v4343_v49  ;;  %v6124_v60 = vor.u32 %v8594_v46, %v6123_v43  ;;  %v6292_v46 = vor.u32 %v8636_v29, %v6291_v28  ;;  %v6459_v0 = vld [vmem:[%s13322_s1 + $0x398] sm:$0xf]  ;;  %v6435_v40 = vld [vmem:[%s13322_s1 + $0x368] sm:$0xf] }
 0x18c   :  { %4569 = vmatpush.bf16.msra.mxu0 %v6064_v61  ;;  %v6220_v61 = vor.u32 %v8618_v48, %v6219_v47  ;;  %v6472_v47 = vor.u32 %v8681_v33, %v6471_v34  ;;  %v8702_v59 = vld [vmem:[%s13322_s1 + $0x460] sm:$0xf0]  ;;  %v6723_v28 = vld [vmem:[%s13322_s1 + $0x5a8] sm:$0xf]  ;;  %v8744_v29 = vld [vmem:[%s13322_s1 + $0x5b0] sm:$0xf0] }
 0x18d   :  { %4582 = vmatpush.bf16.msra.mxu1 %v6160_v62  ;;  %v6015_v62 = vld [vmem:[%s13322_s1 + $0x20] sm:$0xf] }
 0x18e   :  { %4595 = vmatpush.bf16.msra.mxu2 %v6256_v63  ;;  %v8567_v63 = vld [vmem:[%s13322_s1 + $0x28] sm:$0xf0]  ;;  %v4331_v2 = vpop.f32.mrf.mxu1 }
 0x18f   :  { %4608 = vmatpush.bf16.msra.mxu3 %v6352_v3  ;;  %v8591_v3 = vld [vmem:[%s13322_s1 + $0xe8] sm:$0xf0]  ;;  %v6016_v9 = vor.u32 %v8567_v63, %v6015_v62  ;;  %v6747_v62 = vld [vmem:[%s13322_s1 + $0x5d8] sm:$0xf]  ;;  %v8750_v63 = vld [vmem:[%s13322_s1 + $0x5e0] sm:$0xf0]  ;;  %v6556_v2 = vor.u32 %v8702_v59, %v6555_v53 }
 0x190   :  { %4570 = vmatpush.bf16.msra.mxu0 %v6052_v12  ;;  %v6003_v12 = vld [vmem:[%s13322_s1 + $0x8] sm:$0xf]  ;;  %v4344_v23 = vpop.f32.mrf.mxu2  ;;  %v6748_v7 = vor.u32 %v8750_v63, %v6747_v62  ;;  %v8666_v53 = vld [vmem:[%s13322_s1 + $0x340] sm:$0xf0]  ;;  %v6603_v62 = vld [vmem:[%s13322_s1 + $0x4b8] sm:$0xf] }
 0x191   :  { %4583 = vmatpush.bf16.msra.mxu1 %v6148_v16  ;;  %v6112_v16 = vor.u32 %v8591_v3, %v6111_v1  ;;  %v4357_v30 = vpop.f32.mrf.mxu3  ;;  %v6460_v1 = vor.u32 %v8678_v50, %v6459_v0  ;;  %v6447_v3 = vld [vmem:[%s13322_s1 + $0x380] sm:$0xf]  ;;  %v6627_v23 = vld [vmem:[%s13322_s1 + $0x4e8] sm:$0xf]  ;;  %v6411_v50 = vld [vmem:[%s13322_s1 + $0x338] sm:$0xf] }
 0x192   :  { %4596 = vmatpush.bf16.msra.mxu2 %v6244_v17  ;;  %v6208_v17 = vor.u32 %v8615_v6, %v6207_v4  ;;  %v8675_v4 = vld [vmem:[%s13322_s1 + $0x388] sm:$0xf0]  ;;  %v6543_v6 = vld [vmem:[%s13322_s1 + $0x440] sm:$0xf]  ;;  %v8714_v63 = vld [vmem:[%s13322_s1 + $0x4c0] sm:$0xf0] }
 0x193   :  { %4609 = vmatpush.bf16.msra.mxu3 %v6340_v27  ;;  %v8612_v27 = vld [vmem:[%s13322_s1 + $0x190] sm:$0xf0]  ;;  %v6544_v18 = vor.u32 %v8699_v8, %v6543_v6  ;;  %v6412_v6 = vor.u32 %v8666_v53, %v6411_v50  ;;  %v8849_v50 = vld [vmem:[%s13322_s1 + $0x8f8] sm:$0xf0] }
 0x194   :  { %4571 = vmatpush.bf16.msra.mxu0 %v6040_v38  ;;  %v6004_v38 = vor.u32 %v8564_v15, %v6003_v12  ;;  %v6196_v43 = vor.u32 %v8612_v27, %v6195_v20  ;;  %v8723_v12 = vld [vmem:[%s13322_s1 + $0x508] sm:$0xf0]  ;;  %v6735_v15 = vld [vmem:[%s13322_s1 + $0x5c0] sm:$0xf]  ;;  %v8672_v20 = vld [vmem:[%s13322_s1 + $0x370] sm:$0xf0] }
 0x195   :  { %4584 = vmatpush.bf16.msra.mxu1 %v6136_v39  ;;  %v8705_v39 = vld [vmem:[%s13322_s1 + $0x478] sm:$0xf0]  ;;  %v6436_v34 = vor.u32 %v8672_v20, %v6435_v40  ;;  %v6591_v40 = vld [vmem:[%s13322_s1 + $0x4a0] sm:$0xf]  ;;  %v8711_v20 = vld [vmem:[%s13322_s1 + $0x4a8] sm:$0xf0] }
 0x196   :  { %4597 = vmatpush.bf16.msra.mxu2 %v6232_v56  ;;  %v6663_v56 = vld [vmem:[%s13322_s1 + $0x530] sm:$0xf]  ;;  %v6568_v48 = vor.u32 %v8705_v39, %v6567_v37 }
 0x197   :  { %4610 = vmatpush.bf16.msra.mxu3 %v6328_v45  ;;  %v8753_v45 = vld [vmem:[%s13322_s1 + $0x5f8] sm:$0xf0]  ;;  %v6664_v49 = vor.u32 %v8729_v41, %v6663_v56  ;;  %v6423_v39 = vld [vmem:[%s13322_s1 + $0x350] sm:$0xf] }
 0x198   :  { %4572 = vmatpush.bf16.msra.mxu0 %v6028_v57  ;;  %v6760_v57 = vor.u32 %v8753_v45, %v6759_v44  ;;  %v8669_v56 = vld [vmem:[%s13322_s1 + $0x358] sm:$0xf0]  ;;  %v6519_v41 = vld [vmem:[%s13322_s1 + $0x410] sm:$0xf] }
 0x199   :  { %4585 = vmatpush.bf16.msra.mxu1 %v6124_v60  ;;  %v6651_v60 = vld [vmem:[%s13322_s1 + $0x518] sm:$0xf]  ;;  %v6615_v44 = vld [vmem:[%s13322_s1 + $0x4d0] sm:$0xf]  ;;  %v8717_v45 = vld [vmem:[%s13322_s1 + $0x4d8] sm:$0xf0] }
 0x19a   :  { %4598 = vmatpush.bf16.msra.mxu2 %v6220_v61  ;;  %v8726_v61 = vld [vmem:[%s13322_s1 + $0x520] sm:$0xf0]  ;;  %v6616_v0 = vor.u32 %v8717_v45, %v6615_v44  ;;  %v8801_v45 = vld [vmem:[%s13322_s1 + $0x778] sm:$0xf0] }
 0x19b   :  { %4611 = vmatpush.bf16.msra.mxu3 %v6316_v19  ;;  %v6652_v19 = vor.u32 %v8726_v61, %v6651_v60  ;;  %v8690_v61 = vld [vmem:[%s13322_s1 + $0x400] sm:$0xf0] }
 0x19c   :  { %4573 = vmatpush.bf16.msra.mxu0 %v6016_v9  ;;  %v6639_v9 = vld [vmem:[%s13322_s1 + $0x500] sm:$0xf] }
 0x19d   :  { %4586 = vmatpush.bf16.msra.mxu1 %v6112_v16  ;;  %v8747_v16 = vld [vmem:[%s13322_s1 + $0x5c8] sm:$0xf0] }
 0x19e   :  { %4599 = vmatpush.bf16.msra.mxu2 %v6208_v17  ;;  %v6448_v17 = vor.u32 %v8675_v4, %v6447_v3  ;;  %v8738_v3 = vld [vmem:[%s13322_s1 + $0x580] sm:$0xf0] }
 0x19f   :  { %4612 = vmatpush.bf16.msra.mxu3 %v6304_v24  ;;  %v8720_v24 = vld [vmem:[%s13322_s1 + $0x4f0] sm:$0xf0] }
 0x1a0   :  { %4574 = vmatpush.bf16.msra.mxu0 %v6004_v38  ;;  %v4368_v27 = vpop.f32.mrf.mxu0  ;;  %v6628_v38 = vor.u32 %v8720_v24, %v6627_v23  ;;  %v6387_v23 = vld [vmem:[%s13322_s1 + $0x308] sm:$0xf]  ;;  %v8660_v24 = vld [vmem:[%s13322_s1 + $0x310] sm:$0xf0] }
 0x1a1   :  { %4587 = vmatpush.bf16.msra.mxu1 %v6100_v42  ;;  %v4369_v30 = vadd.f32 %v4368_v27, %v11875_v58  ;;  %v4381_v33 = vpop.f32.mrf.mxu1  ;;  %v6724_v58 = vor.u32 %v8744_v29, %v6723_v28  ;;  %v6592_v28 = vor.u32 %v8711_v20, %v6591_v40  ;;  %v6483_v29 = vld [vmem:[%s13322_s1 + $0x3c8] sm:$0xf]  ;;  %v6388_v44 = vor.u32 %v8660_v24, %v6387_v23  ;;  %v7023_v40 = vld [vmem:[%s13322_s1 + $0x800] sm:$0xf]  ;;  %v8819_v20 = vld [vmem:[%s13322_s1 + $0x808] sm:$0xf0] }
 0x1a2   :  { %4600 = vmatpush.bf16.msra.mxu2 %v6196_v43  ;;  %v8693_v43 = vld [vmem:[%s13322_s1 + $0x418] sm:$0xf0]  ;;  %v7024_v23 = vor.u32 %v8819_v20, %v7023_v40  ;;  %v6819_v24 = vld [vmem:[%s13322_s1 + $0x668] sm:$0xf]  ;;  %v6879_v40 = vld [vmem:[%s13322_s1 + $0x6e0] sm:$0xf] }
 0x1a3   :  { %4613 = vmatpush.bf16.msra.mxu3 %v6292_v46  ;;  %4575 = vmatmul.bf16.vlgmr.msra.gmra.mxu0 %v9654_v32  ;;  %v6531_v32 = vld [vmem:[%s13322_s1 + $0x428] sm:$0xf]  ;;  %v4382_v42 = vadd.f32 %v4381_v33, %v4369_v30  ;;  %v6711_v46 = vld [vmem:[%s13322_s1 + $0x590] sm:$0xf]  ;;  %v8684_v30 = vld [vmem:[%s13322_s1 + $0x3d0] sm:$0xf0] }
 0x1a4   :  { %4619 = vmatpush.bf16.msrb.mxu0 %v6472_v47  ;;  %4588 = vmatmul.bf16.vlgmr.msra.gmra.mxu1 %v9658_v36  ;;  %v8696_v36 = vld [vmem:[%s13322_s1 + $0x430] sm:$0xf0]  ;;  %v8741_v47 = vld [vmem:[%s13322_s1 + $0x598] sm:$0xf0] }
 0x1a5   :  { %4632 = vmatpush.bf16.msrb.mxu1 %v6568_v48  ;;  %4601 = vmatmul.bf16.vlgmr.msra.gmra.mxu2 %v9652_v31  ;;  %v6640_v31 = vor.u32 %v8723_v12, %v6639_v9  ;;  %v6532_v37 = vor.u32 %v8696_v36, %v6531_v32  ;;  %v6424_v48 = vor.u32 %v8669_v56, %v6423_v39  ;;  %v6687_v32 = vld [vmem:[%s13322_s1 + $0x560] sm:$0xf]  ;;  %v8732_v39 = vld [vmem:[%s13322_s1 + $0x550] sm:$0xf0] }
 0x1a6   :  { %4645 = vmatpush.bf16.msrb.mxu2 %v6664_v49  ;;  %4614 = vmatmul.bf16.vlgmr.msra.gmra.mxu3 %v9656_v35  ;;  %v6736_v35 = vor.u32 %v8747_v16, %v6735_v15  ;;  %v6520_v49 = vor.u32 %v8693_v43, %v6519_v41  ;;  %v6712_v59 = vor.u32 %v8741_v47, %v6711_v46  ;;  %v6399_v15 = vld [vmem:[%s13322_s1 + $0x320] sm:$0xf]  ;;  %v8663_v16 = vld [vmem:[%s13322_s1 + $0x328] sm:$0xf0]  ;;  %v6855_v41 = vld [vmem:[%s13322_s1 + $0x6b0] sm:$0xf] }
 0x1a7   :  { %4658 = vmatpush.bf16.msrb.mxu3 %v6760_v57  ;;  %v6507_v57 = vld [vmem:[%s13322_s1 + $0x3f8] sm:$0xf]  ;;  %v6604_v12 = vor.u32 %v8714_v63, %v6603_v62  ;;  %v6400_v36 = vor.u32 %v8663_v16, %v6399_v15  ;;  %v7047_v46 = vld [vmem:[%s13322_s1 + $0x830] sm:$0xf]  ;;  %v8825_v47 = vld [vmem:[%s13322_s1 + $0x838] sm:$0xf0] }
 0x1a8   :  { %4620 = vmatpush.bf16.msrb.mxu0 %v6460_v1  ;;  %v4394_v60 = vpop.f32.mrf.mxu2  ;;  %v4370_v4 = vpop.f32.mrf.mxu0  ;;  %v6508_v9 = vor.u32 %v8690_v61, %v6507_v57  ;;  %v6843_v61 = vld [vmem:[%s13322_s1 + $0x698] sm:$0xf]  ;;  %v8774_v62 = vld [vmem:[%s13322_s1 + $0x6a0] sm:$0xf0]  ;;  %v6831_v15 = vld [vmem:[%s13322_s1 + $0x680] sm:$0xf] }
 0x1a9   :  { %4633 = vmatpush.bf16.msrb.mxu1 %v6556_v2  ;;  %v4395_v1 = vadd.f32 %v4394_v60, %v4382_v42  ;;  %v4407_v2 = vpop.f32.mrf.mxu3  ;;  %v6951_v42 = vld [vmem:[%s13322_s1 + $0x770] sm:$0xf]  ;;  %v7048_v60 = vor.u32 %v8825_v47, %v7047_v46  ;;  %v6939_v63 = vld [vmem:[%s13322_s1 + $0x758] sm:$0xf]  ;;  %v8771_v16 = vld [vmem:[%s13322_s1 + $0x688] sm:$0xf0] }
 0x1aa   :  { %4646 = vmatpush.bf16.msrb.mxu2 %v6652_v19  ;;  %v6699_v19 = vld [vmem:[%s13322_s1 + $0x578] sm:$0xf]  ;;  %v6999_v46 = vld [vmem:[%s13322_s1 + $0x7d0] sm:$0xf]  ;;  %v8813_v47 = vld [vmem:[%s13322_s1 + $0x7d8] sm:$0xf0] }
 0x1ab   :  { %4659 = vmatpush.bf16.msrb.mxu3 %v6748_v7  ;;  %v4383_v7 = vpop.f32.mrf.mxu1  ;;  %v12074_v8 = vadd.f32 %v4407_v2, %v4395_v1  ;;  %v8798_v2 = vld [vmem:[%s13322_s1 + $0x760] sm:$0xf0]  ;;  %v7131_v4 = vld [vmem:[%s13322_s1 + $0x8d8] sm:$0xf] }
 0x1ac   :  { %4621 = vmatpush.bf16.msrb.mxu0 %v6448_v17  ;;  %v6495_v17 = vld [vmem:[%s13322_s1 + $0x3e0] sm:$0xf]  ;;  %v6844_v7 = vor.u32 %v8774_v62, %v6843_v61 }
 0x1ad   :  { %4634 = vmatpush.bf16.msrb.mxu1 %v6544_v18  ;;  %v6700_v18 = vor.u32 %v8738_v3, %v6699_v19  ;;  %v7035_v19 = vld [vmem:[%s13322_s1 + $0x818] sm:$0xf]  ;;  %v8822_v3 = vld [vmem:[%s13322_s1 + $0x820] sm:$0xf0] }
 0x1ae   :  { %4647 = vmatpush.bf16.msrb.mxu2 %v6640_v31  ;;  %v8687_v31 = vld [vmem:[%s13322_s1 + $0x3e8] sm:$0xf0] }
 0x1af   :  { %4660 = vmatpush.bf16.msrb.mxu3 %v6736_v35  ;;  %v8735_v35 = vld [vmem:[%s13322_s1 + $0x568] sm:$0xf0]  ;;  %v6496_v27 = vor.u32 %v8687_v31, %v6495_v17  ;;  %v6927_v17 = vld [vmem:[%s13322_s1 + $0x740] sm:$0xf] }
 0x1b0   :  { %4622 = vmatpush.bf16.msrb.mxu0 %v6436_v34  ;;  %v6579_v34 = vld [vmem:[%s13322_s1 + $0x488] sm:$0xf]  ;;  %v6688_v33 = vor.u32 %v8735_v35, %v6687_v32  ;;  %v4396_v56 = vpop.f32.mrf.mxu2  ;;  %v8795_v31 = vld [vmem:[%s13322_s1 + $0x748] sm:$0xf0]  ;;  %v7119_v32 = vld [vmem:[%s13322_s1 + $0x8c0] sm:$0xf]  ;;  %v6832_v35 = vor.u32 %v8771_v16, %v6831_v15 }
 0x1b1   :  { %4635 = vmatpush.bf16.msrb.mxu1 %v6532_v37  ;;  %v8708_v37 = vld [vmem:[%s13322_s1 + $0x490] sm:$0xf0]  ;;  %v4409_v43 = vpop.f32.mrf.mxu3 }
 0x1b2   :  { %4648 = vmatpush.bf16.msrb.mxu2 %v6628_v38  ;;  %v6675_v38 = vld [vmem:[%s13322_s1 + $0x548] sm:$0xf]  ;;  %v6903_v43 = vld [vmem:[%s13322_s1 + $0x710] sm:$0xf] }
 0x1b3   :  { %4661 = vmatpush.bf16.msrb.mxu3 %v6724_v58  ;;  %v8777_v58 = vld [vmem:[%s13322_s1 + $0x6b8] sm:$0xf0]  ;;  %v6676_v53 = vor.u32 %v8732_v39, %v6675_v38 }
 0x1b4   :  { %4623 = vmatpush.bf16.msrb.mxu0 %v6424_v48  ;;  %v6484_v48 = vor.u32 %v8684_v30, %v6483_v29  ;;  %v6856_v57 = vor.u32 %v8777_v58, %v6855_v41  ;;  %v8816_v29 = vld [vmem:[%s13322_s1 + $0x7f0] sm:$0xf0]  ;;  %v6807_v58 = vld [vmem:[%s13322_s1 + $0x650] sm:$0xf] }
 0x1b5   :  { %4636 = vmatpush.bf16.msrb.mxu1 %v6520_v49  ;;  %v6580_v49 = vor.u32 %v8708_v37, %v6579_v34  ;;  %v7107_v34 = vld [vmem:[%s13322_s1 + $0x8a8] sm:$0xf] }
 0x1b6   :  { %4649 = vmatpush.bf16.msrb.mxu2 %v6616_v0  ;;  %v7143_v0 = vld [vmem:[%s13322_s1 + $0x8f0] sm:$0xf] }
 0x1b7   :  { %4662 = vmatpush.bf16.msrb.mxu3 %v6712_v59  ;;  %v6952_v59 = vor.u32 %v8801_v45, %v6951_v42  ;;  %v7144_v1 = vor.u32 %v8849_v50, %v7143_v0  ;;  %v8765_v42 = vld [vmem:[%s13322_s1 + $0x658] sm:$0xf0] }
 0x1b8   :  { %4624 = vmatpush.bf16.msrb.mxu0 %v6412_v6  ;;  %v8846_v6 = vld [vmem:[%s13322_s1 + $0x8e0] sm:$0xf0]  ;;  %v8789_v45 = vld [vmem:[%s13322_s1 + $0x718] sm:$0xf0]  ;;  %v6808_v0 = vor.u32 %v8765_v42, %v6807_v58  ;;  %v7335_v58 = vld [vmem:[%s13322_s1 + $0xa70] sm:$0xf] }
 0x1b9   :  { %4637 = vmatpush.bf16.msrb.mxu1 %v6508_v9  ;;  %v6940_v9 = vor.u32 %v8798_v2, %v6939_v63  ;;  %v6904_v50 = vor.u32 %v8789_v45, %v6903_v43  ;;  %v8786_v63 = vld [vmem:[%s13322_s1 + $0x700] sm:$0xf0]  ;;  %v8921_v45 = vld [vmem:[%s13322_s1 + $0xb38] sm:$0xf0] }
 0x1ba   :  { %4650 = vmatpush.bf16.msrb.mxu2 %v6604_v12  ;;  %v7036_v12 = vor.u32 %v8822_v3, %v7035_v19  ;;  %v8810_v2 = vld [vmem:[%s13322_s1 + $0x7c0] sm:$0xf0] }
 0x1bb   :  { %4663 = vmatpush.bf16.msrb.mxu3 %v6700_v18  ;;  %v7132_v18 = vor.u32 %v8846_v6, %v7131_v4  ;;  %v7083_v4 = vld [vmem:[%s13322_s1 + $0x878] sm:$0xf]  ;;  %v8834_v6 = vld [vmem:[%s13322_s1 + $0x880] sm:$0xf0] }
 0x1bc   :  { %4625 = vmatpush.bf16.msrb.mxu0 %v6400_v36  ;;  %v6928_v36 = vor.u32 %v8795_v31, %v6927_v17  ;;  %v8759_v31 = vld [vmem:[%s13322_s1 + $0x628] sm:$0xf0]  ;;  %v7084_v20 = vor.u32 %v8834_v6, %v7083_v4 }
 0x1bd   :  { %4638 = vmatpush.bf16.msrb.mxu1 %v6496_v27  ;;  %v8768_v27 = vld [vmem:[%s13322_s1 + $0x670] sm:$0xf0] }
 0x1be   :  { %4651 = vmatpush.bf16.msrb.mxu2 %v6592_v28  ;;  %v7011_v28 = vld [vmem:[%s13322_s1 + $0x7e8] sm:$0xf]  ;;  %v6820_v38 = vor.u32 %v8768_v27, %v6819_v24 }
 0x1bf   :  { %4664 = vmatpush.bf16.msrb.mxu3 %v6688_v33  ;;  %v8840_v33 = vld [vmem:[%s13322_s1 + $0x8b0] sm:$0xf0]  ;;  %v7012_v41 = vor.u32 %v8816_v29, %v7011_v28  ;;  %v6771_v27 = vld [vmem:[%s13322_s1 + $0x608] sm:$0xf] }
 0x1c0   :  { %4626 = vmatpush.bf16.msrb.mxu0 %v6388_v44  ;;  %v4420_v30 = vpop.f32.mrf.mxu0  ;;  %v6867_v28 = vld [vmem:[%s13322_s1 + $0x6c8] sm:$0xf]  ;;  %v8780_v29 = vld [vmem:[%s13322_s1 + $0x6d0] sm:$0xf0] }
 0x1c1   :  { %4639 = vmatpush.bf16.msrb.mxu1 %v6484_v48  ;;  %v4421_v37 = vadd.f32 %v4420_v30, %v12074_v8  ;;  %v4433_v39 = vpop.f32.mrf.mxu1  ;;  %v7108_v8 = vor.u32 %v8840_v33, %v7107_v34  ;;  %v7095_v48 = vld [vmem:[%s13322_s1 + $0x890] sm:$0xf]  ;;  %v6963_v30 = vld [vmem:[%s13322_s1 + $0x788] sm:$0xf]  ;;  %v8804_v33 = vld [vmem:[%s13322_s1 + $0x790] sm:$0xf0] }
 0x1c2   :  { %4652 = vmatpush.bf16.msrb.mxu2 %v6580_v49  ;;  %v8837_v49 = vld [vmem:[%s13322_s1 + $0x898] sm:$0xf0] }
 0x1c3   :  { %4665 = vmatpush.bf16.msrb.mxu3 %v6676_v53  ;;  %4627 = vmatmul.bf16.vlgmr.msrb.gmra.mxu0 %v9768_v22  ;;  %v6915_v22 = vld [vmem:[%s13322_s1 + $0x728] sm:$0xf]  ;;  %v4434_v44 = vadd.f32 %v4433_v39, %v4421_v37  ;;  %v7000_v53 = vor.u32 %v8813_v47, %v6999_v46  ;;  %v7096_v61 = vor.u32 %v8837_v49, %v7095_v48  ;;  %v7527_v48 = vld [vmem:[%s13322_s1 + $0xbf0] sm:$0xf]  ;;  %v8945_v49 = vld [vmem:[%s13322_s1 + $0xbf8] sm:$0xf0] }
 0x1c4   :  { %4671 = vmatpush.bf16.msra.mxu0 %v6856_v57  ;;  %4640 = vmatmul.bf16.vlgmr.msrb.gmra.mxu1 %v9772_v26  ;;  %v8792_v26 = vld [vmem:[%s13322_s1 + $0x730] sm:$0xf0]  ;;  %v6795_v57 = vld [vmem:[%s13322_s1 + $0x638] sm:$0xf]  ;;  %v7059_v37 = vld [vmem:[%s13322_s1 + $0x848] sm:$0xf]  ;;  %v6868_v46 = vor.u32 %v8780_v29, %v6867_v28  ;;  %v6964_v47 = vor.u32 %v8804_v33, %v6963_v30 }
 0x1c5   :  { %4684 = vmatpush.bf16.msra.mxu1 %v6952_v59  ;;  %4653 = vmatmul.bf16.vlgmr.msrb.gmra.mxu2 %v9766_v21  ;;  %v8843_v21 = vld [vmem:[%s13322_s1 + $0x8c8] sm:$0xf0]  ;;  %v6916_v56 = vor.u32 %v8792_v26, %v6915_v22  ;;  %v8762_v59 = vld [vmem:[%s13322_s1 + $0x640] sm:$0xf0]  ;;  %v8756_v22 = vld [vmem:[%s13322_s1 + $0x610] sm:$0xf0] }
 0x1c6   :  { %4697 = vmatpush.bf16.msra.mxu2 %v7048_v60  ;;  %4666 = vmatmul.bf16.vlgmr.msrb.gmra.mxu3 %v9770_v25  ;;  %v7120_v25 = vor.u32 %v8843_v21, %v7119_v32  ;;  %v6891_v60 = vld [vmem:[%s13322_s1 + $0x6f8] sm:$0xf]  ;;  %v8783_v32 = vld [vmem:[%s13322_s1 + $0x6e8] sm:$0xf0]  ;;  %v6975_v21 = vld [vmem:[%s13322_s1 + $0x7a0] sm:$0xf]  ;;  %v6772_v43 = vor.u32 %v8756_v22, %v6771_v27 }
 0x1c7   :  { %4710 = vmatpush.bf16.msra.mxu3 %v7144_v1  ;;  %v6987_v1 = vld [vmem:[%s13322_s1 + $0x7b8] sm:$0xf]  ;;  %v6892_v16 = vor.u32 %v8786_v63, %v6891_v60  ;;  %v8870_v60 = vld [vmem:[%s13322_s1 + $0x9a0] sm:$0xf0]  ;;  %v8912_v27 = vld [vmem:[%s13322_s1 + $0xaf0] sm:$0xf0] }
 0x1c8   :  { %4672 = vmatpush.bf16.msra.mxu0 %v6844_v7  ;;  %v4446_v62 = vpop.f32.mrf.mxu2  ;;  %v4422_v7 = vpop.f32.mrf.mxu0  ;;  %v6988_v17 = vor.u32 %v8810_v2, %v6987_v1  ;;  %v8894_v63 = vld [vmem:[%s13322_s1 + $0xa60] sm:$0xf0]  ;;  %v7419_v1 = vld [vmem:[%s13322_s1 + $0xb18] sm:$0xf] }
 0x1c9   :  { %4685 = vmatpush.bf16.msra.mxu1 %v6940_v9  ;;  %v4447_v19 = vadd.f32 %v4446_v62, %v4434_v44  ;;  %v4459_v3 = vpop.f32.mrf.mxu3  ;;  %v6796_v9 = vor.u32 %v8762_v59, %v6795_v57  ;;  %v7431_v44 = vld [vmem:[%s13322_s1 + $0xb30] sm:$0xf]  ;;  %v7227_v59 = vld [vmem:[%s13322_s1 + $0x998] sm:$0xf]  ;;  %v7528_v62 = vor.u32 %v8945_v49, %v7527_v48  ;;  %v8918_v2 = vld [vmem:[%s13322_s1 + $0xb20] sm:$0xf0] }
 0x1ca   :  { %4698 = vmatpush.bf16.msra.mxu2 %v7036_v12  ;;  %v4435_v12 = vpop.f32.mrf.mxu1  ;;  %v7432_v57 = vor.u32 %v8921_v45, %v7431_v44  ;;  %v7228_v4 = vor.u32 %v8870_v60, %v7227_v59  ;;  %v7420_v7 = vor.u32 %v8918_v2, %v7419_v1  ;;  %v8858_v48 = vld [vmem:[%s13322_s1 + $0x940] sm:$0xf0]  ;;  %v7275_v49 = vld [vmem:[%s13322_s1 + $0x9f8] sm:$0xf] }
 0x1cb   :  { %4711 = vmatpush.bf16.msra.mxu3 %v7132_v18  ;;  %v12273_v15 = vadd.f32 %v4459_v3, %v4447_v19  ;;  %v6783_v18 = vld [vmem:[%s13322_s1 + $0x620] sm:$0xf]  ;;  %v7515_v19 = vld [vmem:[%s13322_s1 + $0xbd8] sm:$0xf]  ;;  %v8942_v3 = vld [vmem:[%s13322_s1 + $0xbe0] sm:$0xf0] }
 0x1cc   :  { %4673 = vmatpush.bf16.msra.mxu0 %v6832_v35  ;;  %v8807_v35 = vld [vmem:[%s13322_s1 + $0x7a8] sm:$0xf0]  ;;  %v6784_v24 = vor.u32 %v8759_v31, %v6783_v18  ;;  %v7407_v31 = vld [vmem:[%s13322_s1 + $0xb00] sm:$0xf]  ;;  %v8906_v59 = vld [vmem:[%s13322_s1 + $0xac0] sm:$0xf0] }
 0x1cd   :  { %4686 = vmatpush.bf16.msra.mxu1 %v6928_v36  ;;  %v7071_v36 = vld [vmem:[%s13322_s1 + $0x860] sm:$0xf]  ;;  %v6976_v26 = vor.u32 %v8807_v35, %v6975_v21  ;;  %v8867_v12 = vld [vmem:[%s13322_s1 + $0x988] sm:$0xf0] }
 0x1ce   :  { %4699 = vmatpush.bf16.msra.mxu2 %v7024_v23  ;;  %v8831_v23 = vld [vmem:[%s13322_s1 + $0x868] sm:$0xf0] }
 0x1cf   :  { %4712 = vmatpush.bf16.msra.mxu3 %v7120_v25  ;;  %v6880_v25 = vor.u32 %v8783_v32, %v6879_v40  ;;  %v7072_v34 = vor.u32 %v8831_v23, %v7071_v36  ;;  %v8891_v18 = vld [vmem:[%s13322_s1 + $0xa48] sm:$0xf0]  ;;  %v7299_v36 = vld [vmem:[%s13322_s1 + $0xa28] sm:$0xf]  ;;  %v8888_v23 = vld [vmem:[%s13322_s1 + $0xa30] sm:$0xf0] }
 0x1d0   :  { %4674 = vmatpush.bf16.msra.mxu0 %v6820_v38  ;;  %v8828_v38 = vld [vmem:[%s13322_s1 + $0x850] sm:$0xf0]  ;;  %v4448_v39 = vpop.f32.mrf.mxu2  ;;  %v8915_v40 = vld [vmem:[%s13322_s1 + $0xb08] sm:$0xf0] }
 0x1d1   :  { %4687 = vmatpush.bf16.msra.mxu1 %v6916_v56  ;;  %v7239_v56 = vld [vmem:[%s13322_s1 + $0x9b0] sm:$0xf]  ;;  %v4461_v42 = vpop.f32.mrf.mxu3  ;;  %v7408_v35 = vor.u32 %v8915_v40, %v7407_v31  ;;  %v8903_v31 = vld [vmem:[%s13322_s1 + $0xaa8] sm:$0xf0]  ;;  %v7455_v40 = vld [vmem:[%s13322_s1 + $0xb60] sm:$0xf] }
 0x1d2   :  { %4700 = vmatpush.bf16.msra.mxu2 %v7012_v41  ;;  %v8873_v41 = vld [vmem:[%s13322_s1 + $0x9b8] sm:$0xf0]  ;;  %v7287_v39 = vld [vmem:[%s13322_s1 + $0xa10] sm:$0xf] }
 0x1d3   :  { %4713 = vmatpush.bf16.msra.mxu3 %v7108_v8  ;;  %v8897_v8 = vld [vmem:[%s13322_s1 + $0xa78] sm:$0xf0] }
 0x1d4   :  { %4675 = vmatpush.bf16.msra.mxu0 %v6808_v0  ;;  %v7060_v0 = vor.u32 %v8828_v38, %v7059_v37  ;;  %v7191_v37 = vld [vmem:[%s13322_s1 + $0x950] sm:$0xf]  ;;  %v8861_v38 = vld [vmem:[%s13322_s1 + $0x958] sm:$0xf0] }
 0x1d5   :  { %4688 = vmatpush.bf16.msra.mxu1 %v6904_v50  ;;  %v7240_v50 = vor.u32 %v8873_v41, %v7239_v56  ;;  %v8885_v41 = vld [vmem:[%s13322_s1 + $0xa18] sm:$0xf0]  ;;  %v7192_v44 = vor.u32 %v8861_v38, %v7191_v37  ;;  %v7815_v37 = vld [vmem:[%s13322_s1 + $0xe30] sm:$0xf] }
 0x1d6   :  { %4701 = vmatpush.bf16.msra.mxu2 %v7000_v53  ;;  %v7336_v53 = vor.u32 %v8897_v8, %v7335_v58  ;;  %v7383_v58 = vld [vmem:[%s13322_s1 + $0xad0] sm:$0xf]  ;;  %v8909_v42 = vld [vmem:[%s13322_s1 + $0xad8] sm:$0xf0]  ;;  %v7288_v45 = vor.u32 %v8885_v41, %v7287_v39 }
 0x1d7   :  { %4714 = vmatpush.bf16.msra.mxu3 %v7096_v61  ;;  %v7323_v61 = vld [vmem:[%s13322_s1 + $0xa58] sm:$0xf]  ;;  %v8933_v8 = vld [vmem:[%s13322_s1 + $0xb98] sm:$0xf0] }
 0x1d8   :  { %4676 = vmatpush.bf16.msra.mxu0 %v6796_v9  ;;  %v7324_v6 = vor.u32 %v8894_v63, %v7323_v61  ;;  %v7215_v9 = vld [vmem:[%s13322_s1 + $0x980] sm:$0xf]  ;;  %v8930_v63 = vld [vmem:[%s13322_s1 + $0xb80] sm:$0xf0]  ;;  %v9017_v38 = vld [vmem:[%s13322_s1 + $0xe38] sm:$0xf0] }
 0x1d9   :  { %4689 = vmatpush.bf16.msra.mxu1 %v6892_v16  ;;  %v7311_v16 = vld [vmem:[%s13322_s1 + $0xa40] sm:$0xf]  ;;  %v7216_v32 = vor.u32 %v8867_v12, %v7215_v9  ;;  %v8855_v9 = vld [vmem:[%s13322_s1 + $0x928] sm:$0xf0]  ;;  %v9041_v41 = vld [vmem:[%s13322_s1 + $0xef8] sm:$0xf0] }
 0x1da   :  { %4702 = vmatpush.bf16.msra.mxu2 %v6988_v17  ;;  %v7516_v17 = vor.u32 %v8942_v3, %v7515_v19  ;;  %v7312_v21 = vor.u32 %v8891_v18, %v7311_v16  ;;  %v7263_v12 = vld [vmem:[%s13322_s1 + $0x9e0] sm:$0xf] }
 0x1db   :  { %4715 = vmatpush.bf16.msra.mxu3 %v7084_v20  ;;  %v8939_v20 = vld [vmem:[%s13322_s1 + $0xbc8] sm:$0xf0]  ;;  %v7359_v18 = vld [vmem:[%s13322_s1 + $0xaa0] sm:$0xf] }
 0x1dc   :  { %4677 = vmatpush.bf16.msra.mxu0 %v6784_v24  ;;  %v7395_v24 = vld [vmem:[%s13322_s1 + $0xae8] sm:$0xf] }
 0x1dd   :  { %4690 = vmatpush.bf16.msra.mxu1 %v6880_v25  ;;  %v7491_v25 = vld [vmem:[%s13322_s1 + $0xba8] sm:$0xf]  ;;  %v7396_v33 = vor.u32 %v8912_v27, %v7395_v24  ;;  %v8900_v24 = vld [vmem:[%s13322_s1 + $0xa90] sm:$0xf0] }
 0x1de   :  { %4703 = vmatpush.bf16.msra.mxu2 %v6976_v26  ;;  %v8936_v26 = vld [vmem:[%s13322_s1 + $0xbb0] sm:$0xf0]  ;;  %v7443_v27 = vld [vmem:[%s13322_s1 + $0xb48] sm:$0xf] }
 0x1df   :  { %4716 = vmatpush.bf16.msra.mxu3 %v7072_v34  ;;  %v7300_v34 = vor.u32 %v8888_v23, %v7299_v36  ;;  %v8876_v36 = vld [vmem:[%s13322_s1 + $0x9d0] sm:$0xf0] }
 0x1e0   :  { %4678 = vmatpush.bf16.msra.mxu0 %v6772_v43  ;;  %v4472_v22 = vpop.f32.mrf.mxu0  ;;  %v7479_v43 = vld [vmem:[%s13322_s1 + $0xb90] sm:$0xf] }
 0x1e1   :  { %4691 = vmatpush.bf16.msra.mxu1 %v6868_v46  ;;  %v4473_v28 = vadd.f32 %v4472_v22, %v12273_v15  ;;  %v4485_v30 = vpop.f32.mrf.mxu1  ;;  %v7492_v15 = vor.u32 %v8936_v26, %v7491_v25  ;;  %v7384_v46 = vor.u32 %v8909_v42, %v7383_v58  ;;  %v8924_v22 = vld [vmem:[%s13322_s1 + $0xb50] sm:$0xf0]  ;;  %v7623_v26 = vld [vmem:[%s13322_s1 + $0xcb0] sm:$0xf] }
 0x1e2   :  { %4704 = vmatpush.bf16.msra.mxu2 %v6964_v47  ;;  %v7179_v47 = vld [vmem:[%s13322_s1 + $0x938] sm:$0xf]  ;;  %v7444_v58 = vor.u32 %v8924_v22, %v7443_v27  ;;  %v8981_v27 = vld [vmem:[%s13322_s1 + $0xd18] sm:$0xf0]  ;;  %v7767_v22 = vld [vmem:[%s13322_s1 + $0xdd0] sm:$0xf] }
 0x1e3   :  { %4717 = vmatpush.bf16.msra.mxu3 %v7060_v0  ;;  %4679 = vmatmul.bf16.vlgmr.msra.gmra.mxu0 %v9868_v10  ;;  %v7503_v10 = vld [vmem:[%s13322_s1 + $0xbc0] sm:$0xf]  ;;  %v4486_v56 = vadd.f32 %v4485_v30, %v4473_v28  ;;  %v7480_v0 = vor.u32 %v8933_v8, %v7479_v43  ;;  %v7180_v2 = vor.u32 %v8858_v48, %v7179_v47  ;;  %v8969_v28 = vld [vmem:[%s13322_s1 + $0xcb8] sm:$0xf0]  ;;  %v8990_v48 = vld [vmem:[%s13322_s1 + $0xd60] sm:$0xf0] }
 0x1e4   :  { %4723 = vmatpush.bf16.msrb.mxu0 %v7240_v50  ;;  %4692 = vmatmul.bf16.vlgmr.msra.gmra.mxu1 %v9872_v13  ;;  %v8864_v13 = vld [vmem:[%s13322_s1 + $0x970] sm:$0xf0]  ;;  %v7624_v42 = vor.u32 %v8969_v28, %v7623_v26  ;;  %v7816_v8 = vor.u32 %v9017_v38, %v7815_v37  ;;  %v7863_v26 = vld [vmem:[%s13322_s1 + $0xe90] sm:$0xf]  ;;  %v9029_v28 = vld [vmem:[%s13322_s1 + $0xe98] sm:$0xf0] }
 0x1e5   :  { %4736 = vmatpush.bf16.msrb.mxu1 %v7336_v53  ;;  %4705 = vmatmul.bf16.vlgmr.msra.gmra.mxu2 %v9870_v11  ;;  %v7203_v11 = vld [vmem:[%s13322_s1 + $0x968] sm:$0xf]  ;;  %v8882_v53 = vld [vmem:[%s13322_s1 + $0xa00] sm:$0xf0]  ;;  %v7659_v38 = vld [vmem:[%s13322_s1 + $0xcf8] sm:$0xf] }
 0x1e6   :  { %4749 = vmatpush.bf16.msrb.mxu2 %v7432_v57  ;;  %4718 = vmatmul.bf16.vlgmr.msra.gmra.mxu3 %v9874_v14  ;;  %v7504_v14 = vor.u32 %v8939_v20, %v7503_v10  ;;  %v7204_v29 = vor.u32 %v8864_v13, %v7203_v11  ;;  %v7371_v57 = vld [vmem:[%s13322_s1 + $0xab8] sm:$0xf]  ;;  %v8927_v10 = vld [vmem:[%s13322_s1 + $0xb68] sm:$0xf0]  ;;  %v7360_v11 = vor.u32 %v8903_v31, %v7359_v18  ;;  %v7251_v13 = vld [vmem:[%s13322_s1 + $0x9c8] sm:$0xf] }
 0x1e7   :  { %4762 = vmatpush.bf16.msrb.mxu3 %v7528_v62  ;;  %v7467_v62 = vld [vmem:[%s13322_s1 + $0xb78] sm:$0xf]  ;;  %v7456_v23 = vor.u32 %v8927_v10, %v7455_v40  ;;  %v7252_v39 = vor.u32 %v8876_v36, %v7251_v13  ;;  %v7779_v18 = vld [vmem:[%s13322_s1 + $0xde8] sm:$0xf]  ;;  %v9008_v31 = vld [vmem:[%s13322_s1 + $0xdf0] sm:$0xf0] }
 0x1e8   :  { %4724 = vmatpush.bf16.msrb.mxu0 %v7228_v4  ;;  %v4498_v50 = vpop.f32.mrf.mxu2  ;;  %v4474_v1 = vpop.f32.mrf.mxu0  ;;  %v7276_v4 = vor.u32 %v8882_v53, %v7275_v49  ;;  %v7468_v16 = vor.u32 %v8930_v63, %v7467_v62  ;;  %v7803_v49 = vld [vmem:[%s13322_s1 + $0xe18] sm:$0xf]  ;;  %v9038_v53 = vld [vmem:[%s13322_s1 + $0xee0] sm:$0xf0]  ;;  %v8963_v62 = vld [vmem:[%s13322_s1 + $0xc88] sm:$0xf0]  ;;  %v7780_v13 = vor.u32 %v9008_v31, %v7779_v18 }
 0x1e9   :  { %4737 = vmatpush.bf16.msrb.mxu1 %v7324_v6  ;;  %v4499_v60 = vadd.f32 %v4498_v50, %v4486_v56  ;;  %v4511_v61 = vpop.f32.mrf.mxu3  ;;  %v4487_v19 = vpop.f32.mrf.mxu1  ;;  %v7372_v6 = vor.u32 %v8906_v59, %v7371_v57  ;;  %v7911_v56 = vld [vmem:[%s13322_s1 + $0xef0] sm:$0xf]  ;;  %v7899_v50 = vld [vmem:[%s13322_s1 + $0xed8] sm:$0xf]  ;;  %v7695_v63 = vld [vmem:[%s13322_s1 + $0xd40] sm:$0xf] }
 0x1ea   :  { %4750 = vmatpush.bf16.msrb.mxu2 %v7420_v7  ;;  %v7167_v7 = vld [vmem:[%s13322_s1 + $0x920] sm:$0xf]  ;;  %v7912_v47 = vor.u32 %v9041_v41, %v7911_v56  ;;  %v7900_v1 = vor.u32 %v9038_v53, %v7899_v50  ;;  %v7875_v10 = vld [vmem:[%s13322_s1 + $0xea8] sm:$0xf]  ;;  %v7575_v36 = vld [vmem:[%s13322_s1 + $0xc50] sm:$0xf] }
 0x1eb   :  { %4763 = vmatpush.bf16.msrb.mxu3 %v7516_v17  ;;  %v12472_v3 = vadd.f32 %v4511_v61, %v4499_v60  ;;  %v8879_v17 = vld [vmem:[%s13322_s1 + $0x9e8] sm:$0xf0]  ;;  %v7168_v20 = vor.u32 %v8855_v9, %v7167_v7  ;;  %v7599_v61 = vld [vmem:[%s13322_s1 + $0xc80] sm:$0xf]  ;;  %v8954_v37 = vld [vmem:[%s13322_s1 + $0xc40] sm:$0xf0] }
 0x1ec   :  { %4725 = vmatpush.bf16.msrb.mxu0 %v7216_v32  ;;  %v7155_v32 = vld [vmem:[%s13322_s1 + $0x908] sm:$0xf]  ;;  %v7791_v19 = vld [vmem:[%s13322_s1 + $0xe00] sm:$0xf]  ;;  %v7600_v7 = vor.u32 %v8963_v62, %v7599_v61  ;;  %v8978_v56 = vld [vmem:[%s13322_s1 + $0xd00] sm:$0xf0] }
 0x1ed   :  { %4738 = vmatpush.bf16.msrb.mxu1 %v7312_v21  ;;  %v8852_v21 = vld [vmem:[%s13322_s1 + $0x910] sm:$0xf0]  ;;  %v7755_v41 = vld [vmem:[%s13322_s1 + $0xdb8] sm:$0xf]  ;;  %v7551_v50 = vld [vmem:[%s13322_s1 + $0xc20] sm:$0xf] }
 0x1ee   :  { %4751 = vmatpush.bf16.msrb.mxu2 %v7408_v35  ;;  %v7264_v35 = vor.u32 %v8879_v17, %v7263_v12  ;;  %v8984_v17 = vld [vmem:[%s13322_s1 + $0xd30] sm:$0xf0]  ;;  %v8951_v53 = vld [vmem:[%s13322_s1 + $0xc28] sm:$0xf0]  ;;  %v7743_v61 = vld [vmem:[%s13322_s1 + $0xda0] sm:$0xf] }
 0x1ef   :  { %4764 = vmatpush.bf16.msrb.mxu3 %v7504_v14  ;;  %v7347_v14 = vld [vmem:[%s13322_s1 + $0xa88] sm:$0xf]  ;;  %v8999_v62 = vld [vmem:[%s13322_s1 + $0xda8] sm:$0xf0]  ;;  %v8007_v18 = vld [vmem:[%s13322_s1 + $0xfb0] sm:$0xf] }
 0x1f0   :  { %4726 = vmatpush.bf16.msrb.mxu0 %v7204_v29  ;;  %v4500_v25 = vpop.f32.mrf.mxu2  ;;  %v7719_v29 = vld [vmem:[%s13322_s1 + $0xd70] sm:$0xf]  ;;  %v9065_v31 = vld [vmem:[%s13322_s1 + $0xfb8] sm:$0xf0] }
 0x1f1   :  { %4739 = vmatpush.bf16.msrb.mxu1 %v7300_v34  ;;  %v4513_v30 = vpop.f32.mrf.mxu3  ;;  %v7156_v34 = vor.u32 %v8852_v21, %v7155_v32  ;;  %v9005_v25 = vld [vmem:[%s13322_s1 + $0xdd8] sm:$0xf0] }
 0x1f2   :  { %4752 = vmatpush.bf16.msrb.mxu2 %v7396_v33  ;;  %v8993_v33 = vld [vmem:[%s13322_s1 + $0xd78] sm:$0xf0] }
 0x1f3   :  { %4765 = vmatpush.bf16.msrb.mxu3 %v7492_v15  ;;  %v7348_v15 = vor.u32 %v8900_v24, %v7347_v14  ;;  %v7720_v43 = vor.u32 %v8993_v33, %v7719_v29  ;;  %v8957_v14 = vld [vmem:[%s13322_s1 + $0xc58] sm:$0xf0]  ;;  %v7563_v33 = vld [vmem:[%s13322_s1 + $0xc38] sm:$0xf] }
 0x1f4   :  { %4727 = vmatpush.bf16.msrb.mxu0 %v7192_v44  ;;  %v7611_v44 = vld [vmem:[%s13322_s1 + $0xc98] sm:$0xf]  ;;  %v7576_v29 = vor.u32 %v8957_v14, %v7575_v36  ;;  %v8295_v36 = vld [vmem:[%s13322_s1 + $0x11f0] sm:$0xf]  ;;  %v9137_v14 = vld [vmem:[%s13322_s1 + $0x11f8] sm:$0xf0] }
 0x1f5   :  { %4740 = vmatpush.bf16.msrb.mxu1 %v7288_v45  ;;  %v8966_v45 = vld [vmem:[%s13322_s1 + $0xca0] sm:$0xf0] }
 0x1f6   :  { %4753 = vmatpush.bf16.msrb.mxu2 %v7384_v46  ;;  %v7707_v46 = vld [vmem:[%s13322_s1 + $0xd58] sm:$0xf]  ;;  %v7612_v57 = vor.u32 %v8966_v45, %v7611_v44  ;;  %v9026_v44 = vld [vmem:[%s13322_s1 + $0xe80] sm:$0xf0] }
 0x1f7   :  { %4766 = vmatpush.bf16.msrb.mxu3 %v7480_v0  ;;  %v9014_v0 = vld [vmem:[%s13322_s1 + $0xe20] sm:$0xf0]  ;;  %v7708_v59 = vor.u32 %v8990_v48, %v7707_v46  ;;  %v7564_v46 = vor.u32 %v8954_v37, %v7563_v33  ;;  %v8283_v33 = vld [vmem:[%s13322_s1 + $0x11d8] sm:$0xf] }
 0x1f8   :  { %4728 = vmatpush.bf16.msrb.mxu0 %v7180_v2  ;;  %v7804_v60 = vor.u32 %v9014_v0, %v7803_v49  ;;  %v8987_v2 = vld [vmem:[%s13322_s1 + $0xd48] sm:$0xf0]  ;;  %v7660_v49 = vor.u32 %v8978_v56, %v7659_v38  ;;  %v9134_v37 = vld [vmem:[%s13322_s1 + $0x11e0] sm:$0xf0]  ;;  %v7983_v56 = vld [vmem:[%s13322_s1 + $0xf80] sm:$0xf] }
 0x1f9   :  { %4741 = vmatpush.bf16.msrb.mxu1 %v7276_v4  ;;  %v9011_v4 = vld [vmem:[%s13322_s1 + $0xe08] sm:$0xf0]  ;;  %v7696_v9 = vor.u32 %v8987_v2, %v7695_v63  ;;  %v7839_v63 = vld [vmem:[%s13322_s1 + $0xe60] sm:$0xf]  ;;  %v7552_v2 = vor.u32 %v8951_v53, %v7551_v50 }
 0x1fa   :  { %4754 = vmatpush.bf16.msrb.mxu2 %v7372_v6  ;;  %v9035_v6 = vld [vmem:[%s13322_s1 + $0xec8] sm:$0xf0]  ;;  %v7792_v12 = vor.u32 %v9011_v4, %v7791_v19  ;;  %v7539_v19 = vld [vmem:[%s13322_s1 + $0xc08] sm:$0xf]  ;;  %v8948_v4 = vld [vmem:[%s13322_s1 + $0xc10] sm:$0xf0] }
 0x1fb   :  { %4767 = vmatpush.bf16.msrb.mxu3 %v7468_v16  ;;  %v7683_v16 = vld [vmem:[%s13322_s1 + $0xd28] sm:$0xf]  ;;  %v9245_v50 = vld.sshfl [vmem:[#allocation1 + $0x18] sm:$0xff pattern:$0x73625140] }
 0x1fc   :  { %4729 = vmatpush.bf16.msrb.mxu0 %v7168_v20  ;;  %v9032_v20 = vld [vmem:[%s13322_s1 + $0xeb0] sm:$0xf0] }
 0x1fd   :  { %4742 = vmatpush.bf16.msrb.mxu1 %v7264_v35 }
 0x1fe   :  { %4755 = vmatpush.bf16.msrb.mxu2 %v7360_v11  ;;  %v7684_v11 = vor.u32 %v8984_v17, %v7683_v16  ;;  %v7827_v16 = vld [vmem:[%s13322_s1 + $0xe48] sm:$0xf] }
 0x1ff   :  { %4768 = vmatpush.bf16.msrb.mxu3 %v7456_v23  ;;  %v7671_v23 = vld [vmem:[%s13322_s1 + $0xd10] sm:$0xf] }
 0x200   :  { %4730 = vmatpush.bf16.msrb.mxu0 %v7156_v34  ;;  %v4524_v40 = vpop.f32.mrf.mxu0  ;;  %v7672_v30 = vor.u32 %v8981_v27, %v7671_v23  ;;  %v7768_v34 = vor.u32 %v9005_v25, %v7767_v22  ;;  %v7995_v22 = vld [vmem:[%s13322_s1 + $0xf98] sm:$0xf]  ;;  %v9062_v25 = vld [vmem:[%s13322_s1 + $0xfa0] sm:$0xf0] }
 0x201   :  { %4743 = vmatpush.bf16.msrb.mxu1 %v7252_v39  ;;  %v4525_v32 = vadd.f32 %v4524_v40, %v12472_v3  ;;  %v4537_v35 = vpop.f32.mrf.mxu1  ;;  %v7876_v3 = vor.u32 %v9032_v20, %v7875_v10  ;;  %v7864_v39 = vor.u32 %v9029_v28, %v7863_v26  ;;  %v8103_v40 = vld [vmem:[%s13322_s1 + $0x1070] sm:$0xf]  ;;  %v7540_v20 = vor.u32 %v8948_v4, %v7539_v19  ;;  %v8091_v26 = vld [vmem:[%s13322_s1 + $0x1058] sm:$0xf]  ;;  %v9080_v19 = vld [vmem:[%s13322_s1 + $0x1030] sm:$0xf0] }
 0x202   :  { %4756 = vmatpush.bf16.msrb.mxu2 %v7348_v15  ;;  %v8296_v28 = vor.u32 %v9137_v14, %v8295_v36  ;;  %v7996_v38 = vor.u32 %v9062_v25, %v7995_v22  ;;  %v8163_v4 = vld [vmem:[%s13322_s1 + $0x10e8] sm:$0xf]  ;;  %v9074_v25 = vld [vmem:[%s13322_s1 + $0x1000] sm:$0xf0] }
 0x203   :  { %4769 = vmatpush.bf16.msrb.mxu3 %v7444_v58  ;;  %4731 = vmatmul.bf16.vlgmr.msrb.gmra.mxu0 %v10042_v51  ;;  %v7887_v51 = vld [vmem:[%s13322_s1 + $0xec0] sm:$0xf]  ;;  %v4538_v24 = vadd.f32 %v4537_v35, %v4525_v32  ;;  %v9002_v58 = vld [vmem:[%s13322_s1 + $0xdc0] sm:$0xf0]  ;;  %v9089_v32 = vld [vmem:[%s13322_s1 + $0x1078] sm:$0xf0] }
 0x204   :  { %4775 = vmatpush.bf16.msra.mxu0 %v7624_v42  ;;  %4744 = vmatmul.bf16.vlgmr.msrb.gmra.mxu1 %v10046_v54  ;;  %v8960_v54 = vld [vmem:[%s13322_s1 + $0xc70] sm:$0xf0]  ;;  %v7756_v0 = vor.u32 %v9002_v58, %v7755_v41  ;;  %v9113_v35 = vld [vmem:[%s13322_s1 + $0x1138] sm:$0xf0]  ;;  %v9059_v41 = vld [vmem:[%s13322_s1 + $0xf88] sm:$0xf0] }
 0x205   :  { %4788 = vmatpush.bf16.msra.mxu1 %v7720_v43  ;;  %4757 = vmatmul.bf16.vlgmr.msrb.gmra.mxu2 %v10044_v52  ;;  %v7587_v52 = vld [vmem:[%s13322_s1 + $0xc68] sm:$0xf]  ;;  %v8079_v58 = vld [vmem:[%s13322_s1 + $0x1040] sm:$0xf]  ;;  %v7984_v53 = vor.u32 %v9059_v41, %v7983_v56 }
 0x206   :  { %4801 = vmatpush.bf16.msra.mxu2 %v7816_v8  ;;  %4770 = vmatmul.bf16.vlgmr.msrb.gmra.mxu3 %v10048_v55  ;;  %v7888_v55 = vor.u32 %v9035_v6, %v7887_v51  ;;  %v7588_v21 = vor.u32 %v8960_v54, %v7587_v52  ;;  %v7851_v8 = vld [vmem:[%s13322_s1 + $0xe78] sm:$0xf]  ;;  %v7744_v6 = vor.u32 %v8999_v62, %v7743_v61  ;;  %v8996_v54 = vld [vmem:[%s13322_s1 + $0xd90] sm:$0xf0]  ;;  %v8067_v62 = vld [vmem:[%s13322_s1 + $0x1028] sm:$0xf] }
 0x207   :  { %4814 = vmatpush.bf16.msra.mxu3 %v7912_v47  ;;  %v9056_v61 = vld [vmem:[%s13322_s1 + $0xf70] sm:$0xf0]  ;;  %v7935_v41 = vld [vmem:[%s13322_s1 + $0xf20] sm:$0xf] }
 0x208   :  { %4776 = vmatpush.bf16.msra.mxu0 %v7612_v57  ;;  %v4550_v15 = vpop.f32.mrf.mxu2  ;;  %v4526_v45 = vpop.f32.mrf.mxu0  ;;  %v7647_v57 = vld [vmem:[%s13322_s1 + $0xce0] sm:$0xf] }
 0x209   :  { %4789 = vmatpush.bf16.msra.mxu1 %v7708_v59  ;;  %v4551_v42 = vadd.f32 %v4550_v15, %v4538_v24  ;;  %v4563_v43 = vpop.f32.mrf.mxu3  ;;  %v4539_v47 = vpop.f32.mrf.mxu1  ;;  %v7852_v59 = vor.u32 %v9026_v44, %v7851_v8  ;;  %v8104_v24 = vor.u32 %v9089_v32, %v8103_v40  ;;  %v9083_v8 = vld [vmem:[%s13322_s1 + $0x1048] sm:$0xf0]  ;;  %v8175_v44 = vld [vmem:[%s13322_s1 + $0x1100] sm:$0xf]  ;;  %v9101_v32 = vld [vmem:[%s13322_s1 + $0x10d8] sm:$0xf0] }
 0x20a   :  { %4802 = vmatpush.bf16.msra.mxu2 %v7804_v60  ;;  %v8975_v60 = vld [vmem:[%s13322_s1 + $0xce8] sm:$0xf0] }
 0x20b   :  { %4815 = vmatpush.bf16.msra.mxu3 %v7900_v1  ;;  %v12671_v48 = vadd.f32 %v4563_v43, %v4551_v42  ;;  %v9023_v1 = vld [vmem:[%s13322_s1 + $0xe68] sm:$0xf0]  ;;  %v7648_v51 = vor.u32 %v8975_v60, %v7647_v57  ;;  %v9242_v42 = vld.sshfl [vmem:[#allocation1] sm:$0xff pattern:$0x73625140]  ;;  %v8284_v43 = vor.u32 %v9134_v37, %v8283_v33 }
 0x20c   :  { %4777 = vmatpush.bf16.msra.mxu0 %v7600_v7  ;;  %v7635_v7 = vld [vmem:[%s13322_s1 + $0xcc8] sm:$0xf]  ;;  %v7840_v52 = vor.u32 %v9023_v1, %v7839_v63  ;;  %v9107_v45 = vld [vmem:[%s13322_s1 + $0x1108] sm:$0xf0]  ;;  %v9246_v63 = vld [vmem:[%s13323_s2] sm:$0x7] }
 0x20d   :  { %4790 = vmatpush.bf16.msra.mxu1 %v7696_v9  ;;  %v8972_v9 = vld [vmem:[%s13322_s1 + $0xcd0] sm:$0xf0]  ;;  %v9244_v47 = vld.sshfl [vmem:[#allocation1 + $0x8] sm:$0xff pattern:$0x73625140]  ;;  %v8176_v60 = vor.u32 %v9107_v45, %v8175_v44  ;;  %v806_v1 = vperm.slane %v9246_v63, 2 }
 0x20e   :  { %4803 = vmatpush.bf16.msra.mxu2 %v7792_v12  ;;  %v7731_v12 = vld [vmem:[%s13322_s1 + $0xd88] sm:$0xf]  ;;  %v9122_v33 = vld [vmem:[%s13322_s1 + $0x1180] sm:$0xf0]  ;;  %v9071_v44 = vld [vmem:[%s13322_s1 + $0xfe8] sm:$0xf0] }
 0x20f   :  { %4816 = vmatpush.bf16.msra.mxu3 %v7888_v55  ;;  %v9020_v55 = vld [vmem:[%s13322_s1 + $0xe50] sm:$0xf0]  ;;  %v7971_v57 = vld [vmem:[%s13322_s1 + $0xf68] sm:$0xf]  ;;  %v8127_v45 = vld [vmem:[%s13322_s1 + $0x10a0] sm:$0xf] }
 0x210   :  { %4778 = vmatpush.bf16.msra.mxu0 %v7588_v21  ;;  %v4552_v17 = vpop.f32.mrf.mxu2  ;;  %v8199_v21 = vld [vmem:[%s13322_s1 + $0x1130] sm:$0xf]  ;;  %v7828_v23 = vor.u32 %v9020_v55, %v7827_v16  ;;  %v9053_v55 = vld [vmem:[%s13322_s1 + $0xf58] sm:$0xf0]  ;;  %v9068_v63 = vld [vmem:[%s13322_s1 + $0xfd0] sm:$0xf0] }
 0x211   :  { %4791 = vmatpush.bf16.msra.mxu1 %v7684_v11  ;;  %v4565_v10 = vpop.f32.mrf.mxu3  ;;  %v7636_v11 = vor.u32 %v8972_v9, %v7635_v7  ;;  %v8200_v27 = vor.u32 %v9113_v35, %v8199_v21  ;;  %v9128_v7 = vld [vmem:[%s13322_s1 + $0x11b0] sm:$0xf0]  ;;  %v7972_v9 = vor.u32 %v9056_v61, %v7971_v57  ;;  %v7959_v16 = vld [vmem:[%s13322_s1 + $0xf50] sm:$0xf]  ;;  %v9125_v35 = vld [vmem:[%s13322_s1 + $0x1198] sm:$0xf0] }
 0x212   :  { %4804 = vmatpush.bf16.msra.mxu2 %v7780_v13  ;;  %v7732_v13 = vor.u32 %v8996_v54, %v7731_v12  ;;  %v8055_v17 = vld [vmem:[%s13322_s1 + $0x1010] sm:$0xf]  ;;  %v9077_v10 = vld [vmem:[%s13322_s1 + $0x1018] sm:$0xf0]  ;;  %v7923_v57 = vld [vmem:[%s13322_s1 + $0xf08] sm:$0xf] }
 0x213   :  { %4817 = vmatpush.bf16.msra.mxu3 %v7876_v3  ;;  %v8008_v3 = vor.u32 %v9065_v31, %v8007_v18  ;;  %v8247_v21 = vld [vmem:[%s13322_s1 + $0x1190] sm:$0xf]  ;;  %v8056_v36 = vor.u32 %v9077_v10, %v8055_v17  ;;  %v9143_v10 = vld [vmem:[%s13324_s3 + $0x28] sm:$0xff] }
 0x214   :  { %4779 = vmatpush.bf16.msra.mxu0 %v7576_v29  ;;  %v9086_v29 = vld [vmem:[%s13322_s1 + $0x1060] sm:$0xf0]  ;;  %v8248_v22 = vor.u32 %v9125_v35, %v8247_v21  ;;  %v9152_v17 = vld [vmem:[%s13324_s3 + $0x70] sm:$0xff] }
 0x215   :  { %4792 = vmatpush.bf16.msra.mxu1 %v7672_v30  ;;  %v8187_v30 = vld [vmem:[%s13322_s1 + $0x1118] sm:$0xf]  ;;  %v9150_v35 = vld [vmem:[%s13324_s3 + $0x60] sm:$0xff] }
 0x216   :  { %4805 = vmatpush.bf16.msra.mxu2 %v7768_v34  ;;  %v9110_v34 = vld [vmem:[%s13322_s1 + $0x1120] sm:$0xf0] }
 0x217   :  { %4818 = vmatpush.bf16.msra.mxu3 %v7864_v39  ;;  %v8092_v39 = vor.u32 %v9086_v29, %v8091_v26  ;;  %v8188_v15 = vor.u32 %v9110_v34, %v8187_v30  ;;  %v8139_v26 = vld [vmem:[%s13322_s1 + $0x10b8] sm:$0xf] }
 0x218   :  { %4780 = vmatpush.bf16.msra.mxu0 %v7564_v46  ;;  %v9243_v46 = vld.sshfl [vmem:[#allocation1 + $0x10] sm:$0xff pattern:$0x73625140]  ;;  %v8235_v34 = vld [vmem:[%s13322_s1 + $0x1178] sm:$0xf] }
 0x219   :  { %4793 = vmatpush.bf16.msra.mxu1 %v7660_v49  ;;  %v8271_v49 = vld [vmem:[%s13322_s1 + $0x11c0] sm:$0xf] }
 0x21a   :  { %4806 = vmatpush.bf16.msra.mxu2 %v7756_v0  ;;  %v9131_v0 = vld [vmem:[%s13322_s1 + $0x11c8] sm:$0xf0] }
 0x21b   :  { %4819 = vmatpush.bf16.msra.mxu3 %v7852_v59  ;;  %v8080_v59 = vor.u32 %v9083_v8, %v8079_v58  ;;  %v9047_v58 = vld [vmem:[%s13322_s1 + $0xf28] sm:$0xf0]  ;;  %v8236_v8 = vor.u32 %v9122_v33, %v8235_v34 }
 0x21c   :  { %4781 = vmatpush.bf16.msra.mxu0 %v7552_v2  ;;  %v8272_v2 = vor.u32 %v9131_v0, %v8271_v49  ;;  %v9119_v49 = vld [vmem:[%s13322_s1 + $0x1168] sm:$0xf0]  ;;  %v7936_v0 = vor.u32 %v9047_v58, %v7935_v41 }
 0x21d   :  { %4794 = vmatpush.bf16.msra.mxu1 %v7648_v51  ;;  %v9104_v51 = vld [vmem:[%s13322_s1 + $0x10f0] sm:$0xf0]  ;;  %v9147_v34 = vld [vmem:[%s13324_s3 + $0x48] sm:$0xff] }
 0x21e   :  { %4807 = vmatpush.bf16.msra.mxu2 %v7744_v6  ;;  %v8259_v6 = vld [vmem:[%s13322_s1 + $0x11a8] sm:$0xf]  ;;  %v8164_v54 = vor.u32 %v9104_v51, %v8163_v4  ;;  %v9116_v51 = vld [vmem:[%s13322_s1 + $0x1150] sm:$0xf0] }
 0x21f   :  { %4820 = vmatpush.bf16.msra.mxu3 %v7840_v52  ;;  %v8068_v52 = vor.u32 %v9080_v19, %v8067_v62  ;;  %v8260_v40 = vor.u32 %v9128_v7, %v8259_v6  ;;  %v8211_v4 = vld [vmem:[%s13322_s1 + $0x1148] sm:$0xf] }
 0x220   :  { %4782 = vmatpush.bf16.msra.mxu0 %v7540_v20  ;;  %v4576_v12 = vpop.f32.mrf.mxu0  ;;  %v8151_v20 = vld [vmem:[%s13322_s1 + $0x10d0] sm:$0xf] }
 0x221   :  { %4795 = vmatpush.bf16.msra.mxu1 %v7636_v11  ;;  %v4577_v18 = vadd.f32 %v4576_v12, %v806_v1  ;;  %v4589_v31 = vpop.f32.mrf.mxu1  ;;  %v8152_v14 = vor.u32 %v9101_v32, %v8151_v20  ;;  %v8115_v1 = vld [vmem:[%s13322_s1 + $0x1088] sm:$0xf]  ;;  %v8212_v12 = vor.u32 %v9116_v51, %v8211_v4  ;;  %v9142_v32 = vld [vmem:[%s13324_s3 + $0x20] sm:$0xff] }
 0x222   :  { %4808 = vmatpush.bf16.msra.mxu2 %v7732_v13  ;;  %v7960_v13 = vor.u32 %v9053_v55, %v7959_v16  ;;  %v9144_v16 = vld [vmem:[%s13324_s3 + $0x30] sm:$0xff]  ;;  %v9247_v55 = vld.sshfl [vmem:[#allocation1 + $0x20] sm:$0xff pattern:$0x73625140]  ;;  %v9151_v20 = vld [vmem:[%s13324_s3 + $0x68] sm:$0xff] }
 0x223   :  { %4821 = vmatpush.bf16.msra.mxu3 %v7828_v23  ;;  %4783 = vmatmul.bf16.vlgmr.msra.gmra.mxu0 %v9242_v42  ;;  %v4590_v11 = vadd.f32 %v4589_v31, %v4577_v18  ;;  %v7947_v23 = vld [vmem:[%s13322_s1 + $0xf38] sm:$0xf]  ;;  %v8031_v42 = vld [vmem:[%s13322_s1 + $0xfe0] sm:$0xf]  ;;  %v9155_v4 = vld [vmem:[%s13324_s3 + $0x88] sm:$0xff] }
 0x224   :  { %4827 = vmatpush.bf16.msrb.mxu0 %v8008_v3  ;;  %4796 = vmatmul.bf16.vlgmr.msra.gmra.mxu1 %v9244_v47  ;;  %v9050_v3 = vld [vmem:[%s13322_s1 + $0xf40] sm:$0xf0]  ;;  %v8223_v47 = vld [vmem:[%s13322_s1 + $0x1160] sm:$0xf] }
 0x225   :  { %4840 = vmatpush.bf16.msrb.mxu1 %v8104_v24  ;;  %4809 = vmatmul.bf16.vlgmr.msra.gmra.mxu2 %v9243_v46  ;;  %v8043_v24 = vld [vmem:[%s13322_s1 + $0xff8] sm:$0xf]  ;;  %v7948_v37 = vor.u32 %v9050_v3, %v7947_v23  ;;  %v9095_v46 = vld [vmem:[%s13322_s1 + $0x10a8] sm:$0xf0]  ;;  %v8224_v62 = vor.u32 %v9119_v49, %v8223_v47 }
 0x226   :  { %4853 = vmatpush.bf16.msrb.mxu2 %v8200_v27  ;;  %4822 = vmatmul.bf16.vlgmr.msra.gmra.mxu3 %v9245_v50  ;;  %v8032_v50 = vor.u32 %v9071_v44, %v8031_v42  ;;  %v9248_v18 = vld.sshfl [vmem:[#allocation1 + $0x28] sm:$0xff pattern:$0x73625140]  ;;  %v9249_v31 = vld.sshfl [vmem:[#allocation1 + $0x30] sm:$0xff pattern:$0x73625140] }
 0x227   :  { %4866 = vmatpush.bf16.msrb.mxu3 %v8296_v28  ;;  %v9098_v28 = vld [vmem:[%s13322_s1 + $0x10c0] sm:$0xf0]  ;;  %v9149_v23 = vld [vmem:[%s13324_s3 + $0x58] sm:$0xff] }
 0x228   :  { %4828 = vmatpush.bf16.msrb.mxu0 %v7996_v38  ;;  %v4602_v27 = vpop.f32.mrf.mxu2  ;;  %v8140_v56 = vor.u32 %v9098_v28, %v8139_v26  ;;  %v9148_v28 = vld [vmem:[%s13324_s3 + $0x50] sm:$0xff] }
 0x229   :  { %4841 = vmatpush.bf16.msrb.mxu1 %v8092_v39  ;;  %v4603_v29 = vadd.f32 %v4602_v27, %v4590_v11  ;;  %v4615_v30 = vpop.f32.mrf.mxu3  ;;  %v4578_v39 = vpop.f32.mrf.mxu0 }
 0x22a   :  { %4854 = vmatpush.bf16.msrb.mxu2 %v8188_v15  ;;  %v8044_v15 = vor.u32 %v9074_v25, %v8043_v24  ;;  %v4879_v39 = vmax.f32 %v11483_v5, 0.0 }
 0x22b   :  { %4867 = vmatpush.bf16.msrb.mxu3 %v8284_v43  ;;  %v12868_v38 = vadd.f32 %v4615_v30, %v4603_v29  ;;  %v4591_v43 = vpop.f32.mrf.mxu1  ;;  %v9139_v30 = vld [vmem:[%s13324_s3 + $0x8] sm:$0xff] }
 0x22c   :  { %4829 = vmatpush.bf16.msrb.mxu0 %v7984_v53  ;;  %v8128_v53 = vor.u32 %v9095_v46, %v8127_v45  ;;  %v4882_v41 = vpack.c.bf16 %v4879_v39, %v4879_v39 }
 0x22d   :  { %4842 = vmatpush.bf16.msrb.mxu1 %v8080_v59  ;;  %v9044_v59 = vld [vmem:[%s13322_s1 + $0xf10] sm:$0xf0] }
 0x22e   :  { %4855 = vmatpush.bf16.msrb.mxu2 %v8176_v60  ;;  %v8019_v60 = vld [vmem:[%s13322_s1 + $0xfc8] sm:$0xf]  ;;  %v7924_v6 = vor.u32 %v9044_v59, %v7923_v57 }
 0x22f   :  { %4868 = vmatpush.bf16.msrb.mxu3 %v8272_v2  ;;  %v9092_v2 = vld [vmem:[%s13322_s1 + $0x1090] sm:$0xf0]  ;;  %v8020_v7 = vor.u32 %v9068_v63, %v8019_v60  ;;  %s5984_s1 = sshll.u32 %s13328_s7, 4  ;;  %s5985_s1 = int_to_ptr.hbm [resolvable:$true] %s5984_s1 }
 0x230   :  { %4830 = vmatpush.bf16.msrb.mxu0 %v7972_v9  ;;  %v4604_v61 = vpop.f32.mrf.mxu2  ;;  %v8116_v9 = vor.u32 %v9092_v2, %v8115_v1 }
 0x231   :  { %4843 = vmatpush.bf16.msrb.mxu1 %v8068_v52  ;;  %v4617_v19 = vpop.f32.mrf.mxu3  ;;  %v9145_v52 = vld [vmem:[%s13324_s3 + $0x38] sm:$0xff] }
 0x232   :  { %4856 = vmatpush.bf16.msrb.mxu2 %v8164_v54  ;;  %v9153_v54 = vld [vmem:[%s13324_s3 + $0x78] sm:$0xff] }
 0x233   :  { %4869 = vmatpush.bf16.msrb.mxu3 %v8260_v40  ;;  %v9250_v40 = vld.sshfl [vmem:[#allocation1 + $0x38] sm:$0xff pattern:$0x73625140] }
 0x234   :  { %4831 = vmatpush.bf16.msrb.mxu0 %v7960_v13 }
 0x235   :  { %4844 = vmatpush.bf16.msrb.mxu1 %v8056_v36 }
 0x236   :  { %4857 = vmatpush.bf16.msrb.mxu2 %v8152_v14  ;;  %v9141_v14 = vld [vmem:[%s13324_s3 + $0x18] sm:$0xff] }
 0x237   :  { %4870 = vmatpush.bf16.msrb.mxu3 %v8248_v22  ;;  %v9140_v22 = vld [vmem:[%s13324_s3 + $0x10] sm:$0xff] }
 0x238   :  { %4832 = vmatpush.bf16.msrb.mxu0 %v7948_v37 }
 0x239   :  { %4845 = vmatpush.bf16.msrb.mxu1 %v8044_v15  ;;  %v9146_v15 = vld [vmem:[%s13324_s3 + $0x40] sm:$0xff] }
 0x23a   :  { %4858 = vmatpush.bf16.msrb.mxu2 %v8140_v56  ;;  %v4880_v56 = vmax.f32 %v12671_v48, 0.0 }
 0x23b   :  { %4871 = vmatpush.bf16.msrb.mxu3 %v8236_v8 }
 0x23c   :  { %4833 = vmatpush.bf16.msrb.mxu0 %v7936_v0  ;;  %v4883_v58 = vpack.c.bf16 %v4880_v56, %v4880_v56 }
 0x23d   :  { %4846 = vmatpush.bf16.msrb.mxu1 %v8032_v50 }
 0x23e   :  { %4859 = vmatpush.bf16.msrb.mxu2 %v8128_v53 }
 0x23f   :  { %4872 = vmatpush.bf16.msrb.mxu3 %v8224_v62 }
 0x240   :  { %4834 = vmatpush.bf16.msrb.mxu0 %v7924_v6  ;;  %v4628_v21 = vpop.f32.mrf.mxu0 }
 0x241   :  { %4847 = vmatpush.bf16.msrb.mxu1 %v8020_v7  ;;  %v4629_v11 = vadd.f32 %v4628_v21, %v12868_v38  ;;  %v4641_v13 = vpop.f32.mrf.mxu1  ;;  %v9138_v38 = vld [vmem:[%s13324_s3] sm:$0xff] }
 0x242   :  { %4860 = vmatpush.bf16.msrb.mxu2 %v8116_v9 }
 0x243   :  { %4873 = vmatpush.bf16.msrb.mxu3 %v8212_v12  ;;  %4835 = vmatmul.bf16.vlgmr.msrb.gmra.mxu0 %v9247_v55  ;;  %v4642_v36 = vadd.f32 %v4641_v13, %v4629_v11 }
 0x244   :  { %5035 = vmatpush.bf16.msra.mxu0 %v9145_v52  ;;  %4848 = vmatmul.bf16.vlgmr.msrb.gmra.mxu1 %v9248_v18  ;;  %v9154_v52 = vld [vmem:[%s13324_s3 + $0x80] sm:$0xff] }
 0x245   :  { %5048 = vmatpush.bf16.msra.mxu1 %v9153_v54  ;;  %4861 = vmatmul.bf16.vlgmr.msrb.gmra.mxu2 %v9249_v31 }
 0x246   :  { %4874 = vmatmul.bf16.vlgmr.msrb.gmra.mxu3 %v9250_v40  ;;  %5067 = vmatpush.bf16.msra.mxu2 %v9155_v4  ;;  %v5076_v4 = vld [vmem:[%s13325_s4] sm:$0xf] }
 0x248   :  { %5036 = vmatpush.bf16.msra.mxu0 %v9144_v16  ;;  %v4654_v3 = vpop.f32.mrf.mxu2  ;;  %v4630_v26 = vpop.f32.mrf.mxu0 }
 0x249   :  { %5049 = vmatpush.bf16.msra.mxu1 %v9152_v17  ;;  %v4655_v24 = vadd.f32 %v4654_v3, %v4642_v36  ;;  %v4667_v27 = vpop.f32.mrf.mxu3  ;;  %v4643_v29 = vpop.f32.mrf.mxu1  ;;  %v8396_v36 = vld [vmem:[%s13326_s5 + $0x48] sm:$0xf] }
 0x24a   :  { %5068 = vmatpush.bf16.msra.mxu2 %v9154_v52 }
 0x24b   :  { %v4668_v25 = vadd.f32 %v4667_v27, %v4655_v24 }
 0x24c   :  { %5037 = vmatpush.bf16.msra.mxu0 %v9143_v10 }
 0x24d   :  { %5050 = vmatpush.bf16.msra.mxu1 %v9151_v20 }
 0x250   :  { %5038 = vmatpush.bf16.msra.mxu0 %v9142_v32  ;;  %v4656_v33 = vpop.f32.mrf.mxu2 }
 0x251   :  { %5051 = vmatpush.bf16.msra.mxu1 %v9150_v35  ;;  %v4669_v37 = vpop.f32.mrf.mxu3 }
 0x254   :  { %5039 = vmatpush.bf16.msra.mxu0 %v9141_v14  ;;  %v9163_v14 = vld [vmem:[%s13326_s5 + $0x50] sm:$0xf0] }
 0x255   :  { %5052 = vmatpush.bf16.msra.mxu1 %v9149_v23  ;;  %v9162_v23 = vld [vmem:[%s13326_s5 + $0x4c] sm:$0xf] }
 0x258   :  { %5040 = vmatpush.bf16.msra.mxu0 %v9140_v22  ;;  %v8397_v22 = vor.u32 %v9163_v14, %v8396_v36 }
 0x259   :  { %5053 = vmatpush.bf16.msra.mxu1 %v9148_v28 }
 0x25a   :  { %5141 = vmatpush.bf16.msra.mxu3 %v8397_v22 }
 0x25c   :  { %5041 = vmatpush.bf16.msra.mxu0 %v9139_v30 }
 0x25d   :  { %5054 = vmatpush.bf16.msra.mxu1 %v9147_v34 }
 0x260   :  { %5042 = vmatpush.bf16.msra.mxu0 %v9138_v38  ;;  %v4680_v42 = vpop.f32.mrf.mxu0  ;;  %v9197_v38 = vld [vmem:[%s13325_s4 + $0x4] ss:$0 sm:$0xff] }
 0x261   :  { %5055 = vmatpush.bf16.msra.mxu1 %v9146_v15  ;;  %v4681_v43 = vadd.f32 %v4680_v42, %v4668_v25  ;;  %v4693_v8 = vpop.f32.mrf.mxu1  ;;  %v8398_v25 = vld [vmem:[%s13326_s5 + $0x54] sm:$0xf0] }
 0x262   :  { %v8401_v28 = vor.u32 %v9162_v23, %v8398_v25 }
 0x263   :  { %5043 = vmatmul.bf16.vlgmr.msra.gmra.mxu0 %v4882_v41  ;;  %v4694_v44 = vadd.f32 %v4693_v8, %v4681_v43  ;;  %v8388_v43 = vld [vmem:[%s13326_s5 + $0x30] sm:$0xf]  ;;  %v9161_v8 = vld [vmem:[%s13326_s5 + $0x38] sm:$0xf0] }
 0x264   :  { %5056 = vmatmul.bf16.vlgmr.msra.gmra.mxu1 %v4883_v58  ;;  %5154 = vmatpush.bf16.msrb.mxu2 %v8401_v28 }
 0x268   :  { %v4706_v45 = vpop.f32.mrf.mxu2  ;;  %v4682_v47 = vpop.f32.mrf.mxu0 }
 0x269   :  { %v4707_v46 = vadd.f32 %v4706_v45, %v4694_v44  ;;  %v4719_v5 = vpop.f32.mrf.mxu3  ;;  %v4695_v49 = vpop.f32.mrf.mxu1  ;;  %v9160_v44 = vld [vmem:[%s13326_s5 + $0x34] sm:$0xf]  ;;  %v8389_v45 = vor.u32 %v9161_v8, %v8388_v43  ;;  %v8380_v47 = vld [vmem:[%s13326_s5 + $0x18] sm:$0xf] }
 0x26a   :  { %v9159_v49 = vld [vmem:[%s13326_s5 + $0x20] sm:$0xf0]  ;;  %v9167_v43 = vld [vmem:[%s13326_s5 + $0x54] sm:$0xf0] }
 0x26b   :  { %v4720_v0 = vadd.f32 %v4719_v5, %v4707_v46  ;;  %v8390_v46 = vld [vmem:[%s13326_s5 + $0x3c] sm:$0xf0]  ;;  %5142 = vmatpush.bf16.msra.mxu3 %v8389_v45  ;;  %v9165_v45 = vld [vmem:[%s13326_s5 + $0x24] sm:$0xf0] }
 0x26c   :  { %v8393_v5 = vor.u32 %v9160_v44, %v8390_v46  ;;  %v8414_v44 = vld [vmem:[%s13326_s5 + $0x1c] sm:$0xf] }
 0x26d   :  { %v8415_v46 = vor.u32 %v9165_v45, %v8414_v44 }
 0x26e   :  { %5155 = vmatpush.bf16.msrb.mxu2 %v8393_v5 }
 0x270   :  { %v4708_v50 = vpop.f32.mrf.mxu2 }
 0x271   :  { %v4721_v53 = vpop.f32.mrf.mxu3  ;;  %v8381_v50 = vor.u32 %v9159_v49, %v8380_v47 }
 0x272   :  { %v8382_v53 = vld [vmem:[%s13326_s5 + $0x24] sm:$0xf0] }
 0x273   :  { %5143 = vmatpush.bf16.msra.mxu3 %v8381_v50 }
 0x280   :  { %v4732_v57 = vpop.f32.mrf.mxu0 }
 0x281   :  { %v4745_v48 = vpop.f32.mrf.mxu1  ;;  %v4733_v51 = vadd.f32 %v4732_v57, %v4720_v0  ;;  %v9158_v0 = vld [vmem:[%s13326_s5 + $0x1c] sm:$0xf] }
 0x282   :  { %v8385_v57 = vor.u32 %v9158_v0, %v8382_v53 }
 0x283   :  { %v4746_v54 = vadd.f32 %v4745_v48, %v4733_v51  ;;  %v8372_v48 = vld [vmem:[%s13326_s5] sm:$0xf] }
 0x284   :  { %5156 = vmatpush.bf16.msrb.mxu2 %v8385_v57 }
 0x288   :  { %v4758_v59 = vpop.f32.mrf.mxu2  ;;  %v4734_v61 = vpop.f32.mrf.mxu0 }
 0x289   :  { %v4771_v60 = vpop.f32.mrf.mxu3  ;;  %v4747_v62 = vpop.f32.mrf.mxu1  ;;  %v4759_v16 = vadd.f32 %v4758_v59, %v4746_v54  ;;  %v9157_v59 = vld [vmem:[%s13326_s5 + $0x8] sm:$0xf0] }
 0x28a   :  { %v8373_v61 = vor.u32 %v9157_v59, %v8372_v48  ;;  %v8374_v62 = vld [vmem:[%s13326_s5 + $0xc] sm:$0xf0]  ;;  %v8418_v59 = vld [vmem:[%s13326_s5 + $0x34] sm:$0xf] }
 0x28b   :  { %v4772_v18 = vadd.f32 %v4771_v60, %v4759_v16  ;;  %v9156_v60 = vld [vmem:[%s13326_s5 + $0x4] sm:$0xf] }
 0x28c   :  { %5144 = vmatpush.bf16.msra.mxu3 %v8373_v61 }
 0x290   :  { %v4760_v63 = vpop.f32.mrf.mxu2 }
 0x291   :  { %v4773_v1 = vpop.f32.mrf.mxu3  ;;  %v8377_v63 = vor.u32 %v9156_v60, %v8374_v62  ;;  %v9166_v60 = vld [vmem:[%s13326_s5 + $0x3c] sm:$0xf0] }
 0x292   :  { %v8419_v62 = vor.u32 %v9166_v60, %v8418_v59  ;;  %v9200_v59 = vld [vmem:[%s13327_s6 + $0x3] ss:$0 sm:$0xff] }
 0x293   :  { %5157 = vmatpush.bf16.msrb.mxu2 %v8377_v63 }
 0x2a0   :  { %v4784_v2 = vpop.f32.mrf.mxu0 }
 0x2a1   :  { %v4797_v19 = vpop.f32.mrf.mxu1  ;;  %v4785_v31 = vadd.f32 %v4784_v2, %v4772_v18 }
 0x2a3   :  { %v4798_v40 = vadd.f32 %v4797_v19, %v4785_v31 }
 0x2a8   :  { %v4810_v6 = vpop.f32.mrf.mxu2  ;;  %v4786_v9 = vpop.f32.mrf.mxu0 }
 0x2a9   :  { %v4823_v7 = vpop.f32.mrf.mxu3  ;;  %v4799_v12 = vpop.f32.mrf.mxu1  ;;  %v4811_v10 = vadd.f32 %v4810_v6, %v4798_v40 }
 0x2aa   :  { %v5087_v12 = vld [vmem:[%s13327_s6] sm:$0x3] }
 0x2ab   :  { %v4824_v20 = vadd.f32 %v4823_v7, %v4811_v10  ;;  %v5089_v52 = vperm.slane %v5087_v12, 0  ;;  %v5090_v54 = vperm.slane %v5087_v12, 1 }
 0x2b0   :  { %v4812_v55 = vpop.f32.mrf.mxu2 }
 0x2b1   :  { %v4825_v17 = vpop.f32.mrf.mxu3 }
 0x2c0   :  { %v4836_v32 = vpop.f32.mrf.mxu0 }
 0x2c1   :  { %v4849_v21 = vpop.f32.mrf.mxu1  ;;  %v4837_v35 = vadd.f32 %v4836_v32, %v4824_v20 }
 0x2c3   :  { %v4850_v11 = vadd.f32 %v4849_v21, %v4837_v35 }
 0x2c8   :  { %v4862_v13 = vpop.f32.mrf.mxu2  ;;  %v4838_v27 = vpop.f32.mrf.mxu0 }
 0x2c9   :  { %v4863_v3 = vadd.f32 %v4862_v13, %v4850_v11  ;;  %v4875_v24 = vpop.f32.mrf.mxu3  ;;  %v4851_v26 = vpop.f32.mrf.mxu1 }
 0x2cb   :  { %v4876_v29 = vadd.f32 %v4875_v24, %v4863_v3 }
 0x2cd   :  { %v4881_v30 = vmax.f32 %v4876_v29, 0.0 }
 0x2cf   :  { %v4884_v34 = vpack.c.bf16 %v4881_v30, %v4881_v30 }
 0x2d0   :  { %v4864_v33 = vpop.f32.mrf.mxu2 }
 0x2d1   :  { %v4877_v37 = vpop.f32.mrf.mxu3  ;;  %8369 = vmatmul.msk.bf16.vlgmr.msra.gmra.mxu2 %vm5031_vm0, %v4884_v34 }
 0x2e0   :  { %v5044_v39 = vpop.f32.mrf.mxu0 }
 0x2e1   :  { %v5045_v15 = vadd.f32 %v9197_v38, %v5044_v39  ;;  %v5057_v56 = vpop.f32.mrf.mxu1 }
 0x2e3   :  { %v5058_v41 = vadd.f32 %v5057_v56, %v5045_v15 }
 0x2e8   :  { %v5046_v58 = vpop.f32.mrf.mxu0 }
 0x2e9   :  { %v5059_v42 = vpop.f32.mrf.mxu1 }
 0x2ea   :  { %v8422_v42 = vld [vmem:[%s13326_s5 + $0x4c] sm:$0xf] }
 0x2eb   :  { %v8423_v8 = vor.u32 %v9167_v43, %v8422_v42 }
 0x354   :  { %v5070_v1 = vpop.f32.mrf.mxu2 }
 0x355   :  { %v5071_v2 = vadd.f32 %v5070_v1, %v5058_v41 }
 0x357   :  { %v5074_v19 = vmax.f32 %v5071_v2, 0.0  ;;  %v8410_v2 = vld [vmem:[%s13326_s5 + $0x4] sm:$0xf] }
 0x359   :  { %v5075_v51 = vmul.f32 8.0, %v5074_v19  ;;  %v9164_v19 = vld [vmem:[%s13326_s5 + $0xc] sm:$0xf0] }
 0x35b   :  { %v13030_v6 = vadd.f32 %v5076_v4, %v5075_v51  ;;  %v8411_v4 = vor.u32 %v9164_v19, %v8410_v2 }
 0x35c   :  { %v5072_v7 = vpop.f32.mrf.mxu2 }
 0x35d   :  { %v5078_v9 = vpack.c.bf16 %v13030_v6, %v13030_v6 }
 0x35f   :  { %8402 = vmatmul.msk.bf16.vlgmr.msra.gmra.mxu3 %vm5133_vm1, %v5078_v9  ;;  %8403 = vmatmul.msk.bf16.vlgmr.msrb.gmra.mxu2 %vm5133_vm1, %v5078_v9 }
 0x3e2   :  { %v5146_v16 = vpop.f32.mrf.mxu3  ;;  %v5159_v55 = vpop.f32.mrf.mxu2 }
 0x3e3   :  { %v5147_v17 = vadd.f32 %v5146_v16, %v5089_v52  ;;  %v5160_v18 = vadd.f32 %v5159_v55, %v5090_v54  ;;  %v9198_v52 = vld [vmem:[%s13327_s6 + $0x1] ss:$0 sm:$0xff] }
 0x3e5   :  { %v5163_v31 = vpack.c.bf16 %v5147_v17, %v5147_v17  ;;  %v5164_v40 = vpack.c.bf16 %v5160_v18, %v5160_v18 }
 0x3e7   :  { %v5207_v10 = vsel %vm5205_vm2, %v5164_v40, 0  ;;  %5166 = vrot.lane.b32.xlu1 %v5163_v31, %s9277_s30  ;;  %5224 = vrot.lane.b32.xlu0 %v5163_v31, %s9278_s8 }
 0x3e8   :  { %5216 = vmatpush.bf16.msrb.mxu0 %v5207_v10 }
 0x3ea   :  { %v5148_v20 = vpop.f32.mrf.mxu3  ;;  %v5161_v32 = vpop.f32.mrf.mxu2 }
 0x3ef   :  { %5222 = vrot.lane.b32.xlu0 %v5163_v31, %s9279_s9 }
 0x3f7   :  { %5259 = vrot.lane.b32.xlu0 %v5164_v40, %s9279_s9 }
 0x3ff   :  { %5323 = vrot.lane.b32.xlu0 %v8423_v8, %s9277_s30 }
 0x407   :  { %5319 = vrot.lane.b32.xlu0 %v8415_v46, %s9277_s30 }
 0x459   :  { %v5167_v21 = vpop.permute.xlu1 %5166  ;;  %v5225_v35 = vpop.permute.xlu0 %5224 }
 0x45a   :  { %v5172_v11 = vsel %vm5031_vm0, %v5167_v21, 0  ;;  %v5230_v13 = vsel %vm5031_vm0, %v5225_v35, 0  ;;  %v9280_v21 = vmov 64.0   ;;  %v9199_v35 = vld [vmem:[%s13327_s6 + $0x2] ss:$0 sm:$0xff] }
 0x45b   :  { %5181 = vmatpush.bf16.xpose.msrb.mxu3 %v5172_v11  ;;  %5239 = vmatpush.bf16.xpose.msrb.mxu1 %v5230_v13 }
 0x461   :  { %v5223_v36 = vpop.permute.xlu0 %5222 }
 0x462   :  { %8404 = vmatmul.msk.bf16.vlgmr.msrb.gmra.mxu3 %vm5031_vm0, %v5163_v31  ;;  %8406 = vmatmul.msk.bf16.vlgmr.msrb.gmra.mxu1 %vm5031_vm0, %v5223_v36 }
 0x469   :  { %v5260_v14 = vpop.permute.xlu0 %5259 }
 0x46a   :  { %v5265_v23 = vsel %vm5205_vm2, %v5260_v14, 0 }
 0x46b   :  { %5274 = vmatpush.bf16.msra.mxu2 %v5265_v23 }
 0x471   :  { %v5324_v61 = vpop.permute.xlu0 %5323 }
 0x472   :  { %5339 = vmatpush.bf16.msra.mxu3 %v5324_v61 }
 0x479   :  { %v5320_v12 = vpop.permute.xlu0 %5319 }
 0x4df   :  { %v5241_v3 = vpop.f32.mrf.mxu1 }
 0x4e0   :  { %v5245_v24 = vmul.f32 0.17677669, %v5241_v3 }
 0x4e2   :  { %v5246_v27 = vsel %vm5188_vm3, %v5245_v24, -inf }
 0x4e3   :  { %5247 = vmax.xlane.f32.xlu1 %v5246_v27 }
 0x4e5   :  { %v5183_v22 = vpop.f32.mrf.mxu3 }
 0x4e6   :  { %v5187_v25 = vmul.f32 0.17677669, %v5183_v22 }
 0x4e7   :  { %v5243_v26 = vpop.f32.mrf.mxu1 }
 0x4e8   :  { %v5189_v28 = vsel %vm5188_vm3, %v5187_v25, -inf  ;;  %v8439_v26 = vld [vmem:[%s13326_s5 + $0x50] sm:$0xf] }
 0x4e9   :  { %5190 = vmax.xlane.f32.xlu2 %v5189_v28  ;;  %v9171_v28 = vld [vmem:[%s13326_s5 + $0x58] sm:$0xf0] }
 0x4ed   :  { %v5185_v29 = vpop.f32.mrf.mxu3 }
 0x4ee   :  { %v8440_v29 = vor.u32 %v9171_v28, %v8439_v26  ;;  %v9174_v26 = vld [vmem:[%s13326_s5 + $0x7c] sm:$0xf]  ;;  %v8464_v28 = vld [vmem:[%s13326_s5 + $0x84] sm:$0xf0] }
 0x4f0   :  { %5432 = vmatpush.bf16.msra.mxu0 %v8440_v29 }
 0x556   :  { %v5248_v30 = vpop.xlane.xlu1 %5247 }
 0x557   :  { %v5249_v34 = vsub.f32 %v5245_v24, %v5248_v30  ;;  %v8435_v30 = vld [vmem:[%s13326_s5 + $0x38] sm:$0xf] }
 0x559   :  { %v5250_v33 = vmul.f32 1.442695, %v5249_v34  ;;  %v9170_v34 = vld [vmem:[%s13326_s5 + $0x40] sm:$0xf0] }
 0x55b   :  { %9207 = vpow2.f32 %v5250_v33  ;;  %v8431_v33 = vld [vmem:[%s13326_s5 + $0x20] sm:$0xf] }
 0x55c   :  { %v5191_v37 = vpop.xlane.xlu2 %5190 }
 0x55d   :  { %v5192_v38 = vsub.f32 %v5187_v25, %v5191_v37  ;;  %v8436_v37 = vor.u32 %v9170_v34, %v8435_v30  ;;  %v8467_v30 = vor.u32 %v9174_v26, %v8464_v28  ;;  %v8454_v34 = vld [vmem:[%s13326_s5 + $0x60] sm:$0xf] }
 0x55f   :  { %v5193_v39 = vmul.f32 1.442695, %v5192_v38  ;;  %v9169_v38 = vld [vmem:[%s13326_s5 + $0x28] sm:$0xf0]  ;;  %5433 = vmatpush.bf16.msra.mxu0 %v8436_v37 }
 0x561   :  { %v9208_v15 = vpop.eup %9207  ;;  %9209 = vpow2.f32 %v5193_v39  ;;  %v8432_v39 = vor.u32 %v9169_v38, %v8431_v33  ;;  %v9173_v33 = vld [vmem:[%s13326_s5 + $0x68] sm:$0xf0] }
 0x562   :  { %v5252_v56 = vsel %vm5188_vm3, %v9208_v15, 0.0  ;;  %v8455_v38 = vor.u32 %v9173_v33, %v8454_v34 }
 0x563   :  { %5253 = vadd.xlane.f32.xlu2 %v5252_v56  ;;  %5434 = vmatpush.bf16.msra.mxu0 %v8432_v39  ;;  %v9168_v56 = vld [vmem:[%s13326_s5 + $0x10] sm:$0xf0] }
 0x567   :  { %v9210_v41 = vpop.eup %9209 }
 0x568   :  { %v5195_v58 = vsel %vm5188_vm3, %v9210_v41, 0.0 }
 0x56b   :  { %5196 = vadd.xlane.f32.xlu2 %v5195_v58 }
 0x583   :  { %5321 = vrot.lane.b32.xlu2 %v8419_v62, %s9277_s30 }
 0x58b   :  { %5329 = vrot.lane.b32.xlu2 %v9198_v52, %s9277_s30 }
 0x593   :  { %5384 = vrot.lane.b32.xlu2 %v9199_v35, %s9277_s30 }
 0x59b   :  { %5447 = vrot.lane.b32.xlu2 %v8436_v37, %s9277_s30  ;;  %v9172_v37 = vld [vmem:[%s13326_s5 + $0x64] sm:$0xf] }
 0x5a3   :  { %5445 = vrot.lane.b32.xlu2 %v8432_v39, %s9277_s30  ;;  %v8456_v39 = vld [vmem:[%s13326_s5 + $0x6c] sm:$0xf0] }
 0x5d6   :  { %v5254_v5 = vpop.xlane.xlu2 %5253 }
 0x5d7   :  { %9211 = vrcp.f32 %v5254_v5 }
 0x5dd   :  { %v9212_v47 = vpop.eup %9211 }
 0x5de   :  { %v5256_v49 = vmul.f32 %v9212_v47, %v9208_v15  ;;  %v5197_v0 = vpop.xlane.xlu2 %5196  ;;  %v8427_v15 = vld [vmem:[%s13326_s5 + $0x8] sm:$0xf] }
 0x5df   :  { %9213 = vrcp.f32 %v5197_v0 }
 0x5e0   :  { %v5257_v50 = vpack.c.bf16 %v5256_v49, %v5256_v49  ;;  %9215 = vrcp.f32 %v9280_v21  ;;  %v9178_v21 = vld [vmem:[%s13326_s5 + $0xac] sm:$0xf] }
 0x5e2   :  { %8407 = vmatmul.msk.bf16.vlgmr.msra.gmra.mxu2 %vm5201_vm4, %v5257_v50 }
 0x5e5   :  { %v9214_v53 = vpop.eup %9213 }
 0x5e6   :  { %v5199_v57 = vmul.f32 %v9214_v53, %v9210_v41  ;;  %v5322_v9 = vpop.permute.xlu2 %5321  ;;  %v9216_v11 = vpop.eup %9215  ;;  %v8428_v41 = vor.u32 %v9168_v56, %v8427_v15  ;;  %v8459_v15 = vor.u32 %v9172_v37, %v8456_v39  ;;  %v9183_v39 = vld [vmem:[%s13326_s5 + $0xb4] sm:$0xf0] }
 0x5e7   :  { %5340 = vmatpush.bf16.msra.mxu3 %v5322_v9  ;;  %v5355_v13 = vmul.f32 64.0, %v9216_v11  ;;  %vm5359_vm6 = vweird.f32 %v9216_v11 }
 0x5e8   :  { %v5200_v48 = vpack.c.bf16 %v5199_v57, %v5199_v57  ;;  %5435 = vmatpush.bf16.msra.mxu0 %v8428_v41  ;;  %5443 = vrot.lane.b32.xlu2 %v8428_v41, %s9277_s30 }
 0x5e9   :  { %v5356_v36 = vsub.f32 1.0, %v5355_v13 }
 0x5ea   :  { %8405 = vmatmul.msk.bf16.vlgmr.msrb.gmra.mxu0 %vm5201_vm4, %v5200_v48 }
 0x5eb   :  { %5341 = vmatpush.bf16.msra.mxu3 %v5320_v12  ;;  %v5357_v14 = vmul.f32 %v9216_v11, %v5356_v36  ;;  %v8470_v36 = vld [vmem:[%s13326_s5 + $0x90] sm:$0xf] }
 0x5ed   :  { %v5358_v23 = vadd.f32 %v9216_v11, %v5357_v14  ;;  %v9177_v14 = vld [vmem:[%s13326_s5 + $0x98] sm:$0xf0] }
 0x5ee   :  { %v5330_v18 = vpop.permute.xlu2 %5329 }
 0x5ef   :  { %v13096_v3 = vsel %vm5359_vm6, %v9216_v11, %v5358_v23  ;;  %v8480_v11 = vld [vmem:[%s13326_s5 + $0xb4] sm:$0xf0]  ;;  %v9176_v23 = vld [vmem:[%s13326_s5 + $0x94] sm:$0xf] }
 0x5f0   :  { %v8483_v13 = vor.u32 %v9178_v21, %v8480_v11 }
 0x5f6   :  { %v5385_v50 = vpop.permute.xlu2 %5384 }
 0x5fe   :  { %v5448_v60 = vpop.permute.xlu2 %5447 }
 0x606   :  { %v5446_v62 = vpop.permute.xlu2 %5445 }
 0x665   :  { %v5276_v63 = vpop.f32.mrf.mxu2 }
 0x666   :  { %5281 = vrot.lane.b32.xlu0 %v5276_v63, %s9278_s8  ;;  %v5444_v63 = vpop.permute.xlu2 %5443 }
 0x667   :  { %v5218_v1 = vpop.f32.mrf.mxu0 }
 0x66d   :  { %v5278_v51 = vpop.f32.mrf.mxu2 }
 0x66e   :  { %5317 = vrot.lane.b32.xlu0 %v8411_v4, %s9277_s30 }
 0x66f   :  { %v5220_v7 = vpop.f32.mrf.mxu0 }
 0x6d8   :  { %v5282_v54 = vpop.permute.xlu0 %5281 }
 0x6d9   :  { %v5284_v16 = vsel %vm5031_vm0, %v5218_v1, %v5282_v54 }
 0x6da   :  { %v5285_v17 = vpack.c.bf16 %v5284_v16, %v5284_v16 }
 0x6e0   :  { %v5318_v55 = vpop.permute.xlu0 %5317 }
 0x6e1   :  { %5342 = vmatpush.bf16.msra.mxu3 %v5318_v55  ;;  %v9201_v55 = vld [vmem:[%s13327_s6 + $0x4] ss:$0 sm:$0xff] }
 0x6e4   :  { %8424 = vmatmul.msk.bf16.vlgmr.msra.gmra.mxu3 %vm5133_vm1, %v5285_v17 }
 0x6e5   :  { %5583 = vmatpush.bf16.msrb.mxu3 %v8483_v13 }
 0x767   :  { %v5344_v31 = vpop.f32.mrf.mxu3 }
 0x768   :  { %v5345_v40 = vadd.f32 %v5344_v31, %v5330_v18 }
 0x76a   :  { %v5348_v10 = vadd.f32 %v5345_v40, %v13030_v6 }
 0x76c   :  { %v5351_v20 = vsel %vm5350_vm5, %v5348_v10, 0.0 }
 0x76d   :  { %5352 = vadd.xlane.f32.xlu1 %v5351_v20  ;;  %v8478_v20 = vld [vmem:[%s13326_s5 + $0xa8] sm:$0xf] }
 0x76f   :  { %v5346_v32 = vpop.f32.mrf.mxu3 }
 0x770   :  { %v9179_v32 = vld [vmem:[%s13326_s5 + $0xb0] sm:$0xf0] }
 0x786   :  { %5449 = vrot.lane.b32.xlu1 %v8440_v29, %s9277_s30 }
 0x78e   :  { %5455 = vrot.lane.b32.xlu1 %v9200_v59, %s9277_s30 }
 0x7e0   :  { %v5353_v6 = vpop.xlane.xlu1 %5352 }
 0x7e1   :  { %v5361_v24 = vmul.f32 %v13096_v3, %v5353_v6  ;;  %v8471_v6 = vor.u32 %v9177_v14, %v8470_v36 }
 0x7e3   :  { %v5362_v27 = vsub.f32 %v5348_v10, %v5361_v24  ;;  %v8472_v24 = vld [vmem:[%s13326_s5 + $0x9c] sm:$0xf0] }
 0x7e5   :  { %v5363_v22 = vmul.f32 %v5362_v27, %v5362_v27 }
 0x7e7   :  { %v5364_v25 = vsel %vm5350_vm5, %v5363_v22, 0.0  ;;  %v9175_v22 = vld [vmem:[%s13326_s5 + $0x80] sm:$0xf0] }
 0x7e8   :  { %5365 = vadd.xlane.f32.xlu0 %v5364_v25  ;;  %v8475_v25 = vor.u32 %v9176_v23, %v8472_v24 }
 0x7ea   :  { %5584 = vmatpush.bf16.msrb.mxu3 %v8475_v25 }
 0x7ee   :  { %5585 = vmatpush.bf16.msrb.mxu3 %v8467_v30 }
 0x7f2   :  { %5586 = vmatpush.bf16.msrb.mxu3 %v8459_v15  ;;  %v8509_v15 = vld [vmem:[%s13326_s5 + $0x94] sm:$0xf] }
 0x7f8   :  { %v5450_v61 = vpop.permute.xlu1 %5449 }
 0x7f9   :  { %5465 = vmatpush.bf16.msra.mxu1 %v5450_v61 }
 0x7fc   :  { %5502 = vrot.lane.b32.xlu0 %v9201_v55, %s9277_s30 }
 0x7fd   :  { %5466 = vmatpush.bf16.msra.mxu1 %v5448_v60 }
 0x800   :  { %v5456_v7 = vpop.permute.xlu1 %5455 }
 0x801   :  { %5467 = vmatpush.bf16.msra.mxu1 %v5446_v62 }
 0x805   :  { %5468 = vmatpush.bf16.msra.mxu1 %v5444_v63 }
 0x85b   :  { %v5366_v58 = vpop.xlane.xlu0 %5365 }
 0x85c   :  { %v5367_v42 = vmul.f32 %v5366_v58, %v13096_v3 }
 0x85e   :  { %v5368_v43 = vadd.f32 1e-05, %v5367_v42 }
 0x860   :  { %9217 = vrsqrt.f32 %v5368_v43  ;;  %vm5375_vm8 = vweird.f32 %v5368_v43 }
 0x866   :  { %v9218_v8 = vpop.eup %9217 }
 0x867   :  { %v5370_v44 = vmul.f32 %v9218_v8, %v5368_v43  ;;  %vm5376_vm7 = vweird.f32 %v9218_v8 }
 0x868   :  { %vm5377_vm9 = vmor %vm5375_vm8, %vm5376_vm7 }
 0x869   :  { %v5371_v45 = vmul.f32 %v9218_v8, %v5370_v44 }
 0x86b   :  { %v5372_v46 = vmul.f32 0.5, %v5371_v45 }
 0x86d   :  { %v5373_v5 = vsub.f32 1.5, %v5372_v46 }
 0x86f   :  { %v5374_v47 = vmul.f32 %v9218_v8, %v5373_v5 }
 0x871   :  { %v5378_v49 = vsel %vm5377_vm9, %v9218_v8, %v5374_v47 }
 0x872   :  { %v5379_v0 = vmul.f32 %v5378_v49, %v5362_v27  ;;  %v8462_v27 = vld [vmem:[%s13326_s5 + $0x78] sm:$0xf]  ;;  %v5503_v49 = vpop.permute.xlu0 %5502 }
 0x873   :  { %v8463_v29 = vor.u32 %v9175_v22, %v8462_v27 }
 0x874   :  { %v5383_v53 = vmul.f32 %v9199_v35, %v5379_v0  ;;  %v8479_v35 = vor.u32 %v9179_v32, %v8478_v20 }
 0x876   :  { %v5387_v57 = vadd.f32 %v5385_v50, %v5383_v53  ;;  %5570 = vmatpush.bf16.msrb.mxu2 %v8479_v35 }
 0x878   :  { %v5388_v48 = vpack.c.bf16 %v5387_v57, %v5387_v57 }
 0x87a   :  { %8441 = vmatmul.msk.bf16.vlgmr.msra.gmra.mxu0 %vm5133_vm1, %v5388_v48  ;;  %5571 = vmatpush.bf16.msrb.mxu2 %v8471_v6 }
 0x87e   :  { %5572 = vmatpush.bf16.msrb.mxu2 %v8463_v29 }
 0x882   :  { %5573 = vmatpush.bf16.msrb.mxu2 %v8455_v38  ;;  %v8513_v38 = vld [vmem:[%s13326_s5 + $0xac] sm:$0xf] }
 0x8f7   :  { %v5437_v1 = vpop.f32.mrf.mxu0 }
 0x8f8   :  { %v5438_v2 = vadd.f32 %v9200_v59, %v5437_v1 }
 0x8fa   :  { %v5441_v19 = vmax.f32 %v5438_v2, 0.0 }
 0x8fc   :  { %v5442_v4 = vpack.c.bf16 %v5441_v19, %v5441_v19 }
 0x8fe   :  { %8442 = vmatmul.msk.bf16.vlgmr.msra.gmra.mxu1 %vm5133_vm1, %v5442_v4 }
 0x8ff   :  { %v5439_v51 = vpop.f32.mrf.mxu0 }
 0x97b   :  { %v5470_v9 = vpop.f32.mrf.mxu1 }
 0x97c   :  { %v5471_v12 = vadd.f32 %v5470_v9, %v5456_v7 }
 0x97e   :  { %v5474_v52 = vadd.f32 %v5471_v12, %v5387_v57  ;;  %v8451_v57 = vld [vmem:[%s13327_s6 + $0x5] sm:$0x3] }
 0x97f   :  { %v5519_v48 = vperm.slane %v8451_v57, 0  ;;  %v5520_v59 = vperm.slane %v8451_v57, 1 }
 0x980   :  { %v5476_v54 = vsel %vm5350_vm5, %v5474_v52, 0.0 }
 0x981   :  { %5477 = vadd.xlane.f32.xlu2 %v5476_v54 }
 0x983   :  { %v5472_v16 = vpop.f32.mrf.mxu1 }
 0x9f4   :  { %v5478_v17 = vpop.xlane.xlu2 %5477 }
 0x9f5   :  { %v5479_v18 = vmul.f32 %v5478_v17, %v13096_v3 }
 0x9f7   :  { %v5480_v31 = vsub.f32 %v5474_v52, %v5479_v18 }
 0x9f9   :  { %v5481_v40 = vmul.f32 %v5480_v31, %v5480_v31 }
 0x9fb   :  { %v5482_v10 = vsel %vm5350_vm5, %v5481_v40, 0.0 }
 0x9fc   :  { %5483 = vadd.xlane.f32.xlu1 %v5482_v10 }
 0xa6f   :  { %v5484_v56 = vpop.xlane.xlu1 %5483 }
 0xa70   :  { %v5485_v41 = vmul.f32 %v5484_v56, %v13096_v3  ;;  %v8514_v56 = vor.u32 %v9183_v39, %v8513_v38  ;;  %v9204_v38 = vld [vmem:[%s13327_s6 + $0x8] ss:$0 sm:$0xff] }
 0xa72   :  { %v5486_v58 = vadd.f32 1e-05, %v5485_v41  ;;  %v9182_v41 = vld [vmem:[%s13326_s5 + $0x9c] sm:$0xf0] }
 0xa74   :  { %9219 = vrsqrt.f32 %v5486_v58  ;;  %vm5493_vm11 = vweird.f32 %v5486_v58 }
 0xa7a   :  { %v9220_v42 = vpop.eup %9219 }
 0xa7b   :  { %v5488_v43 = vmul.f32 %v9220_v42, %v5486_v58  ;;  %vm5494_vm10 = vweird.f32 %v9220_v42  ;;  %v8510_v58 = vor.u32 %v9182_v41, %v8509_v15 }
 0xa7c   :  { %vm5495_vm12 = vmor %vm5493_vm11, %vm5494_vm10 }
 0xa7d   :  { %v5489_v8 = vmul.f32 %v9220_v42, %v5488_v43  ;;  %v9181_v43 = vld [vmem:[%s13326_s5 + $0x84] sm:$0xf0] }
 0xa7f   :  { %v5490_v44 = vmul.f32 0.5, %v5489_v8 }
 0xa81   :  { %v5491_v45 = vsub.f32 1.5, %v5490_v44 }
 0xa83   :  { %v5492_v46 = vmul.f32 %v9220_v42, %v5491_v45 }
 0xa85   :  { %v5496_v5 = vsel %vm5495_vm12, %v9220_v42, %v5492_v46  ;;  %v8505_v42 = vld [vmem:[%s13326_s5 + $0x7c] sm:$0xf]  ;;  %v8501_v46 = vld [vmem:[%s13326_s5 + $0x64] sm:$0xf] }
 0xa86   :  { %v5497_v47 = vmul.f32 %v5496_v5, %v5480_v31  ;;  %v8506_v8 = vor.u32 %v9181_v43, %v8505_v42  ;;  %v9180_v5 = vld [vmem:[%s13326_s5 + $0x6c] sm:$0xf0] }
 0xa88   :  { %v5501_v0 = vmul.f32 %v9201_v55, %v5497_v47  ;;  %v8502_v47 = vor.u32 %v9180_v5, %v8501_v46 }
 0xa8a   :  { %v13191_v50 = vadd.f32 %v5503_v49, %v5501_v0 }
 0xa8c   :  { %v5506_v53 = vpack.c.bf16 %v13191_v50, %v13191_v50 }
 0xa8e   :  { %8484 = vmatmul.msk.bf16.vlgmr.msrb.gmra.mxu2 %vm5133_vm1, %v5506_v53  ;;  %8485 = vmatmul.msk.bf16.vlgmr.msrb.gmra.mxu3 %vm5133_vm1, %v5506_v53 }
 0xb11   :  { %v5575_v60 = vpop.f32.mrf.mxu2  ;;  %v5588_v61 = vpop.f32.mrf.mxu3 }
 0xb12   :  { %v5576_v62 = vadd.f32 %v5575_v60, %v5519_v48  ;;  %v5589_v63 = vadd.f32 %v5588_v61, %v5520_v59  ;;  %v9202_v60 = vld [vmem:[%s13327_s6 + $0x6] ss:$0 sm:$0xff] }
 0xb14   :  { %v5592_v1 = vpack.c.bf16 %v5576_v62, %v5576_v62  ;;  %v5593_v2 = vpack.c.bf16 %v5589_v63, %v5589_v63 }
 0xb16   :  { %v5633_v19 = vsel %vm5205_vm2, %v5593_v2, 0  ;;  %5595 = vrot.lane.b32.xlu2 %v5592_v1, %s9277_s30  ;;  %5650 = vrot.lane.b32.xlu0 %v5592_v1, %s9278_s8 }
 0xb17   :  { %5642 = vmatpush.bf16.msrb.mxu1 %v5633_v19 }
 0xb19   :  { %v5577_v4 = vpop.f32.mrf.mxu2  ;;  %v5590_v51 = vpop.f32.mrf.mxu3 }
 0xb1e   :  { %5648 = vrot.lane.b32.xlu0 %v5592_v1, %s9279_s9 }
 0xb70   :  { %v5596_v7 = vpop.permute.xlu2 %5595 }
 0xb71   :  { %v5601_v9 = vsel %vm5031_vm0, %v5596_v7, 0 }
 0xb72   :  { %5610 = vmatpush.bf16.xpose.msrb.mxu0 %v5601_v9  ;;  %v9203_v9 = vld [vmem:[%s13327_s6 + $0x7] ss:$0 sm:$0xff] }
 0xb79   :  { %8486 = vmatmul.msk.bf16.vlgmr.msrb.gmra.mxu0 %vm5031_vm0, %v5592_v1 }
 0xb88   :  { %v5651_v12 = vpop.permute.xlu0 %5650 }
 0xb89   :  { %v5656_v52 = vsel %vm5031_vm0, %v5651_v12, 0 }
 0xb8a   :  { %5665 = vmatpush.bf16.xpose.msra.mxu2 %v5656_v52 }
 0xb90   :  { %v5649_v54 = vpop.permute.xlu0 %5648 }
 0xb91   :  { %8488 = vmatmul.msk.bf16.vlgmr.msra.gmra.mxu2 %vm5031_vm0, %v5649_v54 }
 0xbf6   :  { %v5612_v16 = vpop.f32.mrf.mxu0 }
 0xbf7   :  { %v5616_v55 = vmul.f32 0.17677669, %v5612_v16 }
 0xbf9   :  { %v5617_v17 = vsel %vm5188_vm3, %v5616_v55, -inf }
 0xbfa   :  { %5618 = vmax.xlane.f32.xlu0 %v5617_v17  ;;  %v9187_v17 = vld [vmem:[%s13326_s5 + $0xb8] sm:$0xf0] }
 0xbfe   :  { %v5614_v18 = vpop.f32.mrf.mxu0 }
 0xc0e   :  { %5747 = vrot.lane.b32.xlu0 %v8510_v58, %s9277_s30 }
 0xc14   :  { %v5667_v31 = vpop.f32.mrf.mxu2 }
 0xc15   :  { %v5671_v40 = vmul.f32 0.17677669, %v5667_v31  ;;  %v8536_v31 = vld [vmem:[%s13326_s5 + $0x98] sm:$0xf] }
 0xc16   :  { %5755 = vrot.lane.b32.xlu0 %v9202_v60, %s9277_s30 }
 0xc17   :  { %v5672_v10 = vsel %vm5188_vm3, %v5671_v40, -inf }
 0xc18   :  { %5673 = vmax.xlane.f32.xlu1 %v5672_v10  ;;  %v8532_v10 = vld [vmem:[%s13326_s5 + $0x80] sm:$0xf] }
 0xc1c   :  { %v5669_v20 = vpop.f32.mrf.mxu2 }
 0xc6d   :  { %v5619_v32 = vpop.xlane.xlu0 %5618 }
 0xc6e   :  { %v5620_v21 = vsub.f32 %v5616_v55, %v5619_v32  ;;  %v9185_v32 = vld [vmem:[%s13326_s5 + $0x88] sm:$0xf0] }
 0xc70   :  { %v5621_v35 = vmul.f32 1.442695, %v5620_v21  ;;  %v8533_v21 = vor.u32 %v9185_v32, %v8532_v10 }
 0xc72   :  { %9221 = vpow2.f32 %v5621_v35  ;;  %v8528_v35 = vld [vmem:[%s13326_s5 + $0x68] sm:$0xf] }
 0xc78   :  { %v9222_v11 = vpop.eup %9221 }
 0xc79   :  { %v5623_v13 = vsel %vm5188_vm3, %v9222_v11, 0.0 }
 0xc7a   :  { %5624 = vadd.xlane.f32.xlu2 %v5623_v13 }
 0xc80   :  { %v5748_v57 = vpop.permute.xlu0 %5747 }
 0xc88   :  { %v5756_v1 = vpop.permute.xlu0 %5755 }
 0xc8b   :  { %v5674_v36 = vpop.xlane.xlu1 %5673 }
 0xc8c   :  { %v5675_v14 = vsub.f32 %v5671_v40, %v5674_v36  ;;  %v9186_v40 = vld [vmem:[%s13326_s5 + $0xa0] sm:$0xf0] }
 0xc8d   :  { %v8537_v20 = vor.u32 %v9186_v40, %v8536_v31 }
 0xc8e   :  { %v5676_v23 = vmul.f32 1.442695, %v5675_v14 }
 0xc90   :  { %9223 = vpow2.f32 %v5676_v23 }
 0xc92   :  { %5743 = vrot.lane.b32.xlu2 %v8502_v47, %s9277_s30 }
 0xc96   :  { %v9224_v6 = vpop.eup %9223 }
 0xc97   :  { %v5678_v24 = vsel %vm5188_vm3, %v9224_v6, 0.0 }
 0xc98   :  { %5679 = vadd.xlane.f32.xlu1 %v5678_v24 }
 0xc9a   :  { %5802 = vrot.lane.b32.xlu2 %v9203_v9, %s9277_s30 }
 0xcb1   :  { %5685 = vrot.lane.b32.xlu1 %v5593_v2, %s9279_s9 }
 0xcb9   :  { %5749 = vrot.lane.b32.xlu1 %v8514_v56, %s9277_s30 }
 0xcc1   :  { %5745 = vrot.lane.b32.xlu1 %v8506_v8, %s9277_s30 }
 0xced   :  { %v5625_v27 = vpop.xlane.xlu2 %5624 }
 0xcee   :  { %9225 = vrcp.f32 %v5625_v27 }
 0xcf4   :  { %v9226_v22 = vpop.eup %9225 }
 0xcf5   :  { %v5627_v25 = vmul.f32 %v9226_v22, %v9222_v11  ;;  %v5744_v59 = vpop.permute.xlu2 %5743  ;;  %v9184_v11 = vld [vmem:[%s13326_s5 + $0x70] sm:$0xf0] }
 0xcf6   :  { %v8529_v13 = vor.u32 %v9184_v11, %v8528_v35 }
 0xcf7   :  { %v5628_v26 = vpack.c.bf16 %v5627_v25, %v5627_v25 }
 0xcf9   :  { %8487 = vmatmul.msk.bf16.vlgmr.msrb.gmra.mxu1 %vm5201_vm4, %v5628_v26 }
 0xd0b   :  { %v5680_v28 = vpop.xlane.xlu1 %5679 }
 0xd0c   :  { %9227 = vrcp.f32 %v5680_v28 }
 0xd12   :  { %v9228_v29 = vpop.eup %9227 }
 0xd13   :  { %v5682_v30 = vmul.f32 %v9228_v29, %v9224_v6 }
 0xd15   :  { %v5683_v37 = vpack.c.bf16 %v5682_v30, %v5682_v30  ;;  %v5803_v30 = vpop.permute.xlu2 %5802 }
 0xd23   :  { %v5686_v34 = vpop.permute.xlu1 %5685 }
 0xd24   :  { %v5691_v33 = vsel %vm5205_vm2, %v5686_v34, 0 }
 0xd25   :  { %5700 = vmatpush.bf16.msra.mxu3 %v5691_v33 }
 0xd28   :  { %8489 = vmatmul.msk.bf16.vlgmr.msra.gmra.mxu3 %vm5201_vm4, %v5683_v37  ;;  %vm5975_vm4 = vcmask 125952  }
 0xd2b   :  { %v5750_v53 = vpop.permute.xlu1 %5749 }
 0xd2c   :  { %5765 = vmatpush.bf16.msra.mxu0 %v5750_v53  ;;  %v9205_v53 = vld [vmem:[%s13327_s6 + $0x9] ss:$0 sm:$0xff] }
 0xd30   :  { %5766 = vmatpush.bf16.msra.mxu0 %v5748_v57 }
 0xd33   :  { %v5746_v48 = vpop.permute.xlu1 %5745 }
 0xd34   :  { %5767 = vmatpush.bf16.msra.mxu0 %v5746_v48 }
 0xd38   :  { %5768 = vmatpush.bf16.msra.mxu0 %v5744_v59 }
 0xd76   :  { %v5644_v44 = vpop.f32.mrf.mxu1 }
 0xd7e   :  { %v5646_v45 = vpop.f32.mrf.mxu1 }
 0xdab   :  { %v5702_v49 = vpop.f32.mrf.mxu3 }
 0xdac   :  { %5707 = vrot.lane.b32.xlu1 %v5702_v49, %s9278_s8 }
 0xdb3   :  { %v5704_v0 = vpop.f32.mrf.mxu3 }
 0xe1e   :  { %v5708_v61 = vpop.permute.xlu1 %5707 }
 0xe1f   :  { %v5710_v62 = vsel %vm5031_vm0, %v5644_v44, %v5708_v61 }
 0xe20   :  { %v5711_v63 = vpack.c.bf16 %v5710_v62, %v5710_v62  ;;  %v9191_v62 = vld [vmem:[%s13324_s3 + $0xa8] sm:$0xff] }
 0xe21   :  { %5966 = vmatpush.bf16.msrb.mxu3 %v9191_v62 }
 0xe22   :  { %8515 = vmatmul.msk.bf16.vlgmr.msra.gmra.mxu0 %vm5133_vm1, %v5711_v63  ;;  %v9190_v63 = vld [vmem:[%s13324_s3 + $0xa0] sm:$0xff] }
 0xe25   :  { %5967 = vmatpush.bf16.msrb.mxu3 %v9190_v63 }
 0xe9f   :  { %v5770_v2 = vpop.f32.mrf.mxu0 }
 0xea0   :  { %v5771_v19 = vadd.f32 %v5770_v2, %v5756_v1  ;;  %v9189_v1 = vld [vmem:[%s13324_s3 + $0x98] sm:$0xff]  ;;  %v9188_v2 = vld [vmem:[%s13324_s3 + $0x90] sm:$0xff] }
 0xea1   :  { %5968 = vmatpush.bf16.msrb.mxu3 %v9189_v1 }
 0xea2   :  { %v5774_v4 = vadd.f32 %v5771_v19, %v13191_v50  ;;  %v8540_v50 = vld [vmem:[%s13326_s5 + $0xb0] sm:$0xf] }
 0xea3   :  { %v8541_v18 = vor.u32 %v9187_v17, %v8540_v50 }
 0xea4   :  { %v5776_v51 = vsel %vm5350_vm5, %v5774_v4, 0.0 }
 0xea5   :  { %5777 = vadd.xlane.f32.xlu1 %v5776_v51  ;;  %5850 = vmatpush.bf16.msra.mxu1 %v8541_v18 }
 0xea6   :  { %5867 = vrot.lane.b32.xlu2 %v8541_v18, %s9277_s30  ;;  %5969 = vmatpush.bf16.msrb.mxu3 %v9188_v2 }
 0xea7   :  { %v5772_v7 = vpop.f32.mrf.mxu0 }
 0xea9   :  { %5851 = vmatpush.bf16.msra.mxu1 %v8537_v20 }
 0xead   :  { %5852 = vmatpush.bf16.msra.mxu1 %v8533_v21 }
 0xeae   :  { %5865 = vrot.lane.b32.xlu2 %v8537_v20, %s9277_s30 }
 0xeb1   :  { %5853 = vmatpush.bf16.msra.mxu1 %v8529_v13 }
 0xeb6   :  { %5861 = vrot.lane.b32.xlu2 %v8529_v13, %s9277_s30 }
 0xebe   :  { %5863 = vrot.lane.b32.xlu1 %v8533_v21, %s9277_s30 }
 0xf00   :  { %v5868_v39 = vpop.permute.xlu2 %5867 }
 0xf01   :  { %5883 = vmatpush.bf16.msrb.mxu2 %v5868_v39 }
 0xf08   :  { %v5866_v15 = vpop.permute.xlu2 %5865 }
 0xf09   :  { %5884 = vmatpush.bf16.msrb.mxu2 %v5866_v15 }
 0xf10   :  { %v5862_v41 = vpop.permute.xlu2 %5861 }
 0xf18   :  { %v5778_v12 = vpop.xlane.xlu1 %5777 }
 0xf19   :  { %v5779_v52 = vmul.f32 %v5778_v12, %v13096_v3 }
 0xf1b   :  { %v5780_v54 = vsub.f32 %v5774_v4, %v5779_v52 }
 0xf1d   :  { %v5781_v16 = vmul.f32 %v5780_v54, %v5780_v54 }
 0xf1f   :  { %v5782_v55 = vsel %vm5350_vm5, %v5781_v16, 0.0 }
 0xf20   :  { %5783 = vadd.xlane.f32.xlu0 %v5782_v55 }
 0xf30   :  { %v5864_v56 = vpop.permute.xlu1 %5863 }
 0xf31   :  { %5885 = vmatpush.bf16.msrb.mxu2 %v5864_v56 }
 0xf34   :  { %5873 = vrot.lane.b32.xlu0 %v9204_v38, %s9277_s30 }
 0xf35   :  { %5886 = vmatpush.bf16.msrb.mxu2 %v5862_v41 }
 0xf3c   :  { %5920 = vrot.lane.b32.xlu0 %v9205_v53, %s9277_s30 }
 0xf93   :  { %v5784_v36 = vpop.xlane.xlu0 %5783 }
 0xf94   :  { %v5785_v14 = vmul.f32 %v5784_v36, %v13096_v3 }
 0xf96   :  { %v5786_v23 = vadd.f32 1e-05, %v5785_v14 }
 0xf98   :  { %9229 = vrsqrt.f32 %v5786_v23  ;;  %vm5793_vm14 = vweird.f32 %v5786_v23 }
 0xf9e   :  { %v9230_v6 = vpop.eup %9229 }
 0xf9f   :  { %v5788_v24 = vmul.f32 %v9230_v6, %v5786_v23  ;;  %vm5794_vm13 = vweird.f32 %v9230_v6 }
 0xfa0   :  { %vm5795_vm15 = vmor %vm5793_vm14, %vm5794_vm13 }
 0xfa1   :  { %v5789_v27 = vmul.f32 %v9230_v6, %v5788_v24 }
 0xfa3   :  { %v5790_v22 = vmul.f32 0.5, %v5789_v27 }
 0xfa5   :  { %v5791_v25 = vsub.f32 1.5, %v5790_v22 }
 0xfa6   :  { %v5874_v45 = vpop.permute.xlu0 %5873 }
 0xfa7   :  { %v5792_v26 = vmul.f32 %v9230_v6, %v5791_v25 }
 0xfa9   :  { %v5796_v28 = vsel %vm5795_vm15, %v9230_v6, %v5792_v26 }
 0xfaa   :  { %v5797_v29 = vmul.f32 %v5796_v28, %v5780_v54 }
 0xfac   :  { %v5801_v34 = vmul.f32 %v9203_v9, %v5797_v29 }
 0xfae   :  { %v5805_v33 = vadd.f32 %v5803_v30, %v5801_v34  ;;  %v5921_v17 = vpop.permute.xlu0 %5920 }
 0xfb0   :  { %v5806_v37 = vpack.c.bf16 %v5805_v33, %v5805_v33 }
 0xfb2   :  { %8542 = vmatmul.msk.bf16.vlgmr.msra.gmra.mxu1 %vm5133_vm1, %v5806_v37 }
0x102f   :  { %v5855_v58 = vpop.f32.mrf.mxu1 }
0x1030   :  { %v5856_v42 = vadd.f32 %v9204_v38, %v5855_v58 }
0x1032   :  { %v5859_v43 = vmax.f32 %v5856_v42, 0.0 }
0x1034   :  { %v5860_v8 = vpack.c.bf16 %v5859_v43, %v5859_v43 }
0x1036   :  { %8543 = vmatmul.msk.bf16.vlgmr.msrb.gmra.mxu2 %vm5133_vm1, %v5860_v8 }
0x1037   :  { %v5857_v44 = vpop.f32.mrf.mxu1 }
0x10b9   :  { %v5888_v46 = vpop.f32.mrf.mxu2 }
0x10ba   :  { %v5889_v5 = vadd.f32 %v5888_v46, %v5874_v45 }
0x10bc   :  { %v5892_v47 = vadd.f32 %v5889_v5, %v5805_v33 }
0x10be   :  { %v5894_v49 = vsel %vm5350_vm5, %v5892_v47, 0.0 }
0x10bf   :  { %5895 = vadd.xlane.f32.xlu2 %v5894_v49 }
0x10c1   :  { %v5890_v0 = vpop.f32.mrf.mxu2 }
0x1132   :  { %v5896_v57 = vpop.xlane.xlu2 %5895 }
0x1133   :  { %v5897_v48 = vmul.f32 %v5896_v57, %v13096_v3 }
0x1135   :  { %v5898_v59 = vsub.f32 %v5892_v47, %v5897_v48 }
0x1137   :  { %v5899_v60 = vmul.f32 %v5898_v59, %v5898_v59 }
0x1139   :  { %v5900_v61 = vsel %vm5350_vm5, %v5899_v60, 0.0 }
0x113a   :  { %5901 = vadd.xlane.f32.xlu1 %v5900_v61 }
0x11ad   :  { %v5902_v19 = vpop.xlane.xlu1 %5901 }
0x11ae   :  { %v5903_v4 = vmul.f32 %v5902_v19, %v13096_v3  ;;  %v9206_v3 = vld [vmem:[%s13325_s4 + $0x5] ss:$0 sm:$0xff] }
0x11b0   :  { %v5904_v51 = vadd.f32 1e-05, %v5903_v4 }
0x11b2   :  { %9231 = vrsqrt.f32 %v5904_v51  ;;  %vm5911_vm2 = vweird.f32 %v5904_v51 }
0x11b8   :  { %v9232_v7 = vpop.eup %9231 }
0x11b9   :  { %v5906_v9 = vmul.f32 %v9232_v7, %v5904_v51  ;;  %vm5912_vm0 = vweird.f32 %v9232_v7 }
0x11ba   :  { %vm5913_vm3 = vmor %vm5911_vm2, %vm5912_vm0 }
0x11bb   :  { %v5907_v12 = vmul.f32 %v9232_v7, %v5906_v9 }
0x11bd   :  { %v5908_v52 = vmul.f32 0.5, %v5907_v12 }
0x11bf   :  { %v5909_v54 = vsub.f32 1.5, %v5908_v52 }
0x11c1   :  { %v5910_v16 = vmul.f32 %v9232_v7, %v5909_v54 }
0x11c3   :  { %v5914_v55 = vsel %vm5913_vm3, %v9232_v7, %v5910_v16 }
0x11c4   :  { %v5915_v50 = vmul.f32 %v5914_v55, %v5898_v59 }
0x11c6   :  { %v5919_v18 = vmul.f32 %v9205_v53, %v5915_v50 }
0x11c8   :  { %v5923_v31 = vadd.f32 %v5921_v17, %v5919_v18 }
0x11ca   :  { %v5924_v40 = vpack.c.bf16 %v5923_v31, %v5923_v31 }
0x11cc   :  { %8561 = vmatmul.msk.bf16.vlgmr.msrb.gmra.mxu3 %vm5133_vm1, %v5924_v40 }
0x124f   :  { %v5971_v10 = vpop.f32.mrf.mxu3 }
0x1250   :  { %v5972_v20 = vadd.f32 %v9206_v3, %v5971_v10 }
0x1252   :  { %5976 = vst.msk [vmem:[#allocation2] sm:$0xf] %vm5975_vm4, %v5972_v20 }
0x1253   :  { %5987 = dma.vmem_to_hbm [thread:$0]  %s5983_s12, 64, %s5985_s1, [#allocation3]  }
0x1257   :  { %v5973_v32 = vpop.f32.mrf.mxu3 }
0x1258   :  { %9275 = dma.done.wait [#allocation3], 64  }
0x1259   :  { %9276 = vsyncadd [#allocation3], 4294967232 }
0x125a   :  { %5992 = vsyncpa [#allocation3], 1 }

</bundles_post_ra>
